<compile_context>
chip_gen: v5e
topology: v5e:2x2
jax: 0.10.0
libtpu: 0.0.40
codegen_flags: <defaults>
</compile_context>

<pallas_src>
import math
import functools

import jax
import jax.numpy as jnp
from jax import lax
from jax.experimental import pallas as pl
from jax.experimental.pallas import tpu as pltpu


# ----------------------------------------------------------------------------
# Pallas kernel: one batch element per grid step.
# ----------------------------------------------------------------------------
def _bottleneck_kernel(x_ref, w1_ref, s1_ref, b1_ref,
                       w2_ref, s2_ref, b2_ref,
                       w3_ref, s3_ref, b3_ref,
                       out_ref, acc_ref, pad_ref):
    H, W, Cin = x_ref.shape            # batch dim squeezed out by BlockSpec
    D = w1_ref.shape[1]
    Cout = w3_ref.shape[1]
    M = H * W
    P = (pad_ref.shape[0] - M) // 2    # zero-border rows on each side

    x2d = x_ref[...].reshape(M, Cin)   # f32, also the residual source

    # --- conv_reduce (1x1) + bn_reduce + relu   (bf16 MXU in, f32 accum) ----
    h1 = jnp.dot(x2d.astype(jnp.bfloat16), w1_ref[...],
                 preferred_element_type=jnp.float32)            # (M, D)
    h1 = jnp.maximum(h1 * s1_ref[...] + b1_ref[...], 0.0)

    # --- stage h1 in a row-padded buffer; only the border rows are zeroed ---
    pad_ref[0:P, :] = jnp.zeros((P, D), jnp.float32)
    pad_ref[P + M:P + M + P, :] = jnp.zeros((P, D), jnp.float32)
    pad_ref[P:P + M, :] = h1

    # column-boundary masks (row wrap is handled by the zero rows in pad_ref)
    w_idx = lax.broadcasted_iota(jnp.int32, (M, 1), 0) % W
    m_left = (w_idx >= 1).astype(jnp.float32)        # needed when dw == -1
    m_right = (w_idx <= W - 2).astype(jnp.float32)   # needed when dw == +1

    # --- grouped 3x3 conv: 9 block-diagonal (D,D) matmuls on shifted taps ---
    first = True
    for dh in (-1, 0, 1):
        for dw in (-1, 0, 1):
            start = P + dh * W + dw
            tap = pad_ref[start:start + M, :]                   # (M, D) f32
            if dw == -1:
                tap = tap * m_left
            elif dw == 1:
                tap = tap * m_right
            contrib = jnp.dot(tap.astype(jnp.bfloat16),
                              w2_ref[dh + 1, dw + 1],
                              preferred_element_type=jnp.float32)
            if first:
                acc_ref[...] = contrib
                first = False
            else:
                acc_ref[...] += contrib

    h2 = jnp.maximum(acc_ref[...] * s2_ref[...] + b2_ref[...], 0.0)

    # --- conv_expand (1x1) + bn_expand --------------------------------------
    h3 = jnp.dot(h2.astype(jnp.bfloat16), w3_ref[...],
                 preferred_element_type=jnp.float32)            # (M, Cout)
    h3 = h3 * s3_ref[...] + b3_ref[...]

    # --- identity residual + relu (Cin == Cout) -----------------------------
    out = jnp.maximum(x2d + h3, 0.0)
    out_ref[...] = out.reshape(H, W, Cout).astype(out_ref.dtype)


# ----------------------------------------------------------------------------
# Wrapper: NHWC activations, weight repacking, pallas_call plumbing.
# ----------------------------------------------------------------------------
def bayes_resnext_bottleneck(x_nhwc, params, cardinality):
    N, H, W, Cin = x_nhwc.shape
    w_reduce = params["w_reduce"]      # (D, Cin, 1, 1)   OIHW
    w_conv = params["w_conv"]          # (D, D//G, 3, 3)  OIHW, grouped
    w_expand = params["w_expand"]      # (Cout, D, 1, 1)  OIHW
    D = w_reduce.shape[0]
    Cout = w_expand.shape[0]
    G = cardinality
    gs = D // G
    if Cin != Cout:
        raise ValueError("identity residual requires Cin == Cout "
                         "(stride=1, downsample=None)")

    # 1x1 convs become (Cin, D) / (D, Cout) matmuls; bf16 MXU operands.
    w1 = w_reduce.reshape(D, Cin).T.astype(jnp.bfloat16)
    w3 = w_expand.reshape(Cout, D).T.astype(jnp.bfloat16)

    # Grouped 3x3 conv -> one block-diagonal (D, D) weight per tap (kh, kw).
    # w2g[kh, kw, g, i, o] = w_conv[g*gs + o, i, kh, kw]
    w2g = jnp.transpose(w_conv.reshape(G, gs, gs, 3, 3), (3, 4, 0, 2, 1))
    w2 = jnp.einsum("khgio,gq->khgiqo", w2g, jnp.eye(G, dtype=w2g.dtype))
    w2 = w2.reshape(3, 3, D, D).astype(jnp.bfloat16)

    def fold(name):
        s, b = params[name]
        return (s.reshape(1, -1).astype(jnp.float32),
                b.reshape(1, -1).astype(jnp.float32))

    s1, b1 = fold("bn1")
    s2, b2 = fold("bn2")
    s3, b3 = fold("bn3")

    M = H * W
    P = pl.cdiv(W + 1, 8) * 8          # sublane-aligned zero border (>= W+1)

    const2 = lambda n: (0, 0)
    const4 = lambda n: (0, 0, 0, 0)

    out_nhwc = pl.pallas_call(
        _bottleneck_kernel,
        out_shape=jax.ShapeDtypeStruct((N, H, W, Cout), x_nhwc.dtype),
        grid_spec=pltpu.PrefetchScalarGridSpec(
            num_scalar_prefetch=0,
            grid=(N,),
            in_specs=[
                pl.BlockSpec((None, H, W, Cin), lambda n: (n, 0, 0, 0)),
                pl.BlockSpec((Cin, D), const2),        # w1  (resident)
                pl.BlockSpec((1, D), const2),          # s1
                pl.BlockSpec((1, D), const2),          # b1
                pl.BlockSpec((3, 3, D, D), const4),    # w2  (resident)
                pl.BlockSpec((1, D), const2),          # s2
                pl.BlockSpec((1, D), const2),          # b2
                pl.BlockSpec((D, Cout), const2),       # w3  (resident)
                pl.BlockSpec((1, Cout), const2),       # s3
                pl.BlockSpec((1, Cout), const2),       # b3
            ],
            out_specs=pl.BlockSpec((None, H, W, Cout), lambda n: (n, 0, 0, 0)),
            scratch_shapes=[
                pltpu.VMEM((M, D), jnp.float32),          # grouped-conv accum
                pltpu.VMEM((M + 2 * P, D), jnp.float32),  # row-padded h1
            ]),
        compiler_params=pltpu.CompilerParams(
            dimension_semantics=("parallel",),
            vmem_limit_bytes=32 * 1024 * 1024),
    )(x_nhwc, w1, s1, b1, w2, s2, b2, w3, s3, b3)
    return out_nhwc


# ----------------------------------------------------------------------------
# Deterministic parameter construction (BBBConv2d sample=True path).
# ----------------------------------------------------------------------------
def init_params(key, inplanes, planes, cardinality, base_width):
    dim = int(math.floor(planes * (base_width / 64.0)))
    D = dim * cardinality
    Cout = planes * 4
    assert Cout == inplanes, "identity residual requires inplanes == planes*4"
    assert D % cardinality == 0

    ks = jax.random.split(key, 9)

    def bayes_weight(kmu, keps, shape):
        mu = 0.1 * jax.random.normal(kmu, shape, jnp.float32)
        rho = jnp.full(shape, -3.0, jnp.float32)
        sigma = jnp.log1p(jnp.exp(rho))                  # softplus
        eps = jax.random.normal(keps, shape, jnp.float32)
        return mu + sigma * eps                          # sampled weight

    def bn_affine(k, C):
        k1, k2, k3, k4 = jax.random.split(k, 4)
        gamma = 1.0 + 0.1 * jax.random.normal(k1, (C,), jnp.float32)
        beta = 0.1 * jax.random.normal(k2, (C,), jnp.float32)
        mean = 0.1 * jax.random.normal(k3, (C,), jnp.float32)
        var = jnp.abs(jax.random.normal(k4, (C,), jnp.float32)) + 0.5
        scale = gamma / jnp.sqrt(var + 1e-5)
        bias = beta - mean * scale
        return scale, bias

    return {
        "w_reduce": bayes_weight(ks[0], ks[1], (D, inplanes, 1, 1)),
        "w_conv": bayes_weight(ks[2], ks[3], (D, D // cardinality, 3, 3)),
        "w_expand": bayes_weight(ks[4], ks[5], (Cout, D, 1, 1)),
        "bn1": bn_affine(ks[6], D),
        "bn2": bn_affine(ks[7], D),
        "bn3": bn_affine(ks[8], Cout),
    }


# ----------------------------------------------------------------------------
# Pure-JAX reference (lax.conv, NHWC) mirroring the kernel's bf16-input /
# f32-accumulate numerics.
# ----------------------------------------------------------------------------
def reference(x_nhwc, params, cardinality):
    dn = ("NHWC", "HWIO", "NHWC")

    def conv(h, w_oihw, groups=1, pad="VALID"):
        w = jnp.transpose(w_oihw, (2, 3, 1, 0)).astype(jnp.bfloat16)
        return lax.conv_general_dilated(
            h.astype(jnp.bfloat16), w, (1, 1), pad, dimension_numbers=dn,
            feature_group_count=groups, preferred_element_type=jnp.float32)

    def bn(h, name):
        s, b = params[name]
        return h * s[None, None, None, :] + b[None, None, None, :]

    h = jax.nn.relu(bn(conv(x_nhwc, params["w_reduce"]), "bn1"))
    h = jax.nn.relu(bn(conv(h, params["w_conv"], groups=cardinality,
                            pad="SAME"), "bn2"))
    h = bn(conv(h, params["w_expand"]), "bn3")
    return jax.nn.relu(x_nhwc + h)


if __name__ == "__main__":
    # Bottleneck config: inplanes=128, planes=32, cardinality=4, base_width=64
    #   -> dim = 32, D = dim*cardinality = 128, out channels = planes*4 = 128
    # (channel widths chosen = 128 so every matmul/store is lane-dense)
    inplanes, planes, cardinality, base_width = 128, 32, 4, 64
    N, H, W = 2, 16, 16

    key = jax.random.PRNGKey(0)
    kp, kx = jax.random.split(key)
    params = init_params(kp, inplanes, planes, cardinality, base_width)
    x = jax.random.normal(kx, (N, H, W, inplanes), jnp.float32)   # NHWC

    run = jax.jit(functools.partial(bayes_resnext_bottleneck,
                                    cardinality=cardinality))
    out = jax.block_until_ready(run(x, params))

    ref = reference(x, params, cardinality)
    assert out.shape == (N, H, W, planes * 4)
    max_err = jnp.max(jnp.abs(out - ref))
    assert jnp.allclose(out, ref, atol=1e-2, rtol=1e-2), \
        f"max abs err {max_err}"

    print("KERNEL_OK")
</pallas_src>

<mosaic_0001>
module attributes {stable_mosaic.version = 11 : i64} {
  func.func @_bottleneck_kernel(%arg0: i32, %arg1: memref<1x16x16x128xf32, #tpu.memory_space<vmem>>, %arg2: memref<128x128xbf16, #tpu.memory_space<vmem>>, %arg3: memref<1x128xf32, #tpu.memory_space<vmem>>, %arg4: memref<1x128xf32, #tpu.memory_space<vmem>>, %arg5: memref<3x3x128x128xbf16, #tpu.memory_space<vmem>>, %arg6: memref<1x128xf32, #tpu.memory_space<vmem>>, %arg7: memref<1x128xf32, #tpu.memory_space<vmem>>, %arg8: memref<128x128xbf16, #tpu.memory_space<vmem>>, %arg9: memref<1x128xf32, #tpu.memory_space<vmem>>, %arg10: memref<1x128xf32, #tpu.memory_space<vmem>>, %arg11: memref<1x16x16x128xf32, #tpu.memory_space<vmem>>, %arg12: memref<256x128xf32, #tpu.memory_space<vmem>>, %arg13: memref<304x128xf32, #tpu.memory_space<vmem>>) attributes {dimension_semantics = [#tpu.dimension_semantics<parallel>], iteration_bounds = array<i64: 2>, scalar_prefetch = 0 : i64, scratch_operands = 2 : i64, tpu.core_type = #tpu.core_type<tc>, window_params = [{transform_indices = @transform_0, window_bounds = array<i64: 1, 16, 16, 128>}, {pipeline_mode = #tpu.pipeline_mode<synchronous>, transform_indices = @transform_1, window_bounds = array<i64: 128, 128>}, {pipeline_mode = #tpu.pipeline_mode<synchronous>, transform_indices = @transform_2, window_bounds = array<i64: 1, 128>}, {pipeline_mode = #tpu.pipeline_mode<synchronous>, transform_indices = @transform_3, window_bounds = array<i64: 1, 128>}, {pipeline_mode = #tpu.pipeline_mode<synchronous>, transform_indices = @transform_4, window_bounds = array<i64: 3, 3, 128, 128>}, {pipeline_mode = #tpu.pipeline_mode<synchronous>, transform_indices = @transform_5, window_bounds = array<i64: 1, 128>}, {pipeline_mode = #tpu.pipeline_mode<synchronous>, transform_indices = @transform_6, window_bounds = array<i64: 1, 128>}, {pipeline_mode = #tpu.pipeline_mode<synchronous>, transform_indices = @transform_7, window_bounds = array<i64: 128, 128>}, {pipeline_mode = #tpu.pipeline_mode<synchronous>, transform_indices = @transform_8, window_bounds = array<i64: 1, 128>}, {pipeline_mode = #tpu.pipeline_mode<synchronous>, transform_indices = @transform_9, window_bounds = array<i64: 1, 128>}, {transform_indices = @transform_10, window_bounds = array<i64: 1, 16, 16, 128>}]} {
    %c0 = arith.constant 0 : index
    %c0_0 = arith.constant 0 : index
    %c0_1 = arith.constant 0 : index
    %c0_2 = arith.constant 0 : index
    %0 = vector.load %arg1[%c0, %c0_0, %c0_1, %c0_2] : memref<1x16x16x128xf32, #tpu.memory_space<vmem>>, vector<1x16x16x128xf32>
    %1 = vector.shape_cast %0 : vector<1x16x16x128xf32> to vector<16x16x128xf32>
    %2 = vector.shape_cast %1 : vector<16x16x128xf32> to vector<256x128xf32>
    %3 = arith.truncf %2 : vector<256x128xf32> to vector<256x128xbf16>
    %c0_3 = arith.constant 0 : index
    %c0_4 = arith.constant 0 : index
    %4 = vector.load %arg2[%c0_3, %c0_4] : memref<128x128xbf16, #tpu.memory_space<vmem>>, vector<128x128xbf16>
    %cst = arith.constant dense<0.000000e+00> : vector<256x128xf32>
    %5 = tpu.matmul %3, %4, %cst {dimension_numbers = #tpu.dot_dimension_numbers<[1], [0], [0], [1], [0, 0, 1, 1], [], []>} : vector<256x128xbf16>, vector<128x128xbf16>, vector<256x128xf32> -> vector<256x128xf32>
    %c0_5 = arith.constant 0 : index
    %c0_6 = arith.constant 0 : index
    %6 = vector.load %arg3[%c0_5, %c0_6] : memref<1x128xf32, #tpu.memory_space<vmem>>, vector<1x128xf32>
    %7 = vector.broadcast %6 : vector<1x128xf32> to vector<256x128xf32>
    %8 = arith.mulf %5, %7 : vector<256x128xf32>
    %c0_7 = arith.constant 0 : index
    %c0_8 = arith.constant 0 : index
    %9 = vector.load %arg4[%c0_7, %c0_8] : memref<1x128xf32, #tpu.memory_space<vmem>>, vector<1x128xf32>
    %10 = vector.broadcast %9 : vector<1x128xf32> to vector<256x128xf32>
    %11 = arith.addf %8, %10 : vector<256x128xf32>
    %cst_9 = arith.constant 0.000000e+00 : f32
    %12 = vector.broadcast %cst_9 : f32 to vector<256x128xf32>
    %13 = arith.maximumf %11, %12 : vector<256x128xf32>
    %cst_10 = arith.constant 0.000000e+00 : f32
    %14 = vector.broadcast %cst_10 : f32 to vector<24x128xf32>
    %c0_11 = arith.constant 0 : index
    %c0_12 = arith.constant 0 : index
    %15 = vector.load %arg13[%c0_11, %c0_12] : memref<304x128xf32, #tpu.memory_space<vmem>>, vector<24x128xf32>
    tpu.vector_store %arg13[%c0_11, %c0_12], %14 {strides = array<i32>} : memref<304x128xf32, #tpu.memory_space<vmem>>, vector<24x128xf32>,
    %cst_13 = arith.constant 0.000000e+00 : f32
    %16 = vector.broadcast %cst_13 : f32 to vector<24x128xf32>
    %c280 = arith.constant 280 : index
    %c0_14 = arith.constant 0 : index
    %17 = vector.load %arg13[%c280, %c0_14] : memref<304x128xf32, #tpu.memory_space<vmem>>, vector<24x128xf32>
    tpu.vector_store %arg13[%c280, %c0_14], %16 {strides = array<i32>} : memref<304x128xf32, #tpu.memory_space<vmem>>, vector<24x128xf32>,
    %c24 = arith.constant 24 : index
    %c0_15 = arith.constant 0 : index
    %18 = vector.load %arg13[%c24, %c0_15] : memref<304x128xf32, #tpu.memory_space<vmem>>, vector<256x128xf32>
    tpu.vector_store %arg13[%c24, %c0_15], %13 {strides = array<i32>} : memref<304x128xf32, #tpu.memory_space<vmem>>, vector<256x128xf32>,
    %19 = tpu.iota {dimensions = array<i32: 0>} : vector<256x1xi32>
    %c16_i32 = arith.constant 16 : i32
    %c0_i32 = arith.constant 0 : i32
    %20 = arith.cmpi eq, %c16_i32, %c0_i32 : i32
    %c1_i32 = arith.constant 1 : i32
    %21 = arith.select %20, %c1_i32, %c16_i32 : i32
    %22 = vector.broadcast %21 : i32 to vector<256x1xi32>
    %23 = arith.remsi %19, %22 : vector<256x1xi32>
    %c0_i32_16 = arith.constant 0 : i32
    %24 = vector.broadcast %c0_i32_16 : i32 to vector<256x1xi32>
    %25 = arith.cmpi ne, %23, %24 : vector<256x1xi32>
    %c0_i32_17 = arith.constant 0 : i32
    %26 = vector.broadcast %c0_i32_17 : i32 to vector<256x1xi32>
    %27 = arith.cmpi slt, %23, %26 : vector<256x1xi32>
    %c0_i32_18 = arith.constant 0 : i32
    %28 = arith.cmpi slt, %21, %c0_i32_18 : i32
    %29 = vector.broadcast %28 : i1 to vector<256x1xi1>
    %30 = vector.broadcast %29 : vector<256x1xi1> to vector<256x1xi1>
    %31 = arith.xori %27, %30 : vector<256x1xi1>
    %32 = arith.andi %31, %25 : vector<256x1xi1>
    %33 = vector.broadcast %21 : i32 to vector<256x1xi32>
    %34 = arith.addi %23, %33 : vector<256x1xi32>
    %35 = arith.select %32, %34, %23 : vector<256x1xi1>, vector<256x1xi32>
    %c1_i32_19 = arith.constant 1 : i32
    %36 = vector.broadcast %c1_i32_19 : i32 to vector<256x1xi32>
    %37 = arith.cmpi sge, %35, %36 : vector<256x1xi32>
    %38 = arith.extui %37 : vector<256x1xi1> to vector<256x1xi32>
    %39 = arith.sitofp %38 : vector<256x1xi32> to vector<256x1xf32>
    %c14_i32 = arith.constant 14 : i32
    %40 = vector.broadcast %c14_i32 : i32 to vector<256x1xi32>
    %41 = arith.cmpi sle, %35, %40 : vector<256x1xi32>
    %42 = arith.extui %41 : vector<256x1xi1> to vector<256x1xi32>
    %43 = arith.sitofp %42 : vector<256x1xi32> to vector<256x1xf32>
    %c7 = arith.constant 7 : index
    %c0_20 = arith.constant 0 : index
    %44 = vector.load %arg13[%c7, %c0_20] : memref<304x128xf32, #tpu.memory_space<vmem>>, vector<256x128xf32>
    %45 = vector.broadcast %39 : vector<256x1xf32> to vector<256x128xf32>
    %46 = arith.mulf %44, %45 : vector<256x128xf32>
    %47 = arith.truncf %46 : vector<256x128xf32> to vector<256x128xbf16>
    %c0_21 = arith.constant 0 : index
    %c0_22 = arith.constant 0 : index
    %c0_23 = arith.constant 0 : index
    %c0_24 = arith.constant 0 : index
    %48 = vector.load %arg5[%c0_21, %c0_22, %c0_23, %c0_24] : memref<3x3x128x128xbf16, #tpu.memory_space<vmem>>, vector<1x1x128x128xbf16>
    %49 = vector.shape_cast %48 : vector<1x1x128x128xbf16> to vector<128x128xbf16>
    %cst_25 = arith.constant dense<0.000000e+00> : vector<256x128xf32>
    %50 = tpu.matmul %47, %49, %cst_25 {dimension_numbers = #tpu.dot_dimension_numbers<[1], [0], [0], [1], [0, 0, 1, 1], [], []>} : vector<256x128xbf16>, vector<128x128xbf16>, vector<256x128xf32> -> vector<256x128xf32>
    %c0_26 = arith.constant 0 : index
    %c0_27 = arith.constant 0 : index
    %51 = vector.load %arg12[%c0_26, %c0_27] : memref<256x128xf32, #tpu.memory_space<vmem>>, vector<256x128xf32>
    tpu.vector_store %arg12[%c0_26, %c0_27], %50 {strides = array<i32>} : memref<256x128xf32, #tpu.memory_space<vmem>>, vector<256x128xf32>,
    %c8 = arith.constant 8 : index
    %c0_28 = arith.constant 0 : index
    %52 = vector.load %arg13[%c8, %c0_28] : memref<304x128xf32, #tpu.memory_space<vmem>>, vector<256x128xf32>
    %53 = arith.truncf %52 : vector<256x128xf32> to vector<256x128xbf16>
    %c0_29 = arith.constant 0 : index
    %c1 = arith.constant 1 : index
    %c0_30 = arith.constant 0 : index
    %c0_31 = arith.constant 0 : index
    %54 = vector.load %arg5[%c0_29, %c1, %c0_30, %c0_31] : memref<3x3x128x128xbf16, #tpu.memory_space<vmem>>, vector<1x1x128x128xbf16>
    %55 = vector.shape_cast %54 : vector<1x1x128x128xbf16> to vector<128x128xbf16>
    %cst_32 = arith.constant dense<0.000000e+00> : vector<256x128xf32>
    %56 = tpu.matmul %53, %55, %cst_32 {dimension_numbers = #tpu.dot_dimension_numbers<[1], [0], [0], [1], [0, 0, 1, 1], [], []>} : vector<256x128xbf16>, vector<128x128xbf16>, vector<256x128xf32> -> vector<256x128xf32>
    %c0_33 = arith.constant 0 : index
    %c0_34 = arith.constant 0 : index
    %57 = vector.load %arg12[%c0_33, %c0_34] : memref<256x128xf32, #tpu.memory_space<vmem>>, vector<256x128xf32>
    %58 = arith.addf %57, %56 : vector<256x128xf32>
    %c0_35 = arith.constant 0 : index
    %c0_36 = arith.constant 0 : index
    %59 = vector.load %arg12[%c0_35, %c0_36] : memref<256x128xf32, #tpu.memory_space<vmem>>, vector<256x128xf32>
    tpu.vector_store %arg12[%c0_35, %c0_36], %58 {strides = array<i32>} : memref<256x128xf32, #tpu.memory_space<vmem>>, vector<256x128xf32>,
    %c9 = arith.constant 9 : index
    %c0_37 = arith.constant 0 : index
    %60 = vector.load %arg13[%c9, %c0_37] : memref<304x128xf32, #tpu.memory_space<vmem>>, vector<256x128xf32>
    %61 = vector.broadcast %43 : vector<256x1xf32> to vector<256x128xf32>
    %62 = arith.mulf %60, %61 : vector<256x128xf32>
    %63 = arith.truncf %62 : vector<256x128xf32> to vector<256x128xbf16>
    %c0_38 = arith.constant 0 : index
    %c2 = arith.constant 2 : index
    %c0_39 = arith.constant 0 : index
    %c0_40 = arith.constant 0 : index
    %64 = vector.load %arg5[%c0_38, %c2, %c0_39, %c0_40] : memref<3x3x128x128xbf16, #tpu.memory_space<vmem>>, vector<1x1x128x128xbf16>
    %65 = vector.shape_cast %64 : vector<1x1x128x128xbf16> to vector<128x128xbf16>
    %cst_41 = arith.constant dense<0.000000e+00> : vector<256x128xf32>
    %66 = tpu.matmul %63, %65, %cst_41 {dimension_numbers = #tpu.dot_dimension_numbers<[1], [0], [0], [1], [0, 0, 1, 1], [], []>} : vector<256x128xbf16>, vector<128x128xbf16>, vector<256x128xf32> -> vector<256x128xf32>
    %c0_42 = arith.constant 0 : index
    %c0_43 = arith.constant 0 : index
    %67 = vector.load %arg12[%c0_42, %c0_43] : memref<256x128xf32, #tpu.memory_space<vmem>>, vector<256x128xf32>
    %68 = arith.addf %67, %66 : vector<256x128xf32>
    %c0_44 = arith.constant 0 : index
    %c0_45 = arith.constant 0 : index
    %69 = vector.load %arg12[%c0_44, %c0_45] : memref<256x128xf32, #tpu.memory_space<vmem>>, vector<256x128xf32>
    tpu.vector_store %arg12[%c0_44, %c0_45], %68 {strides = array<i32>} : memref<256x128xf32, #tpu.memory_space<vmem>>, vector<256x128xf32>,
    %c23 = arith.constant 23 : index
    %c0_46 = arith.constant 0 : index
    %70 = vector.load %arg13[%c23, %c0_46] : memref<304x128xf32, #tpu.memory_space<vmem>>, vector<256x128xf32>
    %71 = vector.broadcast %39 : vector<256x1xf32> to vector<256x128xf32>
    %72 = arith.mulf %70, %71 : vector<256x128xf32>
    %73 = arith.truncf %72 : vector<256x128xf32> to vector<256x128xbf16>
    %c1_47 = arith.constant 1 : index
    %c0_48 = arith.constant 0 : index
    %c0_49 = arith.constant 0 : index
    %c0_50 = arith.constant 0 : index
    %74 = vector.load %arg5[%c1_47, %c0_48, %c0_49, %c0_50] : memref<3x3x128x128xbf16, #tpu.memory_space<vmem>>, vector<1x1x128x128xbf16>
    %75 = vector.shape_cast %74 : vector<1x1x128x128xbf16> to vector<128x128xbf16>
    %cst_51 = arith.constant dense<0.000000e+00> : vector<256x128xf32>
    %76 = tpu.matmul %73, %75, %cst_51 {dimension_numbers = #tpu.dot_dimension_numbers<[1], [0], [0], [1], [0, 0, 1, 1], [], []>} : vector<256x128xbf16>, vector<128x128xbf16>, vector<256x128xf32> -> vector<256x128xf32>
    %c0_52 = arith.constant 0 : index
    %c0_53 = arith.constant 0 : index
    %77 = vector.load %arg12[%c0_52, %c0_53] : memref<256x128xf32, #tpu.memory_space<vmem>>, vector<256x128xf32>
    %78 = arith.addf %77, %76 : vector<256x128xf32>
    %c0_54 = arith.constant 0 : index
    %c0_55 = arith.constant 0 : index
    %79 = vector.load %arg12[%c0_54, %c0_55] : memref<256x128xf32, #tpu.memory_space<vmem>>, vector<256x128xf32>
    tpu.vector_store %arg12[%c0_54, %c0_55], %78 {strides = array<i32>} : memref<256x128xf32, #tpu.memory_space<vmem>>, vector<256x128xf32>,
    %c24_56 = arith.constant 24 : index
    %c0_57 = arith.constant 0 : index
    %80 = vector.load %arg13[%c24_56, %c0_57] : memref<304x128xf32, #tpu.memory_space<vmem>>, vector<256x128xf32>
    %81 = arith.truncf %80 : vector<256x128xf32> to vector<256x128xbf16>
    %c1_58 = arith.constant 1 : index
    %c1_59 = arith.constant 1 : index
    %c0_60 = arith.constant 0 : index
    %c0_61 = arith.constant 0 : index
    %82 = vector.load %arg5[%c1_58, %c1_59, %c0_60, %c0_61] : memref<3x3x128x128xbf16, #tpu.memory_space<vmem>>, vector<1x1x128x128xbf16>
    %83 = vector.shape_cast %82 : vector<1x1x128x128xbf16> to vector<128x128xbf16>
    %cst_62 = arith.constant dense<0.000000e+00> : vector<256x128xf32>
    %84 = tpu.matmul %81, %83, %cst_62 {dimension_numbers = #tpu.dot_dimension_numbers<[1], [0], [0], [1], [0, 0, 1, 1], [], []>} : vector<256x128xbf16>, vector<128x128xbf16>, vector<256x128xf32> -> vector<256x128xf32>
    %c0_63 = arith.constant 0 : index
    %c0_64 = arith.constant 0 : index
    %85 = vector.load %arg12[%c0_63, %c0_64] : memref<256x128xf32, #tpu.memory_space<vmem>>, vector<256x128xf32>
    %86 = arith.addf %85, %84 : vector<256x128xf32>
    %c0_65 = arith.constant 0 : index
    %c0_66 = arith.constant 0 : index
    %87 = vector.load %arg12[%c0_65, %c0_66] : memref<256x128xf32, #tpu.memory_space<vmem>>, vector<256x128xf32>
    tpu.vector_store %arg12[%c0_65, %c0_66], %86 {strides = array<i32>} : memref<256x128xf32, #tpu.memory_space<vmem>>, vector<256x128xf32>,
    %c25 = arith.constant 25 : index
    %c0_67 = arith.constant 0 : index
    %88 = vector.load %arg13[%c25, %c0_67] : memref<304x128xf32, #tpu.memory_space<vmem>>, vector<256x128xf32>
    %89 = vector.broadcast %43 : vector<256x1xf32> to vector<256x128xf32>
    %90 = arith.mulf %88, %89 : vector<256x128xf32>
    %91 = arith.truncf %90 : vector<256x128xf32> to vector<256x128xbf16>
    %c1_68 = arith.constant 1 : index
    %c2_69 = arith.constant 2 : index
    %c0_70 = arith.constant 0 : index
    %c0_71 = arith.constant 0 : index
    %92 = vector.load %arg5[%c1_68, %c2_69, %c0_70, %c0_71] : memref<3x3x128x128xbf16, #tpu.memory_space<vmem>>, vector<1x1x128x128xbf16>
    %93 = vector.shape_cast %92 : vector<1x1x128x128xbf16> to vector<128x128xbf16>
    %cst_72 = arith.constant dense<0.000000e+00> : vector<256x128xf32>
    %94 = tpu.matmul %91, %93, %cst_72 {dimension_numbers = #tpu.dot_dimension_numbers<[1], [0], [0], [1], [0, 0, 1, 1], [], []>} : vector<256x128xbf16>, vector<128x128xbf16>, vector<256x128xf32> -> vector<256x128xf32>
    %c0_73 = arith.constant 0 : index
    %c0_74 = arith.constant 0 : index
    %95 = vector.load %arg12[%c0_73, %c0_74] : memref<256x128xf32, #tpu.memory_space<vmem>>, vector<256x128xf32>
    %96 = arith.addf %95, %94 : vector<256x128xf32>
    %c0_75 = arith.constant 0 : index
    %c0_76 = arith.constant 0 : index
    %97 = vector.load %arg12[%c0_75, %c0_76] : memref<256x128xf32, #tpu.memory_space<vmem>>, vector<256x128xf32>
    tpu.vector_store %arg12[%c0_75, %c0_76], %96 {strides = array<i32>} : memref<256x128xf32, #tpu.memory_space<vmem>>, vector<256x128xf32>,
    %c39 = arith.constant 39 : index
    %c0_77 = arith.constant 0 : index
    %98 = vector.load %arg13[%c39, %c0_77] : memref<304x128xf32, #tpu.memory_space<vmem>>, vector<256x128xf32>
    %99 = vector.broadcast %39 : vector<256x1xf32> to vector<256x128xf32>
    %100 = arith.mulf %98, %99 : vector<256x128xf32>
    %101 = arith.truncf %100 : vector<256x128xf32> to vector<256x128xbf16>
    %c2_78 = arith.constant 2 : index
    %c0_79 = arith.constant 0 : index
    %c0_80 = arith.constant 0 : index
    %c0_81 = arith.constant 0 : index
    %102 = vector.load %arg5[%c2_78, %c0_79, %c0_80, %c0_81] : memref<3x3x128x128xbf16, #tpu.memory_space<vmem>>, vector<1x1x128x128xbf16>
    %103 = vector.shape_cast %102 : vector<1x1x128x128xbf16> to vector<128x128xbf16>
    %cst_82 = arith.constant dense<0.000000e+00> : vector<256x128xf32>
    %104 = tpu.matmul %101, %103, %cst_82 {dimension_numbers = #tpu.dot_dimension_numbers<[1], [0], [0], [1], [0, 0, 1, 1], [], []>} : vector<256x128xbf16>, vector<128x128xbf16>, vector<256x128xf32> -> vector<256x128xf32>
    %c0_83 = arith.constant 0 : index
    %c0_84 = arith.constant 0 : index
    %105 = vector.load %arg12[%c0_83, %c0_84] : memref<256x128xf32, #tpu.memory_space<vmem>>, vector<256x128xf32>
    %106 = arith.addf %105, %104 : vector<256x128xf32>
    %c0_85 = arith.constant 0 : index
    %c0_86 = arith.constant 0 : index
    %107 = vector.load %arg12[%c0_85, %c0_86] : memref<256x128xf32, #tpu.memory_space<vmem>>, vector<256x128xf32>
    tpu.vector_store %arg12[%c0_85, %c0_86], %106 {strides = array<i32>} : memref<256x128xf32, #tpu.memory_space<vmem>>, vector<256x128xf32>,
    %c40 = arith.constant 40 : index
    %c0_87 = arith.constant 0 : index
    %108 = vector.load %arg13[%c40, %c0_87] : memref<304x128xf32, #tpu.memory_space<vmem>>, vector<256x128xf32>
    %109 = arith.truncf %108 : vector<256x128xf32> to vector<256x128xbf16>
    %c2_88 = arith.constant 2 : index
    %c1_89 = arith.constant 1 : index
    %c0_90 = arith.constant 0 : index
    %c0_91 = arith.constant 0 : index
    %110 = vector.load %arg5[%c2_88, %c1_89, %c0_90, %c0_91] : memref<3x3x128x128xbf16, #tpu.memory_space<vmem>>, vector<1x1x128x128xbf16>
    %111 = vector.shape_cast %110 : vector<1x1x128x128xbf16> to vector<128x128xbf16>
    %cst_92 = arith.constant dense<0.000000e+00> : vector<256x128xf32>
    %112 = tpu.matmul %109, %111, %cst_92 {dimension_numbers = #tpu.dot_dimension_numbers<[1], [0], [0], [1], [0, 0, 1, 1], [], []>} : vector<256x128xbf16>, vector<128x128xbf16>, vector<256x128xf32> -> vector<256x128xf32>
    %c0_93 = arith.constant 0 : index
    %c0_94 = arith.constant 0 : index
    %113 = vector.load %arg12[%c0_93, %c0_94] : memref<256x128xf32, #tpu.memory_space<vmem>>, vector<256x128xf32>
    %114 = arith.addf %113, %112 : vector<256x128xf32>
    %c0_95 = arith.constant 0 : index
    %c0_96 = arith.constant 0 : index
    %115 = vector.load %arg12[%c0_95, %c0_96] : memref<256x128xf32, #tpu.memory_space<vmem>>, vector<256x128xf32>
    tpu.vector_store %arg12[%c0_95, %c0_96], %114 {strides = array<i32>} : memref<256x128xf32, #tpu.memory_space<vmem>>, vector<256x128xf32>,
    %c41 = arith.constant 41 : index
    %c0_97 = arith.constant 0 : index
    %116 = vector.load %arg13[%c41, %c0_97] : memref<304x128xf32, #tpu.memory_space<vmem>>, vector<256x128xf32>
    %117 = vector.broadcast %43 : vector<256x1xf32> to vector<256x128xf32>
    %118 = arith.mulf %116, %117 : vector<256x128xf32>
    %119 = arith.truncf %118 : vector<256x128xf32> to vector<256x128xbf16>
    %c2_98 = arith.constant 2 : index
    %c2_99 = arith.constant 2 : index
    %c0_100 = arith.constant 0 : index
    %c0_101 = arith.constant 0 : index
    %120 = vector.load %arg5[%c2_98, %c2_99, %c0_100, %c0_101] : memref<3x3x128x128xbf16, #tpu.memory_space<vmem>>, vector<1x1x128x128xbf16>
    %121 = vector.shape_cast %120 : vector<1x1x128x128xbf16> to vector<128x128xbf16>
    %cst_102 = arith.constant dense<0.000000e+00> : vector<256x128xf32>
    %122 = tpu.matmul %119, %121, %cst_102 {dimension_numbers = #tpu.dot_dimension_numbers<[1], [0], [0], [1], [0, 0, 1, 1], [], []>} : vector<256x128xbf16>, vector<128x128xbf16>, vector<256x128xf32> -> vector<256x128xf32>
    %c0_103 = arith.constant 0 : index
    %c0_104 = arith.constant 0 : index
    %123 = vector.load %arg12[%c0_103, %c0_104] : memref<256x128xf32, #tpu.memory_space<vmem>>, vector<256x128xf32>
    %124 = arith.addf %123, %122 : vector<256x128xf32>
    %c0_105 = arith.constant 0 : index
    %c0_106 = arith.constant 0 : index
    %125 = vector.load %arg12[%c0_105, %c0_106] : memref<256x128xf32, #tpu.memory_space<vmem>>, vector<256x128xf32>
    tpu.vector_store %arg12[%c0_105, %c0_106], %124 {strides = array<i32>} : memref<256x128xf32, #tpu.memory_space<vmem>>, vector<256x128xf32>,
    %c0_107 = arith.constant 0 : index
    %c0_108 = arith.constant 0 : index
    %126 = vector.load %arg12[%c0_107, %c0_108] : memref<256x128xf32, #tpu.memory_space<vmem>>, vector<256x128xf32>
    %c0_109 = arith.constant 0 : index
    %c0_110 = arith.constant 0 : index
    %127 = vector.load %arg6[%c0_109, %c0_110] : memref<1x128xf32, #tpu.memory_space<vmem>>, vector<1x128xf32>
    %128 = vector.broadcast %127 : vector<1x128xf32> to vector<256x128xf32>
    %129 = arith.mulf %126, %128 : vector<256x128xf32>
    %c0_111 = arith.constant 0 : index
    %c0_112 = arith.constant 0 : index
    %130 = vector.load %arg7[%c0_111, %c0_112] : memref<1x128xf32, #tpu.memory_space<vmem>>, vector<1x128xf32>
    %131 = vector.broadcast %130 : vector<1x128xf32> to vector<256x128xf32>
    %132 = arith.addf %129, %131 : vector<256x128xf32>
    %cst_113 = arith.constant 0.000000e+00 : f32
    %133 = vector.broadcast %cst_113 : f32 to vector<256x128xf32>
    %134 = arith.maximumf %132, %133 : vector<256x128xf32>
    %135 = arith.truncf %134 : vector<256x128xf32> to vector<256x128xbf16>
    %c0_114 = arith.constant 0 : index
    %c0_115 = arith.constant 0 : index
    %136 = vector.load %arg8[%c0_114, %c0_115] : memref<128x128xbf16, #tpu.memory_space<vmem>>, vector<128x128xbf16>
    %cst_116 = arith.constant dense<0.000000e+00> : vector<256x128xf32>
    %137 = tpu.matmul %135, %136, %cst_116 {dimension_numbers = #tpu.dot_dimension_numbers<[1], [0], [0], [1], [0, 0, 1, 1], [], []>} : vector<256x128xbf16>, vector<128x128xbf16>, vector<256x128xf32> -> vector<256x128xf32>
    %c0_117 = arith.constant 0 : index
    %c0_118 = arith.constant 0 : index
    %138 = vector.load %arg9[%c0_117, %c0_118] : memref<1x128xf32, #tpu.memory_space<vmem>>, vector<1x128xf32>
    %139 = vector.broadcast %138 : vector<1x128xf32> to vector<256x128xf32>
    %140 = arith.mulf %137, %139 : vector<256x128xf32>
    %c0_119 = arith.constant 0 : index
    %c0_120 = arith.constant 0 : index
    %141 = vector.load %arg10[%c0_119, %c0_120] : memref<1x128xf32, #tpu.memory_space<vmem>>, vector<1x128xf32>
    %142 = vector.broadcast %141 : vector<1x128xf32> to vector<256x128xf32>
    %143 = arith.addf %140, %142 : vector<256x128xf32>
    %144 = arith.addf %2, %143 : vector<256x128xf32>
    %cst_121 = arith.constant 0.000000e+00 : f32
    %145 = vector.broadcast %cst_121 : f32 to vector<256x128xf32>
    %146 = arith.maximumf %144, %145 : vector<256x128xf32>
    %147 = vector.shape_cast %146 : vector<256x128xf32> to vector<16x16x128xf32>
    %c0_122 = arith.constant 0 : index
    %c0_123 = arith.constant 0 : index
    %c0_124 = arith.constant 0 : index
    %c0_125 = arith.constant 0 : index
    %148 = vector.load %arg11[%c0_122, %c0_123, %c0_124, %c0_125] : memref<1x16x16x128xf32, #tpu.memory_space<vmem>>, vector<1x16x16x128xf32>
    %149 = vector.shape_cast %148 : vector<1x16x16x128xf32> to vector<16x16x128xf32>
    %150 = vector.shape_cast %147 : vector<16x16x128xf32> to vector<1x16x16x128xf32>
    tpu.vector_store %arg11[%c0_122, %c0_123, %c0_124, %c0_125], %150 {strides = array<i32>} : memref<1x16x16x128xf32, #tpu.memory_space<vmem>>, vector<1x16x16x128xf32>,
    return
  }
  func.func @transform_0(%arg0: i32) -> (i32, i32, i32, i32) {
    %c0_i32 = arith.constant 0 : i32
    %c0_i32_0 = arith.constant 0 : i32
    %c0_i32_1 = arith.constant 0 : i32
    %c0_i32_2 = arith.constant 0 : i32
    return %arg0, %c0_i32, %c0_i32_0, %c0_i32_1 : i32, i32, i32, i32
  }
  func.func @transform_1(%arg0: i32) -> (i32, i32) {
    %c0_i32 = arith.constant 0 : i32
    %c0_i32_0 = arith.constant 0 : i32
    %c0_i32_1 = arith.constant 0 : i32
    return %c0_i32, %c0_i32_0 : i32, i32
  }
  func.func @transform_2(%arg0: i32) -> (i32, i32) {
    %c0_i32 = arith.constant 0 : i32
    %c0_i32_0 = arith.constant 0 : i32
    %c0_i32_1 = arith.constant 0 : i32
    return %c0_i32, %c0_i32_0 : i32, i32
  }
  func.func @transform_3(%arg0: i32) -> (i32, i32) {
    %c0_i32 = arith.constant 0 : i32
    %c0_i32_0 = arith.constant 0 : i32
    %c0_i32_1 = arith.constant 0 : i32
    return %c0_i32, %c0_i32_0 : i32, i32
  }
  func.func @transform_4(%arg0: i32) -> (i32, i32, i32, i32) {
    %c0_i32 = arith.constant 0 : i32
    %c0_i32_0 = arith.constant 0 : i32
    %c0_i32_1 = arith.constant 0 : i32
    %c0_i32_2 = arith.constant 0 : i32
    %c0_i32_3 = arith.constant 0 : i32
    return %c0_i32, %c0_i32_0, %c0_i32_1, %c0_i32_2 : i32, i32, i32, i32
  }
  func.func @transform_5(%arg0: i32) -> (i32, i32) {
    %c0_i32 = arith.constant 0 : i32
    %c0_i32_0 = arith.constant 0 : i32
    %c0_i32_1 = arith.constant 0 : i32
    return %c0_i32, %c0_i32_0 : i32, i32
  }
  func.func @transform_6(%arg0: i32) -> (i32, i32) {
    %c0_i32 = arith.constant 0 : i32
    %c0_i32_0 = arith.constant 0 : i32
    %c0_i32_1 = arith.constant 0 : i32
    return %c0_i32, %c0_i32_0 : i32, i32
  }
  func.func @transform_7(%arg0: i32) -> (i32, i32) {
    %c0_i32 = arith.constant 0 : i32
    %c0_i32_0 = arith.constant 0 : i32
    %c0_i32_1 = arith.constant 0 : i32
    return %c0_i32, %c0_i32_0 : i32, i32
  }
  func.func @transform_8(%arg0: i32) -> (i32, i32) {
    %c0_i32 = arith.constant 0 : i32
    %c0_i32_0 = arith.constant 0 : i32
    %c0_i32_1 = arith.constant 0 : i32
    return %c0_i32, %c0_i32_0 : i32, i32
  }
  func.func @transform_9(%arg0: i32) -> (i32, i32) {
    %c0_i32 = arith.constant 0 : i32
    %c0_i32_0 = arith.constant 0 : i32
    %c0_i32_1 = arith.constant 0 : i32
    return %c0_i32, %c0_i32_0 : i32, i32
  }
  func.func @transform_10(%arg0: i32) -> (i32, i32, i32, i32) {
    %c0_i32 = arith.constant 0 : i32
    %c0_i32_0 = arith.constant 0 : i32
    %c0_i32_1 = arith.constant 0 : i32
    %c0_i32_2 = arith.constant 0 : i32
    return %arg0, %c0_i32, %c0_i32_0, %c0_i32_1 : i32, i32, i32, i32
  }
}

</mosaic_0001>

<bundles_post_ra>
// kernel: bayes_resnext_bottleneck.1
= control target key start
LH: loop header
LB: loop body
LE: loop exit
PB: predicated region body
PF: predicated region fallthrough
CT: control target
= control target key end

     0   :  { %15 = vsyncpa [#allocation5], 0  ;;  %s7580_s0 = inlined_call_operand.vmem [shape: f32[2,16,16,128], index: 0, kind: input, shape index: {}]   ;;  %s7581_s1 = inlined_call_operand.vmem [shape: bf16[128,128], index: 1, kind: input, shape index: {}]   ;;  %s7582_s2 = inlined_call_operand.vmem [shape: f32[1,128], index: 2, kind: input, shape index: {}]   ;;  %s7583_s3 = inlined_call_operand.vmem [shape: f32[1,128], index: 3, kind: input, shape index: {}]   ;;  %s7584_s4 = inlined_call_operand.vmem [shape: bf16[3,3,128,128], index: 4, kind: input, shape index: {}]   ;;  %s7585_s5 = inlined_call_operand.vmem [shape: f32[1,128], index: 5, kind: input, shape index: {}]   ;;  %s7586_s6 = inlined_call_operand.vmem [shape: f32[1,128], index: 6, kind: input, shape index: {}]   ;;  %s7587_s7 = inlined_call_operand.vmem [shape: bf16[128,128], index: 7, kind: input, shape index: {}]   ;;  %s7588_s8 = inlined_call_operand.vmem [shape: f32[1,128], index: 8, kind: input, shape index: {}]   ;;  %s7589_s9 = inlined_call_operand.vmem [shape: f32[1,128], index: 9, kind: input, shape index: {}]   ;;  %s7590_s10 = inlined_call_operand.hbm [shape: f32[2,16,16,128], index: 10, kind: output, shape index: {}]  }
   0x1   :  { %17 = vsyncpa [#allocation5 + $0x1], 0  ;;  %s5517_s13 = smov 0   ;;  %s5519_s14 = smov 0  }
   0x2   :  { %s5521_s15 = smov 0   ;;  %s5523_s16 = smov 0  }
   0x3 LB: > { %s5538_s17 = sadd.s32 4294967295, %s5456_s16   ;;  %s4670_s18 = sadd.s32 4294967294, %s5456_s16   ;;  %s5456_s16 = sphi %s5523_s16, %s7976_s16   ;;  %s5452_s15 = sphi %s5521_s15, %s7975_s15   ;;  %s5448_s14 = sphi %s5519_s14, %s7974_s14   ;;  %s5444_s13 = sphi %s5517_s13, %s7973_s13  }
   0x4   : > { %s5542_s19 = sadd.s32 1, %s5456_s16   ;;  %s245_s20 = sadd.s32 1, %s5452_s15 }
   0x5   : > { %s242_s21 = ssub.s32 %s5456_s16, %s5542_s19  ;;  %p255_p0 = scmp.ne.s32.totalorder %s5452_s15, %s5448_s14 }
   0x6   : > { %p243_p1 = scmp.eq.s32.totalorder %s242_s21, 0  ;;  %p256_p2 = scmp.eq.s32.totalorder %s5538_s17, 1 }
   0x7   : > { %p261_p3 = scmp.ne.s32.totalorder %s5448_s14, %s5444_s13  ;;  %p262_p4 = scmp.eq.s32.totalorder %s4670_s18, 1 }
   0x8   : > { %s5553_s22 = scalar_select %p243_p1, %s5452_s15, %s245_s20  }
   0x9   : > { %p5555_p5 = por %p256_p2, %p255_p0  ;;  %p5559_p6 = por %p262_p4, %p261_p3 }
   0xa   : > { %p4673_p7 = scmp.ge.s32.totalorder %s5456_s16, 1  ;;  %p315_p8 = scmp.lt.s32.totalorder %s5456_s16, 3 }
   0xc   : > { %p316_p9 = pnand %p4673_p7, %p315_p8 }
   0xe   : > { %319 = sbr.rel (%p316_p9) target bundleno = 1307 (0x51b), region = 60 }
  0x13   : > { %v5202_v0 = vld [vmem:[%s7581_s1 + $0x38] sm:$0xff]  ;;  %v5201_v1 = vld [vmem:[%s7581_s1 + $0x30] sm:$0xff]  ;;  %v5200_v2 = vld [vmem:[%s7581_s1 + $0x28] sm:$0xff]  ;;  %p353_p10 = scmp.lt.s32.totalorder %s5538_s17, 1  ;;  %v7591_v42 = vmov 0.0   ;;  %v701_v43 = vlaneseq  ;;  %v5459_v48 = vmov 0.0|0.0  }
  0x14   : > { %470 = vmatpush.bf16.msra.mxu0 %v5202_v0  ;;  %5284 = vmatpush.bf16.msra.mxu3 %v5202_v0  ;;  %v5199_v3 = vld [vmem:[%s7581_s1 + $0x20] sm:$0xff]  ;;  %v5198_v4 = vld [vmem:[%s7581_s1 + $0x18] sm:$0xff]  ;;  %v5197_v5 = vld [vmem:[%s7581_s1 + $0x10] sm:$0xff]  ;;  %663 = vst [vmem:[#allocation3] sm:$0xff] %v7591_v42  ;;  %s350_s30 = sand.u32 1, %s5448_s14   ;;  %s5414_s29 = scalar_lea.hbm %s7590_s10, 512 }
  0x15   : > { %s354_s21 = scalar_select %p353_p10, %s5538_s17, 1  ;;  %v5196_v6 = vld [vmem:[%s7581_s1 + $0x8] sm:$0xff]  ;;  %v5195_v7 = vld [vmem:[%s7581_s1] sm:$0xff]  ;;  %v5609_v23 = vld [vmem:[%s7584_s4 + $0x78] sm:$0xff]  ;;  %664 = vst [vmem:[#allocation3 + $0x8] sm:$0xff] %v7591_v42  ;;  %v5679_v45 = vshrl.u32 %v701_v43, 7 }
  0x16   : > { %1688 = vmatpush.bf16.msra.mxu2 %v5609_v23  ;;  %v5210_v24 = vld [vmem:[%s7584_s4 + $0x38] sm:$0xff]  ;;  %v5618_v25 = vld [vmem:[%s7584_s4 + $0x70] sm:$0xff]  ;;  %v5627_v27 = vld [vmem:[%s7584_s4 + $0x68] sm:$0xff]  ;;  %665 = vst [vmem:[#allocation3 + $0x10] sm:$0xff] %v7591_v42  ;;  %s4674_s11 = sshll.u32 %s350_s30, 8 }
  0x17   : > { %s5194_s27 = sshll.u32 %s354_s21, 8  ;;  %1454 = vmatpush.bf16.msra.mxu1 %v5210_v24  ;;  %v5209_v26 = vld [vmem:[%s7584_s4 + $0x30] sm:$0xff]  ;;  %v5208_v28 = vld [vmem:[%s7584_s4 + $0x28] sm:$0xff]  ;;  %v5638_v31 = vld [vmem:[%s7584_s4 + $0x60] sm:$0xff]  ;;  %666 = vst [vmem:[#allocation3 + $0x118] sm:$0xff] %v7591_v42  ;;  %v738_v47 = vand.u32 15, %v5679_v45 }
  0x18   : > { %471 = vmatpush.bf16.msra.mxu0 %v5201_v1  ;;  %5285 = vmatpush.bf16.msra.mxu3 %v5201_v1  ;;  %s5591_s12 = scalar_lea.vmem %s7580_s0, %s5194_s27  ;;  %v5644_v33 = vld [vmem:[%s7584_s4 + $0x58] sm:$0xff]  ;;  %v5207_v34 = vld [vmem:[%s7584_s4 + $0x20] sm:$0xff]  ;;  %v5653_v35 = vld [vmem:[%s7584_s4 + $0x50] sm:$0xff]  ;;  %667 = vst [vmem:[#allocation3 + $0x120] sm:$0xff] %v7591_v42  ;;  %s7352_s18 = scalar_lea.vmem [#allocation4], %s4674_s11 }
  0x19   : > { %v358_v8 = vld [vmem:[%s5591_s12] sm:$0xff]  ;;  %v359_v9 = vld [vmem:[%s5591_s12 + $0x8] sm:$0xff]  ;;  %v360_v11 = vld [vmem:[%s5591_s12 + $0x10] sm:$0xff]  ;;  %668 = vst [vmem:[#allocation3 + $0x128] sm:$0xff] %v7591_v42  ;;  %vm1118_vm0 = vcmp.ge.s32.totalorder %v738_v47, 1  ;;  %s5283_s27 = sshll.u32 %s5538_s17, 8 }
  0x1a   : > { %v390_v10 = vpack.c.bf16 %v359_v9, %v358_v8  ;;  %v361_v12 = vld [vmem:[%s5591_s12 + $0x18] sm:$0xff]  ;;  %v362_v14 = vld [vmem:[%s5591_s12 + $0x20] sm:$0xff]  ;;  %v363_v15 = vld [vmem:[%s5591_s12 + $0x28] sm:$0xff]  ;;  %1689 = vmatpush.bf16.msra.mxu2 %v5618_v25  ;;  %v5692_v50 = vsel %vm1118_vm0, 1.0, %v7591_v42  ;;  %v704_v8 = vadd.s32 16, %v5679_v45  ;;  %s4604_s11 = scalar_lea.hbm %s7590_s10, %s5283_s27  ;;  %s4605_s20 = sshll.u32 %s7352_s18, 4  ;;  %s4606_s20 = int_to_ptr.vmem [resolvable:$true] %s4605_s20 }
  0x1b   : > { %v391_v13 = vpack.c.bf16 %v361_v12, %v360_v11  ;;  %v392_v16 = vpack.c.bf16 %v363_v15, %v362_v14  ;;  %v364_v17 = vld [vmem:[%s5591_s12 + $0x30] sm:$0xff]  ;;  %v365_v18 = vld [vmem:[%s5591_s12 + $0x38] sm:$0xff]  ;;  %v366_v20 = vld [vmem:[%s5591_s12 + $0x40] sm:$0xff]  ;;  %1455 = vmatpush.bf16.msra.mxu1 %v5209_v26  ;;  %7654 = vst [vmem:[#allocation7_spill] sm:$0xff] %v5692_v50  ;;  %s4607_s21 = sshll.u32 %s4604_s11, 4  ;;  %s4593_s17 = scalar_lea.sflag [#allocation5], %s350_s30  ;;  %s4608_s21 = int_to_ptr.hbm [resolvable:$true] %s4607_s21 }
  0x1c   : > { %472 = vmatpush.bf16.msra.mxu0 %v5200_v2  ;;  %5286 = vmatpush.bf16.msra.mxu3 %v5200_v2  ;;  %v393_v19 = vpack.c.bf16 %v365_v18, %v364_v17  ;;  %v367_v21 = vld [vmem:[%s5591_s12 + $0x48] sm:$0xff]  ;;  %v368_v29 = vld [vmem:[%s5591_s12 + $0x50] sm:$0xff]  ;;  %v369_v30 = vld [vmem:[%s5591_s12 + $0x58] sm:$0xff]  ;;  %s5408_s25 = sshra.s32 %s4608_s21, 4  ;;  %s5409_s25 = int_to_ptr.hbm [resolvable:$true] %s5408_s25 }
  0x1d   : > { %v394_v22 = vpack.c.bf16 %v367_v21, %v366_v20  ;;  %v395_v32 = vpack.c.bf16 %v369_v30, %v368_v29  ;;  %v5206_v36 = vld [vmem:[%s7584_s4 + $0x18] sm:$0xff]  ;;  %v5662_v37 = vld [vmem:[%s7584_s4 + $0x48] sm:$0xff]  ;;  %v5205_v38 = vld [vmem:[%s7584_s4 + $0x10] sm:$0xff]  ;;  %s5410_s26 = scalar_lea.hbm %s5409_s25, 256  ;;  %p5415_p0 = scmp.lt.s32.totalorder %s5409_s25, %s7590_s10 }
  0x1e   : > { %1690 = vmatpush.bf16.msra.mxu2 %v5627_v27  ;;  %v370_v39 = vld [vmem:[%s5591_s12 + $0x60] sm:$0xff]  ;;  %v371_v40 = vld [vmem:[%s5591_s12 + $0x68] sm:$0xff]  ;;  %v372_v55 = vld [vmem:[%s5591_s12 + $0x70] sm:$0xff]  ;;  %p5411_p11 = scmp.ne.s32.totalorder %s5409_s25, %s5410_s26  ;;  %p5416_p1 = scmp.lt.s32.totalorder %s5414_s29, %s5410_s26 }
  0x1f   : > { %1456 = vmatpush.bf16.msra.mxu1 %v5208_v28  ;;  %v5673_v41 = vld [vmem:[%s7584_s4 + $0x40] sm:$0xff]  ;;  %v396_v44 = vpack.c.bf16 %v371_v40, %v370_v39  ;;  %v5204_v46 = vld [vmem:[%s7584_s4 + $0x8] sm:$0xff]  ;;  %v373_v56 = vld [vmem:[%s5591_s12 + $0x78] sm:$0xff]  ;;  %v706_v40 = vadd.s32 32, %v5679_v45 }
  0x20   : > { %473 = vmatpush.bf16.msra.mxu0 %v5199_v3  ;;  %5287 = vmatpush.bf16.msra.mxu3 %v5199_v3  ;;  %v5203_v49 = vld [vmem:[%s7584_s4] sm:$0xff]  ;;  %v1311_v52 = vld [vmem:[#allocation3 + $0xf] sm:$0xff]  ;;  %v397_v57 = vpack.c.bf16 %v373_v56, %v372_v55  ;;  %v5234_v1 = vld [vmem:[%s7584_s4 + $0xf8] sm:$0xff]  ;;  %p5412_p12 = pnand %p5411_p11, %p5555_p5  ;;  %p5417_p2 = por %p5416_p1, %p5415_p0 }
  0x21   : > { %v1310_v51 = vld [vmem:[#allocation3 + $0x7] sm:$0xff]  ;;  %v5702_v60 = vld [vmem:[%s7582_s2] ss:$0 sm:$0xff]  ;;  %v376_v14 = vld [vmem:[%s5591_s12 + $0x90] sm:$0xff]  ;;  %v766_v47 = vand.u32 15, %v706_v40 }
  0x22   : > { %1691 = vmatpush.bf16.msra.mxu2 %v5638_v31  ;;  %v1342_v53 = vmul.f32 %v5692_v50, %v1310_v51  ;;  %v374_v58 = vld [vmem:[%s5591_s12 + $0x80] sm:$0xff]  ;;  %v375_v59 = vld [vmem:[%s5591_s12 + $0x88] sm:$0xff]  ;;  %v377_v15 = vld [vmem:[%s5591_s12 + $0x98] sm:$0xff]  ;;  %p5413_p13 = pneg %p5412_p12 }
  0x23   : > { %1457 = vmatpush.bf16.msra.mxu1 %v5207_v34  ;;  %v5707_v61 = vld [vmem:[%s7583_s3] ss:$0 sm:$0xff]  ;;  %v398_v62 = vpack.c.bf16 %v375_v59, %v374_v58  ;;  %v5232_v11 = vld [vmem:[%s7584_s4 + $0xe8] sm:$0xff]  ;;  %v399_v18 = vpack.c.bf16 %v377_v15, %v376_v14  ;;  %vm1122_vm3 = vcmp.ge.s32.totalorder %v766_v47, 1  ;;  %v381_v14 = vld [vmem:[%s5591_s12 + $0xb8] sm:$0xff] }
  0x24   : > { %474 = vmatpush.bf16.msra.mxu0 %v5198_v4  ;;  %5288 = vmatpush.bf16.msra.mxu3 %v5198_v4  ;;  %v1374_v54 = vpack.c.bf16 %v1311_v52, %v1342_v53  ;;  %v382_v3 = vld [vmem:[%s5591_s12 + $0xc0] sm:$0xff]  ;;  %v383_v4 = vld [vmem:[%s5591_s12 + $0xc8] sm:$0xff]  ;;  %v5782_v59 = vsel %vm1122_vm3, 1.0, %v7591_v42  ;;  %p5418_p3 = pnand %p5417_p2, %p5413_p13 }
  0x25   : > { %v5231_v17 = vld [vmem:[%s7584_s4 + $0xe0] sm:$0xff]  ;;  %7658 = vst [vmem:[#allocation11_spill] sm:$0xff] %v5782_v59 }
  0x26   : > { %1692 = vmatpush.bf16.msra.mxu2 %v5644_v33 }
  0x27   : > { %1458 = vmatpush.bf16.msra.mxu1 %v5206_v36 }
  0x28   : > { %475 = vmatpush.bf16.msra.mxu0 %v5197_v5  ;;  %5289 = vmatpush.bf16.msra.mxu3 %v5197_v5 }
  0x2a   : > { %1693 = vmatpush.bf16.msra.mxu2 %v5653_v35 }
  0x2b   : > { %1459 = vmatpush.bf16.msra.mxu1 %v5205_v38 }
  0x2c   : > { %476 = vmatpush.bf16.msra.mxu0 %v5196_v6  ;;  %5290 = vmatpush.bf16.msra.mxu3 %v5196_v6  ;;  %v402_v6 = vpack.c.bf16 %v383_v4, %v382_v3 }
  0x2e   : > { %1694 = vmatpush.bf16.msra.mxu2 %v5662_v37 }
  0x2f   : > { %1460 = vmatpush.bf16.msra.mxu1 %v5204_v46 }
  0x30   : > { %477 = vmatpush.bf16.msra.mxu0 %v5195_v7  ;;  %5291 = vmatpush.bf16.msra.mxu3 %v5195_v7  ;;  %v5233_v7 = vld [vmem:[%s7584_s4 + $0xf0] sm:$0xff] }
  0x32   : > { %1695 = vmatpush.bf16.msra.mxu2 %v5673_v41 }
  0x33   : > { %478 = vmatmul.bf16.vlgmr.msra.gmra.mxu0 %v390_v10  ;;  %1461 = vmatpush.bf16.msra.mxu1 %v5203_v49 }
  0x34   : > { %5292 = vmatpush.bf16.msrb.mxu3 %v5210_v24  ;;  %2348 = vmatpush.bf16.msrb.mxu0 %v5234_v1  ;;  %v5230_v24 = vld [vmem:[%s7584_s4 + $0xd8] sm:$0xff]  ;;  %v386_v1 = vld [vmem:[%s5591_s12 + $0xe0] sm:$0xff] }
  0x35   : > { %1696 = vmatmul.bf16.vlgmr.msra.gmra.mxu2 %v5459_v48  ;;  %538 = vmatmul.bf16.vlgmr.msra.gmra.mxu3 %v402_v6  ;;  %v378_v48 = vld [vmem:[%s5591_s12 + $0xa0] sm:$0xff] }
  0x36   : > { %1462 = vmatmul.bf16.vlgmr.msra.gmra.mxu1 %v1374_v54 }
  0x38   : > { %5293 = vmatpush.bf16.msrb.mxu3 %v5209_v26  ;;  %2349 = vmatpush.bf16.msrb.mxu0 %v5233_v7 }
  0x3c   : > { %5294 = vmatpush.bf16.msrb.mxu3 %v5208_v28  ;;  %2350 = vmatpush.bf16.msrb.mxu0 %v5232_v11  ;;  %v384_v28 = vld [vmem:[%s5591_s12 + $0xd0] sm:$0xff] }
  0x40   : > { %5295 = vmatpush.bf16.msrb.mxu3 %v5207_v34  ;;  %2351 = vmatpush.bf16.msrb.mxu0 %v5231_v17 }
  0x43   : > { %483 = vmatmul.bf16.gmra.mxu0 %v391_v13  ;;  %v752_v13 = vand.u32 15, %v704_v8 }
  0x44   : > { %5296 = vmatpush.bf16.msrb.mxu3 %v5206_v36  ;;  %2352 = vmatpush.bf16.msrb.mxu0 %v5230_v24  ;;  %v5229_v36 = vld [vmem:[%s7584_s4 + $0xd0] sm:$0xff] }
  0x45   : > { %vm1120_vm1 = vcmp.ge.s32.totalorder %v752_v13, 1  ;;  %v380_v13 = vld [vmem:[%s5591_s12 + $0xb0] sm:$0xff] }
  0x48   : > { %5297 = vmatpush.bf16.msrb.mxu3 %v5205_v38  ;;  %2353 = vmatpush.bf16.msrb.mxu0 %v5229_v36  ;;  %v389_v36 = vld [vmem:[%s5591_s12 + $0xf8] sm:$0xff] }
  0x4c   : > { %5298 = vmatpush.bf16.msrb.mxu3 %v5204_v46 }
  0x50   : > { %5299 = vmatpush.bf16.msrb.mxu3 %v5203_v49  ;;  %v379_v49 = vld [vmem:[%s5591_s12 + $0xa8] sm:$0xff] }
  0x51   : > { %v400_v54 = vpack.c.bf16 %v379_v49, %v378_v48 }
  0x53   : > { %488 = vmatmul.bf16.gmra.mxu0 %v392_v16 }
  0x54   : > { %5300 = vmatpush.bf16.msra.mxu3 %v5609_v23  ;;  %v5737_v23 = vsel %vm1120_vm1, 1.0, %v7591_v42 }
  0x55   : > { %7655 = vst [vmem:[#allocation8_spill] sm:$0xff] %v5737_v23 }
  0x58   : > { %5301 = vmatpush.bf16.msra.mxu3 %v5618_v25  ;;  %v705_v25 = vadd.s32 24, %v5679_v45 }
  0x5a   : > { %v759_v38 = vand.u32 15, %v705_v25 }
  0x5c   : > { %5302 = vmatpush.bf16.msra.mxu3 %v5627_v27  ;;  %v385_v27 = vld [vmem:[%s5591_s12 + $0xd8] sm:$0xff]  ;;  %vm1217_vm2 = vcmp.le.s32.totalorder %v759_v38, 14 }
  0x5d   : > { %v5766_v52 = vsel %vm1217_vm2, 1.0, %v7591_v42 }
  0x60   : > { %5303 = vmatpush.bf16.msra.mxu3 %v5638_v31 }
  0x63   : > { %493 = vmatmul.bf16.gmra.mxu0 %v393_v19 }
  0x64   : > { %5304 = vmatpush.bf16.msra.mxu3 %v5644_v33  ;;  %v5227_v33 = vld [vmem:[%s7584_s4 + $0xc0] sm:$0xff] }
  0x68   : > { %5305 = vmatpush.bf16.msra.mxu3 %v5653_v35 }
  0x6c   : > { %5306 = vmatpush.bf16.msra.mxu3 %v5662_v37 }
  0x70   : > { %5307 = vmatpush.bf16.msra.mxu3 %v5673_v41 }
  0x73   : > { %498 = vmatmul.bf16.gmra.mxu0 %v394_v22 }
  0x83   : > { %503 = vmatmul.bf16.gmra.mxu0 %v395_v32  ;;  %v403_v32 = vpack.c.bf16 %v385_v27, %v384_v28  ;;  %v709_v27 = vadd.s32 56, %v5679_v45 }
  0x85   : > { %543 = vmatmul.bf16.gmra.mxu3 %v403_v32  ;;  %v388_v32 = vld [vmem:[%s5591_s12 + $0xf0] sm:$0xff] }
  0x86   : > { %v405_v40 = vpack.c.bf16 %v389_v36, %v388_v32 }
  0x93   : > { %508 = vmatmul.bf16.gmra.mxu0 %v396_v44  ;;  %v5228_v44 = vld [vmem:[%s7584_s4 + $0xc8] sm:$0xff] }
  0x94   : > { %2354 = vmatpush.bf16.msrb.mxu0 %v5228_v44 }
  0x98   : > { %2355 = vmatpush.bf16.msrb.mxu0 %v5227_v33 }
  0xa3   : > { %513 = vmatmul.bf16.gmra.mxu0 %v397_v57 }
  0xb0   : > { %v479_v63 = vpop.f32.mrf.mxu0 }
  0xb1   : > { %v563_v0 = vmul.f32 %v5702_v60, %v479_v63  ;;  %v707_v63 = vadd.s32 40, %v5679_v45 }
  0xb3   : > { %v599_v2 = vadd.f32 %v5707_v61, %v563_v0  ;;  %518 = vmatmul.bf16.gmra.mxu0 %v398_v62  ;;  %v773_v7 = vand.u32 15, %v707_v63 }
  0xb5   : > { %v631_v5 = vmax.f32 %v599_v2, 0.0  ;;  %v387_v2 = vld [vmem:[%s5591_s12 + $0xe8] sm:$0xff]  ;;  %vm1219_vm4 = vcmp.le.s32.totalorder %v773_v7, 14  ;;  %v5247_v7 = vld [vmem:[%s7584_s4 + $0x160] sm:$0xff] }
  0xb7   : > { %669 = vst [vmem:[#allocation3 + $0x18] sm:$0xff] %v631_v5 }
  0xb8   : > { %v481_v9 = vpop.f32.mrf.mxu0 }
  0xb9   : > { %v564_v10 = vmul.f32 %v5702_v60, %v481_v9  ;;  %v708_v9 = vadd.s32 48, %v5679_v45 }
  0xbb   : > { %v600_v12 = vadd.f32 %v5707_v61, %v564_v10 }
  0xbd   : > { %v632_v16 = vmax.f32 %v600_v12, 0.0  ;;  %v780_v12 = vand.u32 15, %v708_v9 }
  0xbe   : > { %v5734_v22 = vld [vmem:[#allocation3 + $0x17] sm:$0xff] }
  0xbf   : > { %670 = vst [vmem:[#allocation3 + $0x20] sm:$0xff] %v632_v16  ;;  %v1608_v19 = vpack.c.bf16 %v632_v16, %v631_v5  ;;  %v1344_v30 = vmul.f32 %v5737_v23, %v5734_v22  ;;  %v404_v5 = vpack.c.bf16 %v387_v2, %v386_v1  ;;  %v5804_v16 = vsel %vm1219_vm4, 1.0, %v7591_v42 }
  0xc0   : > { %v484_v20 = vpop.f32.mrf.mxu0  ;;  %vm1124_vm5 = vcmp.ge.s32.totalorder %v780_v12, 1  ;;  %v712_v12 = vadd.s32 80, %v5679_v45 }
  0xc1   : > { %v565_v21 = vmul.f32 %v5702_v60, %v484_v20  ;;  %1701 = vmatmul.bf16.gmra.mxu2 %v1608_v19  ;;  %548 = vmatmul.bf16.gmra.mxu3 %v404_v5 }
  0xc3   : > { %v601_v26 = vadd.f32 %v5707_v61, %v565_v21  ;;  %523 = vmatmul.bf16.gmra.mxu0 %v399_v18  ;;  %v401_v18 = vpack.c.bf16 %v381_v14, %v380_v13 }
  0xc5   : > { %v633_v29 = vmax.f32 %v601_v26, 0.0  ;;  %v5816_v26 = vsel %vm1124_vm5, 1.0, %v7591_v42 }
  0xc6   : > { %v5749_v34 = vld [vmem:[#allocation3 + $0x1f] sm:$0xff]  ;;  %7660 = vst [vmem:[#allocation13_spill] sm:$0xff] %v5816_v26 }
  0xc7   : > { %671 = vst [vmem:[#allocation3 + $0x28] sm:$0xff] %v633_v29  ;;  %v1375_v39 = vpack.c.bf16 %v5749_v34, %v1344_v30  ;;  %v5779_v58 = vld [vmem:[#allocation3 + $0x19] sm:$0xff] }
  0xc8   : > { %v486_v31 = vpop.f32.mrf.mxu0  ;;  %7657 = vst [vmem:[#allocation10_spill] sm:$0xff] %v5779_v58 }
  0xc9   : > { %v566_v43 = vmul.f32 %v5702_v60, %v486_v31  ;;  %1467 = vmatmul.bf16.gmra.mxu1 %v1375_v39 }
  0xcb   : > { %v602_v46 = vadd.f32 %v5707_v61, %v566_v43  ;;  %v787_v43 = vand.u32 15, %v709_v27 }
  0xcd   : > { %v634_v51 = vmax.f32 %v602_v46, 0.0  ;;  %v710_v46 = vadd.s32 64, %v5679_v45  ;;  %vm1221_vm6 = vcmp.le.s32.totalorder %v787_v43, 14 }
  0xce   : > { %v5771_v53 = vld [vmem:[#allocation3 + $0x21] sm:$0xff] }
  0xcf   : > { %672 = vst [vmem:[#allocation3 + $0x30] sm:$0xff] %v634_v51  ;;  %v1609_v55 = vpack.c.bf16 %v634_v51, %v633_v29  ;;  %v5776_v35 = vmul.f32 %v5766_v52, %v5771_v53  ;;  %v5784_v62 = vld [vmem:[#allocation3 + $0x27] sm:$0xff]  ;;  %v794_v51 = vand.u32 15, %v710_v46 }
  0xd0   : > { %v489_v56 = vpop.f32.mrf.mxu0  ;;  %v1346_v4 = vmul.f32 %v5782_v59, %v5784_v62  ;;  %v2237_v27 = vmul.f32 %v5737_v23, %v5784_v62  ;;  %v713_v62 = vadd.s32 88, %v5679_v45 }
  0xd1   : > { %7656 = vst [vmem:[#allocation9_spill] sm:$0xff] %v5776_v35  ;;  %v567_v57 = vmul.f32 %v5702_v60, %v489_v56  ;;  %1706 = vmatmul.bf16.gmra.mxu2 %v1609_v55  ;;  %553 = vmatmul.bf16.gmra.mxu3 %v405_v40  ;;  %v2235_v56 = vmul.f32 %v5692_v50, %v5734_v22  ;;  %vm1126_vm7 = vcmp.ge.s32.totalorder %v794_v51, 1  ;;  %v711_v22 = vadd.s32 72, %v5679_v45  ;;  %v5237_v50 = vld [vmem:[%s7584_s4 + $0x110] sm:$0xff] }
  0xd2   : > { %v815_v51 = vand.u32 15, %v713_v62 }
  0xd3   : > { %v603_v37 = vadd.f32 %v5707_v61, %v567_v57  ;;  %528 = vmatmul.bf16.gmra.mxu0 %v400_v54  ;;  %v5835_v54 = vsel %vm1221_vm6, 1.0, %v7591_v42  ;;  %v2267_v2 = vpack.c.bf16 %v5749_v34, %v2235_v56  ;;  %v714_v56 = vadd.s32 96, %v5679_v45 }
  0xd4   : > { %vm1225_vm10 = vcmp.le.s32.totalorder %v815_v51, 14 }
  0xd5   : > { %v635_v3 = vmax.f32 %v603_v37, 0.0 }
  0xd6   : > { %v5795_v6 = vld [vmem:[#allocation3 + $0x2f] sm:$0xff] }
  0xd7   : > { %673 = vst [vmem:[#allocation3 + $0x38] sm:$0xff] %v635_v3  ;;  %v1376_v8 = vpack.c.bf16 %v5795_v6, %v1346_v4  ;;  %v5813_v25 = vld [vmem:[#allocation3 + $0x29] sm:$0xff]  ;;  %v5850_v4 = vsel %vm1126_vm7, 1.0, %v7591_v42 }
  0xd8   : > { %v491_v10 = vpop.f32.mrf.mxu0  ;;  %7662 = vst [vmem:[#allocation15_spill] sm:$0xff] %v5850_v4 }
  0xd9   : > { %v568_v11 = vmul.f32 %v5702_v60, %v491_v10  ;;  %1472 = vmatmul.bf16.gmra.mxu1 %v1376_v8 }
  0xdb   : > { %v604_v41 = vadd.f32 %v5707_v61, %v568_v11  ;;  %v801_v11 = vand.u32 15, %v711_v22 }
  0xdd   : > { %v636_v15 = vmax.f32 %v604_v41, 0.0  ;;  %vm1223_vm8 = vcmp.le.s32.totalorder %v801_v11, 14 }
  0xde   : > { %v5806_v17 = vld [vmem:[#allocation3 + $0x31] sm:$0xff] }
  0xdf   : > { %674 = vst [vmem:[#allocation3 + $0x40] sm:$0xff] %v636_v15  ;;  %v1610_v19 = vpack.c.bf16 %v636_v15, %v635_v3  ;;  %v5810_v21 = vmul.f32 %v5804_v16, %v5806_v17  ;;  %v5818_v28 = vld [vmem:[#allocation3 + $0x37] sm:$0xff] }
  0xe0   : > { %v494_v20 = vpop.f32.mrf.mxu0  ;;  %v1348_v39 = vmul.f32 %v5816_v26, %v5818_v28 }
  0xe1   : > { %7659 = vst [vmem:[#allocation12_spill] sm:$0xff] %v5810_v21  ;;  %v569_v24 = vmul.f32 %v5702_v60, %v494_v20  ;;  %1711 = vmatmul.bf16.gmra.mxu2 %v1610_v19  ;;  %v5867_v20 = vsel %vm1223_vm8, 1.0, %v7591_v42 }
  0xe3   : > { %v605_v30 = vadd.f32 %v5707_v61, %v569_v24  ;;  %533 = vmatmul.bf16.gmra.mxu0 %v401_v18  ;;  %v808_v18 = vand.u32 15, %v712_v12 }
  0xe5   : > { %v637_v38 = vmax.f32 %v605_v30, 0.0  ;;  %vm1128_vm9 = vcmp.ge.s32.totalorder %v808_v18, 1 }
  0xe6   : > { %v5828_v31 = vld [vmem:[#allocation3 + $0x3f] sm:$0xff]  ;;  %v5882_v43 = vsel %vm1128_vm9, 1.0, %v7591_v42 }
  0xe7   : > { %675 = vst [vmem:[#allocation3 + $0x48] sm:$0xff] %v637_v38  ;;  %v1377_v44 = vpack.c.bf16 %v5828_v31, %v1348_v39  ;;  %v5847_v3 = vld [vmem:[#allocation3 + $0x39] sm:$0xff]  ;;  %v2268_v39 = vpack.c.bf16 %v5795_v6, %v2237_v27  ;;  %v539_v27 = vpop.f32.mrf.mxu3 }
  0xe8   : > { %v496_v47 = vpop.f32.mrf.mxu0  ;;  %7664 = vst [vmem:[#allocation17_spill] sm:$0xff] %v5882_v43 }
  0xe9   : > { %v570_v48 = vmul.f32 %v5702_v60, %v496_v47  ;;  %1477 = vmatmul.bf16.gmra.mxu1 %v1377_v44 }
  0xeb   : > { %v606_v49 = vadd.f32 %v5707_v61, %v570_v48 }
  0xed   : > { %v638_v33 = vmax.f32 %v606_v49, 0.0 }
  0xee   : > { %v5837_v55 = vld [vmem:[#allocation3 + $0x41] sm:$0xff] }
  0xef   : > { %676 = vst [vmem:[#allocation3 + $0x50] sm:$0xff] %v638_v33  ;;  %v1611_v57 = vpack.c.bf16 %v638_v33, %v637_v38  ;;  %v5843_v37 = vmul.f32 %v5835_v54, %v5837_v55  ;;  %v5852_v5 = vld [vmem:[#allocation3 + $0x47] sm:$0xff] }
  0xf0   : > { %v499_v63 = vpop.f32.mrf.mxu0  ;;  %v1350_v34 = vmul.f32 %v5850_v4, %v5852_v5 }
  0xf1   : > { %7661 = vst [vmem:[#allocation14_spill] sm:$0xff] %v5843_v37  ;;  %v571_v1 = vmul.f32 %v5702_v60, %v499_v63  ;;  %1716 = vmatmul.bf16.gmra.mxu2 %v1611_v57 }
  0xf3   : > { %v607_v8 = vadd.f32 %v5707_v61, %v571_v1  ;;  %2356 = vmatmul.bf16.vlgmr.msrb.gmra.mxu0 %v2267_v2  ;;  %v822_v2 = vand.u32 15, %v714_v56 }
  0xf5   : > { %v639_v9 = vmax.f32 %v607_v8, 0.0  ;;  %v5899_v8 = vsel %vm1225_vm10, 1.0, %v7591_v42  ;;  %vm1130_vm11 = vcmp.ge.s32.totalorder %v822_v2, 1 }
  0xf6   : > { %v5860_v10 = vld [vmem:[#allocation3 + $0x4f] sm:$0xff]  ;;  %v5914_v18 = vsel %vm1130_vm11, 1.0, %v7591_v42 }
  0xf7   : > { %677 = vst [vmem:[#allocation3 + $0x58] sm:$0xff] %v639_v9  ;;  %v1378_v41 = vpack.c.bf16 %v5860_v10, %v1350_v34  ;;  %v5879_v40 = vld [vmem:[#allocation3 + $0x49] sm:$0xff]  ;;  %v2239_v34 = vmul.f32 %v5782_v59, %v5818_v28  ;;  %v715_v28 = vadd.s32 104, %v5679_v45 }
  0xf8   : > { %v501_v13 = vpop.f32.mrf.mxu0  ;;  %7666 = vst [vmem:[#allocation19_spill] sm:$0xff] %v5914_v18 }
  0xf9   : > { %v572_v14 = vmul.f32 %v5702_v60, %v501_v13  ;;  %1482 = vmatmul.bf16.gmra.mxu1 %v1378_v41 }
  0xfb   : > { %v608_v15 = vadd.f32 %v5707_v61, %v572_v14  ;;  %v2269_v14 = vpack.c.bf16 %v5828_v31, %v2239_v34 }
  0xfd   : > { %v640_v19 = vmax.f32 %v608_v15, 0.0 }
  0xfe   : > { %v5869_v24 = vld [vmem:[#allocation3 + $0x51] sm:$0xff] }
  0xff   : > { %678 = vst [vmem:[#allocation3 + $0x60] sm:$0xff] %v640_v19  ;;  %v1612_v30 = vpack.c.bf16 %v640_v19, %v639_v9  ;;  %v5875_v36 = vmul.f32 %v5867_v20, %v5869_v24  ;;  %v5884_v44 = vld [vmem:[#allocation3 + $0x57] sm:$0xff] }
 0x100   : > { %v504_v32 = vpop.f32.mrf.mxu0  ;;  %v1352_v6 = vmul.f32 %v5882_v43, %v5884_v44 }
 0x101   : > { %7663 = vst [vmem:[#allocation16_spill] sm:$0xff] %v5875_v36  ;;  %v573_v38 = vmul.f32 %v5702_v60, %v504_v32  ;;  %1721 = vmatmul.bf16.gmra.mxu2 %v1612_v30 }
 0x103   : > { %v609_v47 = vadd.f32 %v5707_v61, %v573_v38  ;;  %2361 = vmatmul.bf16.gmra.mxu0 %v2268_v39  ;;  %v829_v39 = vand.u32 15, %v715_v28 }
 0x105   : > { %v641_v48 = vmax.f32 %v609_v47, 0.0  ;;  %v716_v47 = vadd.s32 112, %v5679_v45  ;;  %vm1227_vm12 = vcmp.le.s32.totalorder %v829_v39, 14 }
 0x106   : > { %v5892_v49 = vld [vmem:[#allocation3 + $0x5f] sm:$0xff] }
 0x107   : > { %679 = vst [vmem:[#allocation3 + $0x68] sm:$0xff] %v641_v48  ;;  %v1379_v33 = vpack.c.bf16 %v5892_v49, %v1352_v6  ;;  %v5911_v15 = vld [vmem:[#allocation3 + $0x59] sm:$0xff] }
 0x108   : > { %v506_v57 = vpop.f32.mrf.mxu0 }
 0x109   : > { %v574_v63 = vmul.f32 %v5702_v60, %v506_v57  ;;  %1487 = vmatmul.bf16.gmra.mxu1 %v1379_v33  ;;  %v836_v33 = vand.u32 15, %v716_v47  ;;  %v5931_v57 = vsel %vm1227_vm12, 1.0, %v7591_v42 }
 0x10b   : > { %v610_v1 = vadd.f32 %v5707_v61, %v574_v63  ;;  %v1463_v63 = vpop.f32.mrf.mxu1  ;;  %vm1132_vm13 = vcmp.ge.s32.totalorder %v836_v33, 1  ;;  %v718_v33 = vadd.s32 128, %v5679_v45 }
 0x10d   : > { %v642_v22 = vmax.f32 %v610_v1, 0.0  ;;  %v1697_v1 = vpop.f32.mrf.mxu2 }
 0x10e   : > { %v5901_v9 = vld [vmem:[#allocation3 + $0x61] sm:$0xff] }
 0x10f   : > { %680 = vst [vmem:[#allocation3 + $0x70] sm:$0xff] %v642_v22  ;;  %v1613_v11 = vpack.c.bf16 %v642_v22, %v641_v48  ;;  %v5907_v12 = vmul.f32 %v5899_v8, %v5901_v9  ;;  %v5916_v19 = vld [vmem:[#allocation3 + $0x67] sm:$0xff]  ;;  %v2241_v22 = vmul.f32 %v5816_v26, %v5852_v5  ;;  %v722_v26 = vadd.s32 160, %v5679_v45 }
 0x110   : > { %v509_v41 = vpop.f32.mrf.mxu0  ;;  %v1354_v31 = vmul.f32 %v5914_v18, %v5916_v19 }
 0x111   : > { %7665 = vst [vmem:[#allocation18_spill] sm:$0xff] %v5907_v12  ;;  %v575_v13 = vmul.f32 %v5702_v60, %v509_v41  ;;  %1726 = vmatmul.bf16.gmra.mxu2 %v1613_v11  ;;  %v5937_v11 = vadd.f32 %v1697_v1, %v1463_v63  ;;  %v2270_v28 = vpack.c.bf16 %v5860_v10, %v2241_v22  ;;  %v725_v12 = vadd.s32 184, %v5679_v45 }
 0x113   : > { %v611_v30 = vadd.f32 %v5707_v61, %v575_v13  ;;  %2366 = vmatmul.bf16.gmra.mxu0 %v2269_v14  ;;  %7667 = vst [vmem:[#allocation20_spill] sm:$0xff] %v5937_v11  ;;  %v6010_v46 = vpop.f32.mrf.mxu1  ;;  %v5236_v11 = vld [vmem:[%s7584_s4 + $0x108] sm:$0xff] }
 0x114   : > { %7673 = vst [vmem:[#allocation26_spill] sm:$0xff] %v6010_v46  ;;  %v721_v46 = vadd.s32 152, %v5679_v45 }
 0x115   : > { %v643_v32 = vmax.f32 %v611_v30, 0.0 }
 0x116   : > { %v5924_v38 = vld [vmem:[#allocation3 + $0x6f] sm:$0xff] }
 0x117   : > { %681 = vst [vmem:[#allocation3 + $0x78] sm:$0xff] %v643_v32  ;;  %v1380_v62 = vpack.c.bf16 %v5924_v38, %v1354_v31  ;;  %v5945_v30 = vld [vmem:[#allocation3 + $0x69] sm:$0xff]  ;;  %v5948_v31 = vsel %vm1132_vm13, 1.0, %v7591_v42 }
 0x118   : > { %v511_v48 = vpop.f32.mrf.mxu0  ;;  %7669 = vst [vmem:[#allocation22_spill] sm:$0xff] %v5948_v31 }
 0x119   : > { %v576_v6 = vmul.f32 %v5702_v60, %v511_v48  ;;  %1492 = vmatmul.bf16.gmra.mxu1 %v1380_v62 }
 0x11b   : > { %v612_v51 = vadd.f32 %v5707_v61, %v576_v6 }
 0x11d   : > { %v644_v56 = vmax.f32 %v612_v51, 0.0 }
 0x11e   : > { %v5933_v2 = vld [vmem:[#allocation3 + $0x71] sm:$0xff] }
 0x11f   : > { %682 = vst [vmem:[#allocation3 + $0x80] sm:$0xff] %v644_v56  ;;  %v1614_v34 = vpack.c.bf16 %v644_v56, %v643_v32  ;;  %v5941_v13 = vmul.f32 %v5931_v57, %v5933_v2  ;;  %v5950_v5 = vld [vmem:[#allocation3 + $0x77] sm:$0xff]  ;;  %v717_v32 = vadd.s32 120, %v5679_v45 }
 0x120   : > { %v514_v41 = vpop.f32.mrf.mxu0  ;;  %v1356_v10 = vmul.f32 %v5948_v31, %v5950_v5  ;;  %v5242_v56 = vld [vmem:[%s7584_s4 + $0x138] sm:$0xff] }
 0x121   : > { %7668 = vst [vmem:[#allocation21_spill] sm:$0xff] %v5941_v13  ;;  %v577_v14 = vmul.f32 %v5702_v60, %v514_v41  ;;  %1731 = vmatmul.bf16.gmra.mxu2 %v1614_v34  ;;  %v843_v6 = vand.u32 15, %v717_v32  ;;  %2646 = vmatpush.bf16.msrb.mxu1 %v5242_v56  ;;  %v850_v34 = vand.u32 15, %v718_v33  ;;  %v2243_v32 = vmul.f32 %v5850_v4, %v5884_v44 }
 0x123   : > { %v613_v62 = vadd.f32 %v5707_v61, %v577_v14  ;;  %2371 = vmatmul.bf16.gmra.mxu0 %v2270_v28  ;;  %vm1229_vm14 = vcmp.le.s32.totalorder %v843_v6, 14  ;;  %vm1134_vm15 = vcmp.ge.s32.totalorder %v850_v34, 1  ;;  %v5250_v6 = vld [vmem:[%s7584_s4 + $0x178] sm:$0xff]  ;;  %v2271_v56 = vpack.c.bf16 %v5892_v49, %v2243_v32  ;;  %v5249_v49 = vld [vmem:[%s7584_s4 + $0x170] sm:$0xff] }
 0x124   : > { %v5968_v14 = vsel %vm1229_vm14, 1.0, %v7591_v42  ;;  %v5986_v44 = vsel %vm1134_vm15, 1.0, %v7591_v42  ;;  %2976 = vmatpush.bf16.msrb.mxu2 %v5250_v6 }
 0x125   : > { %v645_v47 = vmax.f32 %v613_v62, 0.0  ;;  %7671 = vst [vmem:[#allocation24_spill] sm:$0xff] %v5986_v44 }
 0x126   : > { %v5958_v48 = vld [vmem:[#allocation3 + $0x7f] sm:$0xff] }
 0x127   : > { %683 = vst [vmem:[#allocation3 + $0x88] sm:$0xff] %v645_v47  ;;  %v1381_v51 = vpack.c.bf16 %v5958_v48, %v1356_v10 }
 0x128   : > { %v516_v63 = vpop.f32.mrf.mxu0  ;;  %2977 = vmatpush.bf16.msrb.mxu2 %v5249_v49 }
 0x129   : > { %v578_v1 = vmul.f32 %v5702_v60, %v516_v63  ;;  %1497 = vmatmul.bf16.gmra.mxu1 %v1381_v51  ;;  %v5983_v63 = vld [vmem:[#allocation3 + $0x79] sm:$0xff] }
 0x12b   : > { %v614_v22 = vadd.f32 %v5707_v61, %v578_v1  ;;  %v719_v1 = vadd.s32 136, %v5679_v45 }
 0x12d   : > { %v646_v41 = vmax.f32 %v614_v22, 0.0  ;;  %v720_v22 = vadd.s32 144, %v5679_v45 }
 0x12e   : > { %v5970_v28 = vld [vmem:[#allocation3 + $0x81] sm:$0xff] }
 0x12f   : > { %684 = vst [vmem:[#allocation3 + $0x90] sm:$0xff] %v646_v41  ;;  %v1615_v62 = vpack.c.bf16 %v646_v41, %v645_v47  ;;  %v5979_v51 = vmul.f32 %v5968_v14, %v5970_v28  ;;  %v5988_v47 = vld [vmem:[#allocation3 + $0x87] sm:$0xff]  ;;  %v864_v49 = vand.u32 15, %v720_v22  ;;  %v2245_v22 = vmul.f32 %v5882_v43, %v5916_v19 }
 0x130   : > { %v519_v10 = vpop.f32.mrf.mxu0  ;;  %v1358_v32 = vmul.f32 %v5986_v44, %v5988_v47 }
 0x131   : > { %7670 = vst [vmem:[#allocation23_spill] sm:$0xff] %v5979_v51  ;;  %v579_v33 = vmul.f32 %v5702_v60, %v519_v10  ;;  %1736 = vmatmul.bf16.gmra.mxu2 %v1615_v62  ;;  %v857_v10 = vand.u32 15, %v719_v1  ;;  %vm1136_vm1 = vcmp.ge.s32.totalorder %v864_v49, 1  ;;  %v2272_v19 = vpack.c.bf16 %v5924_v38, %v2245_v22 }
 0x132   : > { %v6044_v49 = vsel %vm1136_vm1, 1.0, %v7591_v42 }
 0x133   : > { %v615_v34 = vadd.f32 %v5707_v61, %v579_v33  ;;  %2376 = vmatmul.bf16.gmra.mxu0 %v2271_v56  ;;  %v5248_v33 = vld [vmem:[%s7584_s4 + $0x168] sm:$0xff]  ;;  %vm1231_vm0 = vcmp.le.s32.totalorder %v857_v10, 14  ;;  %7676 = vst [vmem:[#allocation29_spill] sm:$0xff] %v6044_v49 }
 0x134   : > { %2978 = vmatpush.bf16.msrb.mxu2 %v5248_v33 }
 0x135   : > { %v647_v41 = vmax.f32 %v615_v34, 0.0  ;;  %v6007_v34 = vpop.f32.mrf.mxu2 }
 0x136   : > { %v5999_v62 = vld [vmem:[#allocation3 + $0x8f] sm:$0xff]  ;;  %7672 = vst [vmem:[#allocation25_spill] sm:$0xff] %v6007_v34  ;;  %v541_v34 = vpop.f32.mrf.mxu3 }
 0x137   : > { %685 = vst [vmem:[#allocation3 + $0x98] sm:$0xff] %v647_v41  ;;  %v1382_v6 = vpack.c.bf16 %v5999_v62, %v1358_v32  ;;  %v5241_v32 = vld [vmem:[%s7584_s4 + $0x130] sm:$0xff] }
 0x138   : > { %v521_v39 = vpop.f32.mrf.mxu0  ;;  %2647 = vmatpush.bf16.msrb.mxu1 %v5241_v32  ;;  %2979 = vmatpush.bf16.msrb.mxu2 %v5247_v7  ;;  %v5246_v32 = vld [vmem:[%s7584_s4 + $0x158] sm:$0xff] }
 0x139   : > { %v580_v56 = vmul.f32 %v5702_v60, %v521_v39  ;;  %1502 = vmatmul.bf16.gmra.mxu1 %v1382_v6  ;;  %v6019_v6 = vsel %vm1231_vm0, 1.0, %v7591_v42 }
 0x13a   : > { %7674 = vst [vmem:[#allocation27_spill] sm:$0xff] %v6019_v6 }
 0x13b   : > { %v616_v1 = vadd.f32 %v5707_v61, %v580_v56  ;;  %v587_v56 = vmul.f32 %v5702_v60, %v539_v27 }
 0x13c   : > { %2980 = vmatpush.bf16.msrb.mxu2 %v5246_v32 }
 0x13d   : > { %v648_v39 = vmax.f32 %v616_v1, 0.0  ;;  %v5240_v1 = vld [vmem:[%s7584_s4 + $0x128] sm:$0xff]  ;;  %v6039_v27 = vadd.f32 %v5707_v61, %v587_v56  ;;  %v5239_v56 = vld [vmem:[%s7584_s4 + $0x120] sm:$0xff] }
 0x13e   : > { %v6021_v10 = vld [vmem:[#allocation3 + $0x91] sm:$0xff]  ;;  %2648 = vmatpush.bf16.msrb.mxu1 %v5240_v1 }
 0x13f   : > { %686 = vst [vmem:[#allocation3 + $0xa0] sm:$0xff] %v648_v39  ;;  %v1616_v33 = vpack.c.bf16 %v648_v39, %v647_v41  ;;  %v6034_v7 = vmul.f32 %v6019_v6, %v6021_v10  ;;  %v6041_v41 = vld [vmem:[#allocation3 + $0x89] sm:$0xff]  ;;  %v6046_v39 = vld [vmem:[#allocation3 + $0x97] sm:$0xff]  ;;  %v7597_v22 = vmax.f32 %v6039_v27, 0.0  ;;  %v7687_v13 = vmax.f32 %v6039_v27, 0.0 }
 0x140   : > { %v524_v29 = vpop.f32.mrf.mxu0  ;;  %v5245_v1 = vld [vmem:[%s7584_s4 + $0x150] sm:$0xff]  ;;  %v1360_v42 = vmul.f32 %v6044_v49, %v6046_v39 }
 0x141   : > { %7675 = vst [vmem:[#allocation28_spill] sm:$0xff] %v6034_v7  ;;  %v581_v0 = vmul.f32 %v5702_v60, %v524_v29  ;;  %1741 = vmatmul.bf16.gmra.mxu2 %v1616_v33  ;;  %v871_v29 = vand.u32 15, %v721_v46 }
 0x142   : > { %693 = vst [vmem:[#allocation3 + $0xd8] sm:$0xff] %v7597_v22  ;;  %2649 = vmatpush.bf16.msrb.mxu1 %v5239_v56  ;;  %2981 = vmatpush.bf16.msrb.mxu2 %v5245_v1  ;;  %v5238_v22 = vld [vmem:[%s7584_s4 + $0x118] sm:$0xff]  ;;  %v5244_v56 = vld [vmem:[%s7584_s4 + $0x148] sm:$0xff]  ;;  %v878_v1 = vand.u32 15, %v722_v26 }
 0x143   : > { %v617_v38 = vadd.f32 %v5707_v61, %v581_v0  ;;  %2381 = vmatmul.bf16.gmra.mxu0 %v2272_v19  ;;  %vm1233_vm2 = vcmp.le.s32.totalorder %v871_v29, 14  ;;  %v2247_v29 = vmul.f32 %v5914_v18, %v5950_v5  ;;  %v723_v18 = vadd.s32 168, %v5679_v45 }
 0x144   : > { %v1702_v33 = vpop.f32.mrf.mxu2  ;;  %vm1138_vm3 = vcmp.ge.s32.totalorder %v878_v1, 1 }
 0x145   : > { %v649_v32 = vmax.f32 %v617_v38, 0.0  ;;  %v588_v38 = vmul.f32 %v5702_v60, %v541_v34  ;;  %v2273_v5 = vpack.c.bf16 %v5958_v48, %v2247_v29 }
 0x146   : > { %v1468_v0 = vpop.f32.mrf.mxu1  ;;  %v6063_v19 = vld [vmem:[#allocation3 + $0x9f] sm:$0xff]  ;;  %2650 = vmatpush.bf16.msrb.mxu1 %v5238_v22  ;;  %2982 = vmatpush.bf16.msrb.mxu2 %v5244_v56 }
 0x147   : > { %687 = vst [vmem:[#allocation3 + $0xa8] sm:$0xff] %v649_v32  ;;  %v1383_v43 = vpack.c.bf16 %v6063_v19, %v1360_v42  ;;  %v6066_v4 = vadd.f32 %v1702_v33, %v1468_v0  ;;  %v624_v42 = vadd.f32 %v5707_v61, %v588_v38  ;;  %v544_v33 = vpop.f32.mrf.mxu3  ;;  %v7678_v38 = vmov 0.0  }
 0x148   : > { %v526_v59 = vpop.f32.mrf.mxu0  ;;  %v6114_v1 = vsel %vm1138_vm3, 1.0, %v7678_v38 }
 0x149   : > { %7677 = vst [vmem:[#allocation30_spill] sm:$0xff] %v6066_v4  ;;  %v582_v46 = vmul.f32 %v5702_v60, %v526_v59  ;;  %1507 = vmatmul.bf16.gmra.mxu1 %v1383_v43  ;;  %v656_v0 = vmax.f32 %v624_v42, 0.0  ;;  %v5243_v59 = vld [vmem:[%s7584_s4 + $0x140] sm:$0xff]  ;;  %v6086_v4 = vsel %vm1233_vm2, 1.0, %v7678_v38  ;;  %v589_v42 = vmul.f32 %v5702_v60, %v544_v33 }
 0x14a   : > { %7679 = vst [vmem:[#allocation31_spill] sm:$0xff] %v6086_v4  ;;  %2651 = vmatpush.bf16.msrb.mxu1 %v5237_v50  ;;  %2983 = vmatpush.bf16.msrb.mxu2 %v5243_v59 }
 0x14b   : > { %v618_v34 = vadd.f32 %v5707_v61, %v582_v46  ;;  %694 = vst [vmem:[#allocation3 + $0xe0] sm:$0xff] %v656_v0 }
 0x14c   : > { %v1704_v23 = vpop.f32.mrf.mxu2  ;;  %7685 = vst [vmem:[#allocation37_spill] sm:$0xff] %v6114_v1 }
 0x14d   : > { %v650_v43 = vmax.f32 %v618_v34, 0.0 }
 0x14e   : > { %v1470_v22 = vpop.f32.mrf.mxu1  ;;  %v6090_v26 = vld [vmem:[#allocation3 + $0xa1] sm:$0xff]  ;;  %2652 = vmatpush.bf16.msrb.mxu1 %v5236_v11 }
 0x14f   : > { %7680 = vst [vmem:[#allocation32_spill] sm:$0xff] %v6090_v26  ;;  %v6092_v56 = vadd.f32 %v1704_v23, %v1470_v22  ;;  %v1617_v46 = vpack.c.bf16 %v650_v43, %v649_v32  ;;  %v6100_v7 = vmul.f32 %v6086_v4, %v6090_v26  ;;  %v6105_v23 = vadd.f32 %v5707_v61, %v589_v42  ;;  %v6107_v32 = vld [vmem:[#allocation3 + $0x99] sm:$0xff]  ;;  %v6116_v59 = vld [vmem:[#allocation3 + $0xa7] sm:$0xff] }
 0x150   : > { %688 = vst [vmem:[#allocation3 + $0xb0] sm:$0xff] %v650_v43  ;;  %v529_v34 = vpop.f32.mrf.mxu0  ;;  %v6111_v33 = vmul.f32 %v5968_v14, %v6090_v26  ;;  %v546_v43 = vpop.f32.mrf.mxu3  ;;  %v1362_v48 = vmul.f32 %v6114_v1, %v6116_v59 }
 0x151   : > { %7681 = vst [vmem:[#allocation33_spill] sm:$0xff] %v6092_v56  ;;  %v583_v50 = vmul.f32 %v5702_v60, %v529_v34  ;;  %1746 = vmatmul.bf16.gmra.mxu2 %v1617_v46  ;;  %v7606_v29 = vmax.f32 %v6105_v23, 0.0  ;;  %v590_v46 = vmul.f32 %v5702_v60, %v546_v43  ;;  %v5235_v34 = vld [vmem:[%s7584_s4 + $0x100] sm:$0xff] }
 0x152   : > { %7682 = vst [vmem:[#allocation34_spill] sm:$0xff] %v6100_v7  ;;  %v724_v7 = vadd.s32 176, %v5679_v45  ;;  %2653 = vmatpush.bf16.msrb.mxu1 %v5235_v34 }
 0x153   : > { %7683 = vst [vmem:[#allocation35_spill] sm:$0xff] %v6107_v32  ;;  %v619_v22 = vadd.f32 %v5707_v61, %v583_v50  ;;  %2386 = vmatmul.bf16.gmra.mxu0 %v2273_v5  ;;  %v6134_v50 = vadd.f32 %v5707_v61, %v590_v46  ;;  %v885_v46 = vand.u32 15, %v723_v18  ;;  %v899_v18 = vand.u32 15, %v725_v12 }
 0x154   : > { %7684 = vst [vmem:[#allocation36_spill] sm:$0xff] %v6111_v33  ;;  %v1707_v42 = vpop.f32.mrf.mxu2 }
 0x155   : > { %v651_v56 = vmax.f32 %v619_v22, 0.0  ;;  %695 = vst [vmem:[#allocation3 + $0xe8] sm:$0xff] %v7606_v29  ;;  %v7610_v22 = vmax.f32 %v6134_v50, 0.0  ;;  %v6145_v29 = vpack.c.bf16 %v656_v0, %v7687_v13  ;;  %vm1235_vm4 = vcmp.le.s32.totalorder %v885_v46, 14 }
 0x156   : > { %v1473_v5 = vpop.f32.mrf.mxu1  ;;  %vm6172_vm7 = vcmp.le.s32.totalorder %v899_v18, 14 }
 0x157   : > { %v6136_v43 = vld [vmem:[#allocation3 + $0xaf] sm:$0xff]  ;;  %689 = vst [vmem:[#allocation3 + $0xb8] sm:$0xff] %v651_v56  ;;  %v6140_v11 = vadd.f32 %v1707_v42, %v1473_v5  ;;  %v892_v42 = vand.u32 15, %v724_v7  ;;  %v6202_v7 = vld [vmem:[#allocation3] sm:$0xff] }
 0x158   : > { %v1384_v51 = vpack.c.bf16 %v6136_v43, %v1362_v48  ;;  %v531_v33 = vpop.f32.mrf.mxu0  ;;  %696 = vst [vmem:[#allocation3 + $0xf0] sm:$0xff] %v7610_v22  ;;  %v729_v48 = vadd.s32 216, %v5679_v45  ;;  %v549_v34 = vpop.f32.mrf.mxu3 }
 0x159   : > { %7686 = vst [vmem:[#allocation38_spill] sm:$0xff] %v6140_v11  ;;  %v584_v36 = vmul.f32 %v5702_v60, %v531_v33  ;;  %v591_v11 = vmul.f32 %v5702_v60, %v549_v34  ;;  %v2249_v33 = vmul.f32 %v5948_v31, %v5988_v47  ;;  %vm6159_vm6 = vcmp.ge.s32.totalorder %v892_v42, 1  ;;  %v6192_v31 = vld [vmem:[#allocation3 + $0xd9] sm:$0xff] }
 0x15a   : > { %1512 = vmatmul.bf16.gmra.mxu1 %v1384_v51  ;;  %v927_v27 = vand.u32 15, %v729_v48  ;;  %v6188_v18 = vsel %vm6159_vm6, 1.0, %v7678_v38  ;;  %7696 = vst [vmem:[#allocation43_spill] sm:$0xff] %v6192_v31 }
 0x15b   : > { %v620_v5 = vadd.f32 %v5707_v61, %v584_v36  ;;  %v6155_v37 = vadd.f32 %v5707_v61, %v591_v11  ;;  %v703_v36 = vadd.s32 8, %v5679_v45  ;;  %v6170_v11 = vsel %vm1235_vm4, 1.0, %v7678_v38  ;;  %7695 = vst [vmem:[#allocation42_spill] sm:$0xff] %v6188_v18 }
 0x15c   : > { %v1709_v13 = vpop.f32.mrf.mxu2  ;;  %vm1241_vm5 = vcmp.le.s32.totalorder %v927_v27, 14  ;;  %v6176_v42 = vld [vmem:[#allocation3 + $0xe1] sm:$0xff] }
 0x15d   : > { %v652_v0 = vmax.f32 %v620_v5, 0.0  ;;  %v7612_v12 = vmax.f32 %v6155_v37, 0.0  ;;  %7694 = vst [vmem:[#allocation41_spill] sm:$0xff] %v6176_v42  ;;  %v6179_v27 = vsel %vm1241_vm5, 1.0, %v7678_v38  ;;  %v6207_v38 = vsel %vm6172_vm7, 1.0, %v6202_v7 }
 0x15e   : > { %v1475_v51 = vpop.f32.mrf.mxu1  ;;  %v6167_v34 = vld [vmem:[#allocation3 + $0xb1] sm:$0xff]  ;;  %7699 = vst [vmem:[#allocation46_spill] sm:$0xff] %v6207_v38 }
 0x15f   : > { %690 = vst [vmem:[#allocation3 + $0xc0] sm:$0xff] %v652_v0  ;;  %v6164_v48 = vadd.f32 %v1709_v13, %v1475_v51  ;;  %v1618_v46 = vpack.c.bf16 %v652_v0, %v651_v56  ;;  %v2274_v56 = vpack.c.bf16 %v5999_v62, %v2249_v33  ;;  %v6190_v0 = vld [vmem:[#allocation3 + $0xb7] sm:$0xff]  ;;  %v745_v51 = vand.u32 15, %v703_v36 }
 0x160   : > { %7691 = vst [vmem:[#allocation40_spill] sm:$0xff] %v6167_v34  ;;  %v534_v5 = vpop.f32.mrf.mxu0  ;;  %v551_v22 = vpop.f32.mrf.mxu3  ;;  %v6211_v36 = vmul.f32 %v6179_v27, %v6176_v42  ;;  %v1364_v47 = vmul.f32 %v6188_v18, %v6190_v0 }
 0x161   : > { %7690 = vst [vmem:[#allocation39_spill] sm:$0xff] %v6164_v48  ;;  %v585_v13 = vmul.f32 %v5702_v60, %v534_v5  ;;  %1751 = vmatmul.bf16.gmra.mxu2 %v1618_v46  ;;  %v6196_v5 = vmul.f32 %v6170_v11, %v6167_v34  ;;  %v592_v33 = vmul.f32 %v5702_v60, %v551_v22  ;;  %v6200_v46 = vld [vmem:[#allocation3 + $0xa9] sm:$0xff]  ;;  %vm1215_vm8 = vcmp.le.s32.totalorder %v745_v51, 14 }
 0x162   : > { %697 = vst [vmem:[#allocation3 + $0xf8] sm:$0xff] %v7612_v12  ;;  %v6217_v22 = vmul.f32 %v6019_v6, %v6167_v34  ;;  %v7705_v51 = vmax.f32 %v6134_v50, 0.0 }
 0x163   : > { %7697 = vst [vmem:[#allocation44_spill] sm:$0xff] %v6196_v5  ;;  %v621_v62 = vadd.f32 %v5707_v61, %v585_v13  ;;  %2391 = vmatmul.bf16.gmra.mxu0 %v2274_v56  ;;  %v6221_v56 = vmul.f32 %v6207_v38, %v6176_v42  ;;  %v6226_v21 = vadd.f32 %v5707_v61, %v592_v33  ;;  %v726_v33 = vadd.s32 192, %v5679_v45 }
 0x164   : > { %7698 = vst [vmem:[#allocation45_spill] sm:$0xff] %v6200_v46  ;;  %v1712_v12 = vpop.f32.mrf.mxu2  ;;  %v727_v5 = vadd.s32 200, %v5679_v45 }
 0x165   : > { %7700 = vst [vmem:[#allocation47_spill] sm:$0xff] %v6211_v36  ;;  %v653_v48 = vmax.f32 %v621_v62, 0.0  ;;  %v7625_v6 = vmax.f32 %v6226_v21, 0.0  ;;  %v7704_v36 = vmax.f32 %v6105_v23, 0.0 }
 0x166   : > { %7701 = vst [vmem:[#allocation48_spill] sm:$0xff] %v6217_v22  ;;  %v1478_v32 = vpop.f32.mrf.mxu1  ;;  %v6230_v13 = vld [vmem:[#allocation3 + $0xbf] sm:$0xff] }
 0x167   : > { %7702 = vst [vmem:[#allocation49_spill] sm:$0xff] %v6221_v56  ;;  %v1385_v62 = vpack.c.bf16 %v6230_v13, %v1364_v47  ;;  %v6237_v34 = vadd.f32 %v1712_v12, %v1478_v32  ;;  %v6245_v26 = vpack.c.bf16 %v7705_v51, %v7704_v36  ;;  %v6250_v47 = vsel %vm1215_vm8, 1.0, %v6202_v7 }
 0x168   : > { %691 = vst [vmem:[#allocation3 + $0xc8] sm:$0xff] %v653_v48  ;;  %v536_v35 = vpop.f32.mrf.mxu0  ;;  %v731_v32 = vadd.s32 232, %v5679_v45  ;;  %v2864_v23 = vmul.f32 %v6250_v47, %v5771_v53  ;;  %v554_v12 = vpop.f32.mrf.mxu3  ;;  %v906_v36 = vand.u32 15, %v726_v33  ;;  %v2251_v53 = vmul.f32 %v5986_v44, %v6046_v39 }
 0x169   : > { %7703 = vst [vmem:[#allocation50_spill] sm:$0xff] %v6237_v34  ;;  %v586_v42 = vmul.f32 %v5702_v60, %v536_v35  ;;  %v593_v51 = vmul.f32 %v5702_v60, %v554_v12  ;;  %v5357_v34 = vld [vmem:[%s7583_s3] ss:$0 sm:$0xff] }
 0x16a   : > { %1517 = vmatmul.bf16.gmra.mxu1 %v1385_v62  ;;  %698 = vst [vmem:[#allocation3 + $0x100] sm:$0xff] %v7625_v6  ;;  %v941_v56 = vand.u32 15, %v731_v32  ;;  %v913_v62 = vand.u32 15, %v727_v5  ;;  %v2895_v46 = vpack.c.bf16 %v2864_v23, %v5779_v58  ;;  %vm1142_vm10 = vcmp.ge.s32.totalorder %v906_v36, 1  ;;  %v6269_v5 = vld [vmem:[#allocation3 + $0xf1] sm:$0xff] }
 0x16b   : > { %v622_v50 = vadd.f32 %v5707_v61, %v586_v42  ;;  %v629_v6 = vadd.f32 %v5357_v34, %v593_v51  ;;  %7708 = vst [vmem:[#allocation53_spill] sm:$0xff] %v6269_v5  ;;  %v2275_v39 = vpack.c.bf16 %v6063_v19, %v2251_v53  ;;  %v5358_v19 = vld [vmem:[%s7582_s2] ss:$0 sm:$0xff]  ;;  %v2533_v53 = vld [vmem:[#allocation3 + $0x18] sm:$0xff] }
 0x16c   : > { %v1714_v35 = vpop.f32.mrf.mxu2  ;;  %vm1243_vm9 = vcmp.le.s32.totalorder %v941_v56, 14  ;;  %vm1239_vm11 = vcmp.le.s32.totalorder %v913_v62, 14 }
 0x16d   : > { %v654_v22 = vmax.f32 %v622_v50, 0.0  ;;  %v661_v60 = vmax.f32 %v629_v6, 0.0  ;;  %v6272_v33 = vsel %vm1243_vm9, 1.0, %v6202_v7  ;;  %v6282_v6 = vsel %vm1142_vm10, 1.0, %v6202_v7 }
 0x16e   : > { %v1480_v31 = vpop.f32.mrf.mxu1  ;;  %7710 = vst [vmem:[#allocation55_spill] sm:$0xff] %v6282_v6  ;;  %v6300_v36 = vsel %vm1239_vm11, 1.0, %v6202_v7 }
 0x16f   : > { %692 = vst [vmem:[#allocation3 + $0xd0] sm:$0xff] %v654_v22  ;;  %v6265_v61 = vadd.f32 %v1714_v35, %v1480_v31  ;;  %v6267_v42 = vld [vmem:[#allocation3 + $0xc1] sm:$0xff]  ;;  %v6276_v56 = vpack.c.bf16 %v654_v22, %v653_v48  ;;  %v6279_v31 = vld [vmem:[#allocation3 + $0xe9] sm:$0xff]  ;;  %v6292_v48 = vmul.f32 %v6272_v33, %v6269_v5  ;;  %v6297_v22 = vld [vmem:[#allocation3 + $0xb9] sm:$0xff] }
 0x170   : > { %7707 = vst [vmem:[#allocation52_spill] sm:$0xff] %v6267_v42  ;;  %v6274_v32 = vpop.f32.mrf.mxu0  ;;  %v6284_v23 = vld [vmem:[#allocation3 + $0xc7] sm:$0xff]  ;;  %v556_v12 = vpop.f32.mrf.mxu3  ;;  %v6288_v50 = vmul.f32 %v6207_v38, %v6267_v42  ;;  %v6304_v51 = vmul.f32 %v6086_v4, %v6267_v42 }
 0x171   : > { %7706 = vst [vmem:[#allocation51_spill] sm:$0xff] %v6265_v61  ;;  %2984 = vmatmul.bf16.vlgmr.msrb.gmra.mxu2 %v2895_v46  ;;  %v594_v46 = vmul.f32 %v5358_v19, %v556_v12  ;;  %v2534_v35 = vld [vmem:[#allocation3 + $0x20] sm:$0xff]  ;;  %v1366_v12 = vmul.f32 %v6282_v6, %v6284_v23  ;;  %v728_v19 = vadd.s32 208, %v5679_v45 }
 0x172   : > { %7709 = vst [vmem:[#allocation54_spill] sm:$0xff] %v6274_v32 }
 0x173   : > { %699 = vst [vmem:[#allocation3 + $0x108] sm:$0xff] %v661_v60  ;;  %2396 = vmatmul.bf16.gmra.mxu0 %v2275_v39  ;;  %v6312_v39 = vmul.f32 %v6300_v36, %v6269_v5  ;;  %v630_v44 = vadd.f32 %v5357_v34, %v594_v46  ;;  %v7717_v34 = vmax.f32 %v6155_v37, 0.0  ;;  %v7718_v46 = vmax.f32 %v6226_v21, 0.0 }
 0x174   : > { %7711 = vst [vmem:[#allocation56_spill] sm:$0xff] %v6288_v50  ;;  %v1717_v62 = vpop.f32.mrf.mxu2  ;;  %v2565_v50 = vpack.c.bf16 %v2534_v35, %v2533_v53  ;;  %v2866_v37 = vmul.f32 %v5766_v52, %v5806_v17  ;;  %v2253_v17 = vmul.f32 %v6044_v49, %v6116_v59  ;;  %v2536_v49 = vld [vmem:[#allocation3 + $0x30] sm:$0xff] }
 0x175   : > { %7712 = vst [vmem:[#allocation57_spill] sm:$0xff] %v6292_v48  ;;  %v662_v42 = vmax.f32 %v630_v44, 0.0  ;;  %v6334_v32 = vpack.c.bf16 %v7718_v46, %v7717_v34 }
 0x176   : > { %7713 = vst [vmem:[#allocation58_spill] sm:$0xff] %v6304_v51  ;;  %v1483_v61 = vpop.f32.mrf.mxu1  ;;  %v6319_v38 = vld [vmem:[#allocation3 + $0xcf] sm:$0xff]  ;;  %v920_v51 = vand.u32 15, %v728_v19  ;;  %v2896_v46 = vpack.c.bf16 %v2866_v37, %v5813_v25 }
 0x177   : > { %7714 = vst [vmem:[#allocation59_spill] sm:$0xff] %v6312_v39  ;;  %v1386_v48 = vpack.c.bf16 %v6319_v38, %v1366_v12  ;;  %v6324_v5 = vadd.f32 %v1717_v62, %v1483_v61  ;;  %v6326_v58 = vld [vmem:[#allocation3 + $0xd1] sm:$0xff]  ;;  %v733_v12 = vadd.s32 248, %v5679_v45  ;;  %v6347_v21 = vld [vmem:[#allocation3 + $0xc9] sm:$0xff] }
 0x178   : > { %v6328_v4 = vpop.f32.mrf.mxu0  ;;  %700 = vst [vmem:[#allocation3 + $0x110] sm:$0xff] %v662_v42  ;;  %v6339_v61 = vmul.f32 %v6300_v36, %v6326_v58  ;;  %v6343_v44 = vmul.f32 %v6170_v11, %v6326_v58  ;;  %vm1144_vm12 = vcmp.ge.s32.totalorder %v920_v51, 1  ;;  %v6368_v51 = vld [vmem:[#allocation3 + $0xd7] sm:$0xff]  ;;  %v2276_v42 = vpack.c.bf16 %v6136_v43, %v2253_v17 }
 0x179   : > { %7715 = vst [vmem:[#allocation60_spill] sm:$0xff] %v6324_v5  ;;  %1522 = vmatmul.bf16.vlgmr.msrb.gmra.mxu3 %v1386_v48  ;;  %v955_v35 = vand.u32 15, %v733_v12  ;;  %v6366_v60 = vsel %vm1144_vm12, 1.0, %v6202_v7  ;;  %v730_v43 = vadd.s32 224, %v5679_v45  ;;  %v2255_v5 = vmul.f32 %v6114_v1, %v6190_v0 }
 0x17a   : > { %7716 = vst [vmem:[#allocation61_spill] sm:$0xff] %v6328_v4  ;;  %2654 = vmatmul.bf16.vlgmr.msrb.gmra.mxu1 %v2565_v50  ;;  %v6353_v53 = vld [vmem:[#allocation3 + $0x101] sm:$0xff] }
 0x17b   : > { %7719 = vst [vmem:[#allocation62_spill] sm:$0xff] %v6343_v44  ;;  %vm1245_vm13 = vcmp.le.s32.totalorder %v955_v35, 14  ;;  %v6370_v35 = vld [vmem:[#allocation3 + $0xf9] sm:$0xff]  ;;  %v6381_v37 = vmul.f32 %v6179_v27, %v6353_v53 }
 0x17c   : > { %v1719_v48 = vpop.f32.mrf.mxu2  ;;  %v6356_v19 = vsel %vm1245_vm13, 1.0, %v6202_v7  ;;  %7723 = vst [vmem:[#allocation66_spill] sm:$0xff] %v6366_v60 }
 0x17d   : > { %7720 = vst [vmem:[#allocation63_spill] sm:$0xff] %v6356_v19  ;;  %v6374_v50 = vmul.f32 %v6356_v19, %v6353_v53 }
 0x17e   : > { %v1485_v62 = vpop.f32.mrf.mxu1  ;;  %7725 = vst [vmem:[#allocation68_spill] sm:$0xff] %v6381_v37 }
 0x17f   : > { %v6360_v34 = vadd.f32 %v1719_v48, %v1485_v62  ;;  %7724 = vst [vmem:[#allocation67_spill] sm:$0xff] %v6374_v50  ;;  %v1368_v48 = vmul.f32 %v6366_v60, %v6368_v51  ;;  %v6385_v62 = vld [vmem:[#allocation3 + $0xdf] sm:$0xff]  ;;  %v934_v50 = vand.u32 15, %v730_v43  ;;  %v2277_v43 = vpack.c.bf16 %v6230_v13, %v2255_v5 }
 0x180   : > { %v6363_v12 = vpop.f32.mrf.mxu0 }
 0x181   : > { %7721 = vst [vmem:[#allocation64_spill] sm:$0xff] %v6360_v34  ;;  %2989 = vmatmul.bf16.gmra.mxu2 %v2896_v46  ;;  %v2535_v46 = vld [vmem:[#allocation3 + $0x28] sm:$0xff]  ;;  %v1387_v59 = vpack.c.bf16 %v6385_v62, %v1368_v48  ;;  %v2868_v34 = vmul.f32 %v5804_v16, %v5837_v55  ;;  %vm1146_vm14 = vcmp.ge.s32.totalorder %v934_v50, 1 }
 0x182   : > { %7722 = vst [vmem:[#allocation65_spill] sm:$0xff] %v6363_v12  ;;  %v6391_v39 = vpack.c.bf16 %v2536_v49, %v2535_v46  ;;  %v6415_v50 = vld [vmem:[#allocation3 + $0xef] sm:$0xff]  ;;  %v2537_v46 = vld [vmem:[#allocation3 + $0x38] sm:$0xff] }
 0x183   : > { %2401 = vmatmul.bf16.gmra.mxu0 %v2276_v42  ;;  %v2897_v49 = vpack.c.bf16 %v2868_v34, %v5847_v3  ;;  %v732_v34 = vadd.s32 240, %v5679_v45  ;;  %v2870_v45 = vmul.f32 %v5835_v54, %v5869_v24  ;;  %v5225_v24 = vld [vmem:[%s7584_s4 + $0xb0] sm:$0xff] }
 0x184   : > { %v1722_v12 = vpop.f32.mrf.mxu2 }
 0x185   : > { %v948_v5 = vand.u32 15, %v732_v34 }
 0x186   : > { %v1488_v17 = vpop.f32.mrf.mxu1 }
 0x187   : > { %v6393_v44 = vadd.f32 %v1722_v12, %v1488_v17  ;;  %v6410_v17 = vld [vmem:[#allocation3 + $0xe7] sm:$0xff]  ;;  %vm1148_vm15 = vcmp.ge.s32.totalorder %v948_v5, 1 }
 0x188   : > { %v6395_v42 = vpop.f32.mrf.mxu0  ;;  %v6439_v34 = vsel %vm1148_vm15, 1.0, %v6202_v7 }
 0x189   : > { %7726 = vst [vmem:[#allocation69_spill] sm:$0xff] %v6395_v42  ;;  %1527 = vmatmul.bf16.gmra.mxu3 %v1387_v59  ;;  %v6408_v59 = vsel %vm1146_vm14, 1.0, %v6202_v7 }
 0x18a   : > { %2659 = vmatmul.bf16.gmra.mxu1 %v6391_v39  ;;  %7728 = vst [vmem:[#allocation71_spill] sm:$0xff] %v6408_v59  ;;  %v1370_v55 = vmul.f32 %v6408_v59, %v6410_v17 }
 0x18b   : > { %7732 = vst [vmem:[#allocation75_spill] sm:$0xff] %v6439_v34 }
 0x18c   : > { %v1724_v4 = vpop.f32.mrf.mxu2  ;;  %v1388_v1 = vpack.c.bf16 %v6415_v50, %v1370_v55 }
 0x18e   : > { %v1490_v37 = vpop.f32.mrf.mxu1 }
 0x18f   : > { %v6402_v48 = vadd.f32 %v1724_v4, %v1490_v37  ;;  %v2538_v4 = vld [vmem:[#allocation3 + $0x40] sm:$0xff] }
 0x190   : > { %v6405_v12 = vpop.f32.mrf.mxu0 }
 0x191   : > { %7727 = vst [vmem:[#allocation70_spill] sm:$0xff] %v6405_v12  ;;  %2994 = vmatmul.bf16.gmra.mxu2 %v2897_v49  ;;  %v6419_v12 = vpack.c.bf16 %v2538_v4, %v2537_v46  ;;  %v5226_v49 = vld [vmem:[%s7584_s4 + $0xb8] sm:$0xff]  ;;  %v2257_v4 = vmul.f32 %v6188_v18, %v6284_v23 }
 0x192   : > { %2018 = vmatpush.bf16.msrb.mxu3 %v5226_v49  ;;  %v6441_v46 = vld [vmem:[#allocation3 + $0xf7] sm:$0xff]  ;;  %v6449_v49 = vld [vmem:[#allocation3 + $0xff] sm:$0xff] }
 0x193   : > { %2406 = vmatmul.bf16.gmra.mxu0 %v2277_v43  ;;  %v2278_v5 = vpack.c.bf16 %v6319_v38, %v2257_v4  ;;  %v1372_v23 = vmul.f32 %v6439_v34, %v6441_v46  ;;  %v5224_v38 = vld [vmem:[%s7584_s4 + $0xa8] sm:$0xff]  ;;  %v2872_v4 = vmul.f32 %v5867_v20, %v5901_v9  ;;  %v5266_v9 = vld [vmem:[%s7584_s4 + $0x1f8] sm:$0xff] }
 0x194   : > { %v1727_v0 = vpop.f32.mrf.mxu2  ;;  %3604 = vmatpush.bf16.msra.mxu0 %v5266_v9 }
 0x195   : > { %v1389_v18 = vpack.c.bf16 %v6449_v49, %v1372_v23 }
 0x196   : > { %v1493_v37 = vpop.f32.mrf.mxu1  ;;  %2019 = vmatpush.bf16.msrb.mxu3 %v5225_v24  ;;  %v2259_v24 = vmul.f32 %v6282_v6, %v6368_v51  ;;  %v2542_v51 = vld [vmem:[#allocation3 + $0x60] sm:$0xff] }
 0x197   : > { %v6421_v42 = vadd.f32 %v1727_v0, %v1493_v37 }
 0x198   : > { %v6423_v13 = vpop.f32.mrf.mxu0 }
 0x199   : > { %7729 = vst [vmem:[#allocation72_spill] sm:$0xff] %v6423_v13  ;;  %1532 = vmatmul.bf16.gmra.mxu3 %v1388_v1  ;;  %v2898_v1 = vpack.c.bf16 %v2870_v45, %v5879_v40  ;;  %v2540_v45 = vld [vmem:[#allocation3 + $0x50] sm:$0xff] }
 0x19a   : > { %2664 = vmatmul.bf16.gmra.mxu1 %v6419_v12  ;;  %2020 = vmatpush.bf16.msrb.mxu3 %v5224_v38 }
 0x19c   : > { %v1729_v43 = vpop.f32.mrf.mxu2 }
 0x19e   : > { %v1495_v55 = vpop.f32.mrf.mxu1 }
 0x19f   : > { %v6433_v0 = vadd.f32 %v1729_v43, %v1495_v55  ;;  %v2539_v55 = vld [vmem:[#allocation3 + $0x48] sm:$0xff] }
 0x1a0   : > { %v6436_v37 = vpop.f32.mrf.mxu0 }
 0x1a1   : > { %7730 = vst [vmem:[#allocation73_spill] sm:$0xff] %v6433_v0  ;;  %2999 = vmatmul.bf16.gmra.mxu2 %v2898_v1 }
 0x1a2   : > { %7731 = vst [vmem:[#allocation74_spill] sm:$0xff] %v6436_v37  ;;  %v6452_v37 = vpack.c.bf16 %v2540_v45, %v2539_v55  ;;  %v2899_v45 = vpack.c.bf16 %v2872_v4, %v5911_v15  ;;  %v2541_v4 = vld [vmem:[#allocation3 + $0x58] sm:$0xff] }
 0x1a3   : > { %2411 = vmatmul.bf16.gmra.mxu0 %v2278_v5 }
 0x1a4   : > { %v1732_v43 = vpop.f32.mrf.mxu2 }
 0x1a6   : > { %v1498_v7 = vpop.f32.mrf.mxu1 }
 0x1a7   : > { %v6454_v13 = vadd.f32 %v1732_v43, %v1498_v7  ;;  %v2279_v7 = vpack.c.bf16 %v6385_v62, %v2259_v24  ;;  %v5265_v62 = vld [vmem:[%s7584_s4 + $0x1f0] sm:$0xff]  ;;  %v5222_v24 = vld [vmem:[%s7584_s4 + $0x98] sm:$0xff] }
 0x1a8   : > { %v6456_v0 = vpop.f32.mrf.mxu0  ;;  %3605 = vmatpush.bf16.msra.mxu0 %v5265_v62  ;;  %v5221_v62 = vld [vmem:[%s7584_s4 + $0x90] sm:$0xff] }
 0x1a9   : > { %7733 = vst [vmem:[#allocation76_spill] sm:$0xff] %v6456_v0  ;;  %1537 = vmatmul.bf16.gmra.mxu3 %v1389_v18  ;;  %v5223_v18 = vld [vmem:[%s7584_s4 + $0xa0] sm:$0xff] }
 0x1aa   : > { %2669 = vmatmul.bf16.gmra.mxu1 %v6452_v37  ;;  %2021 = vmatpush.bf16.msrb.mxu3 %v5223_v18  ;;  %v7750_v0 = vld [vmem:[#allocation45_spill] sm:$0xff] }
 0x1ac   : > { %v1734_v1 = vpop.f32.mrf.mxu2 }
 0x1ae   : > { %v1500_v5 = vpop.f32.mrf.mxu1  ;;  %2022 = vmatpush.bf16.msrb.mxu3 %v5222_v24  ;;  %v2544_v24 = vld [vmem:[#allocation3 + $0x70] sm:$0xff] }
 0x1af   : > { %v6466_v23 = vadd.f32 %v1734_v1, %v1500_v5  ;;  %v6478_v1 = vpack.c.bf16 %v2542_v51, %v2541_v4  ;;  %v5263_v4 = vld [vmem:[%s7584_s4 + $0x1e0] sm:$0xff] }
 0x1b0   : > { %v6472_v43 = vpop.f32.mrf.mxu0 }
 0x1b1   : > { %7734 = vst [vmem:[#allocation77_spill] sm:$0xff] %v6472_v43  ;;  %3004 = vmatmul.bf16.gmra.mxu2 %v2899_v45  ;;  %v5264_v45 = vld [vmem:[%s7584_s4 + $0x1e8] sm:$0xff]  ;;  %v1874_v43 = vld [vmem:[#allocation3 + $0x11] sm:$0xff] }
 0x1b2   : > { %3606 = vmatpush.bf16.msra.mxu0 %v5264_v45  ;;  %2023 = vmatpush.bf16.msrb.mxu3 %v5221_v62 }
 0x1b3   : > { %2416 = vmatmul.bf16.gmra.mxu0 %v2279_v7  ;;  %v2874_v7 = vmul.f32 %v5899_v8, %v5933_v2 }
 0x1b4   : > { %v1737_v55 = vpop.f32.mrf.mxu2 }
 0x1b6   : > { %v1503_v38 = vpop.f32.mrf.mxu1  ;;  %3607 = vmatpush.bf16.msra.mxu0 %v5263_v4  ;;  %v2876_v4 = vmul.f32 %v5931_v57, %v5970_v28  ;;  %v5219_v28 = vld [vmem:[%s7584_s4 + $0x80] sm:$0xff] }
 0x1b7   : > { %v6480_v5 = vadd.f32 %v1737_v55, %v1503_v38  ;;  %v2900_v38 = vpack.c.bf16 %v2874_v7, %v5945_v30 }
 0x1b8   : > { %v6493_v18 = vpop.f32.mrf.mxu0 }
 0x1b9   : > { %1756 = vmatmul.bf16.vlgmr.msra.gmra.mxu3 %v6276_v56  ;;  %7735 = vst [vmem:[#allocation78_spill] sm:$0xff] %v6493_v18  ;;  %v2261_v56 = vmul.f32 %v6366_v60, %v6410_v17  ;;  %v5262_v17 = vld [vmem:[%s7584_s4 + $0x1d8] sm:$0xff] }
 0x1ba   : > { %2674 = vmatmul.bf16.gmra.mxu1 %v6478_v1  ;;  %3608 = vmatpush.bf16.msra.mxu0 %v5262_v17 }
 0x1bb   : > { %v2280_v2 = vpack.c.bf16 %v6415_v50, %v2261_v56  ;;  %v5261_v50 = vld [vmem:[%s7584_s4 + $0x1d0] sm:$0xff]  ;;  %v5220_v56 = vld [vmem:[%s7584_s4 + $0x88] sm:$0xff] }
 0x1bc   : > { %v1739_v9 = vpop.f32.mrf.mxu2  ;;  %2024 = vmatpush.bf16.msrb.mxu3 %v5220_v56 }
 0x1be   : > { %v1505_v51 = vpop.f32.mrf.mxu1  ;;  %3609 = vmatpush.bf16.msra.mxu0 %v5261_v50 }
 0x1bf   : > { %v6499_v55 = vadd.f32 %v1739_v9, %v1505_v51  ;;  %v2543_v51 = vld [vmem:[#allocation3 + $0x68] sm:$0xff] }
 0x1c0   : > { %v6512_v7 = vpop.f32.mrf.mxu0  ;;  %v6514_v60 = vpack.c.bf16 %v2544_v24, %v2543_v51  ;;  %2025 = vmatpush.bf16.msrb.mxu3 %v5219_v28 }
 0x1c1   : > { %3009 = vmatmul.bf16.gmra.mxu2 %v2900_v38  ;;  %7736 = vst [vmem:[#allocation79_spill] sm:$0xff] %v6512_v7  ;;  %v5260_v38 = vld [vmem:[%s7584_s4 + $0x1c8] sm:$0xff] }
 0x1c2   : > { %3610 = vmatpush.bf16.msra.mxu0 %v5260_v38  ;;  %v2545_v38 = vld [vmem:[#allocation3 + $0x78] sm:$0xff] }
 0x1c3   : > { %2421 = vmatmul.bf16.gmra.mxu0 %v2280_v2  ;;  %v2263_v2 = vmul.f32 %v6408_v59, %v6441_v46  ;;  %v2546_v46 = vld [vmem:[#allocation3 + $0x80] sm:$0xff] }
 0x1c4   : > { %v1742_v45 = vpop.f32.mrf.mxu2 }
 0x1c5   : > { %v2281_v51 = vpack.c.bf16 %v6449_v49, %v2263_v2  ;;  %v5258_v49 = vld [vmem:[%s7584_s4 + $0x1b8] sm:$0xff]  ;;  %v2233_v2 = vld [vmem:[#allocation3 + $0x107] sm:$0xff] }
 0x1c6   : > { %v1508_v9 = vpop.f32.mrf.mxu1  ;;  %3306 = vmatpush.bf16.msra.mxu3 %v5258_v49 }
 0x1c7   : > { %v6516_v18 = vadd.f32 %v1742_v45, %v1508_v9  ;;  %v2901_v45 = vpack.c.bf16 %v2876_v4, %v5983_v63  ;;  %v5259_v9 = vld [vmem:[%s7584_s4 + $0x1c0] sm:$0xff] }
 0x1c8   : > { %v6533_v17 = vpop.f32.mrf.mxu0  ;;  %3611 = vmatpush.bf16.msra.mxu0 %v5259_v9  ;;  %v6558_v9 = vld [vmem:[#allocation3 + $0x111] sm:$0xff] }
 0x1c9   : > { %1761 = vmatmul.bf16.gmra.mxu3 %v6145_v29  ;;  %7737 = vst [vmem:[#allocation80_spill] sm:$0xff] %v6533_v17 }
 0x1ca   : > { %2679 = vmatmul.bf16.gmra.mxu1 %v6514_v60 }
 0x1cc   : > { %v1744_v62 = vpop.f32.mrf.mxu2 }
 0x1ce   : > { %v1510_v29 = vpop.f32.mrf.mxu1 }
 0x1cf   : > { %v6535_v24 = vadd.f32 %v1744_v62, %v1510_v29  ;;  %v6545_v62 = vpack.c.bf16 %v2546_v46, %v2545_v38  ;;  %v6561_v46 = vld [vmem:[#allocation3 + $0x109] sm:$0xff] }
 0x1d0   : > { %v6549_v29 = vpop.f32.mrf.mxu0 }
 0x1d1   : > { %3014 = vmatmul.bf16.gmra.mxu2 %v2901_v45  ;;  %7738 = vst [vmem:[#allocation81_spill] sm:$0xff] %v6549_v29  ;;  %v2878_v45 = vmul.f32 %v5968_v14, %v6021_v10 }
 0x1d3   : > { %2426 = vmatmul.bf16.gmra.mxu0 %v2281_v51  ;;  %v2265_v51 = vmul.f32 %v6439_v34, %v2233_v2  ;;  %v2902_v59 = vpack.c.bf16 %v2878_v45, %v6041_v41  ;;  %v5274_v2 = vld [vmem:[%s7584_s4 + $0x238] sm:$0xff]  ;;  %v2548_v34 = vld [vmem:[#allocation3 + $0x90] sm:$0xff] }
 0x1d4   : > { %v1747_v50 = vpop.f32.mrf.mxu2  ;;  %3934 = vmatpush.bf16.msra.mxu1 %v5274_v2  ;;  %v7744_v2 = vld [vmem:[#allocation35_spill] sm:$0xff] }
 0x1d7   : > { %v1513_v56 = vpop.f32.mrf.mxu1 }
 0x1d8   : > { %v6547_v4 = vadd.f32 %v1747_v50, %v1513_v56  ;;  %v6565_v56 = vmul.f32 %v6272_v33, %v6558_v9  ;;  %v6572_v49 = vpop.f32.mrf.mxu0 }
 0x1d9   : > { %1766 = vmatmul.bf16.gmra.mxu3 %v6245_v26  ;;  %v2234_v26 = vld [vmem:[#allocation3 + $0x10f] sm:$0xff]  ;;  %7740 = vst [vmem:[#allocation83_spill] sm:$0xff] %v6572_v49 }
 0x1da   : > { %2684 = vmatmul.bf16.gmra.mxu1 %v6545_v62  ;;  %7739 = vst [vmem:[#allocation82_spill] sm:$0xff] %v6565_v56  ;;  %v2282_v10 = vpack.c.bf16 %v2234_v26, %v2265_v51  ;;  %v7742_v51 = vld [vmem:[#allocation27_spill] sm:$0xff] }
 0x1dc   : > { %v1749_v28 = vpop.f32.mrf.mxu2 }
 0x1df   : > { %v1515_v50 = vpop.f32.mrf.mxu1 }
 0x1e0   : > { %v6567_v38 = vadd.f32 %v1749_v28, %v1515_v50  ;;  %v2547_v28 = vld [vmem:[#allocation3 + $0x88] sm:$0xff] }
 0x1e1   : > { %3019 = vmatmul.bf16.gmra.mxu2 %v2902_v59  ;;  %v6577_v50 = vpack.c.bf16 %v2548_v34, %v2547_v28  ;;  %v7741_v59 = vld [vmem:[#allocation32_spill] sm:$0xff]  ;;  %v1906_v34 = vmul.f32 %v6250_v47, %v1874_v43 }
 0x1e2   : > { %v2880_v26 = vmul.f32 %v7742_v51, %v7741_v59  ;;  %v2549_v28 = vld [vmem:[#allocation3 + $0x98] sm:$0xff] }
 0x1e3   : > { %2431 = vmatmul.bf16.gmra.mxu0 %v2282_v10  ;;  %v6585_v10 = vpop.f32.mrf.mxu0 }
 0x1e4   : > { %v1752_v29 = vpop.f32.mrf.mxu2  ;;  %7743 = vst [vmem:[#allocation32_spill] sm:$0xff] %v6585_v10  ;;  %v2903_v6 = vpack.c.bf16 %v2880_v26, %v7744_v2 }
 0x1e7   : > { %v1518_v17 = vpop.f32.mrf.mxu1 }
 0x1e8   : > { %v6579_v45 = vadd.f32 %v1752_v29, %v1518_v17  ;;  %v2550_v17 = vld [vmem:[#allocation3 + $0xa0] sm:$0xff] }
 0x1e9   : > { %1771 = vmatmul.bf16.gmra.mxu3 %v6334_v32  ;;  %v1873_v32 = vld [vmem:[#allocation3 + $0x9] sm:$0xff]  ;;  %v6596_v10 = vpack.c.bf16 %v2550_v17, %v2549_v28 }
 0x1ea   : > { %2689 = vmatmul.bf16.gmra.mxu1 %v6577_v50  ;;  %v1937_v51 = vpack.c.bf16 %v1906_v34, %v1873_v32  ;;  %v5273_v32 = vld [vmem:[%s7584_s4 + $0x230] sm:$0xff] }
 0x1eb   : > { %v6594_v59 = vpop.f32.mrf.mxu0  ;;  %v2552_v28 = vld [vmem:[#allocation3 + $0xb0] sm:$0xff]  ;;  %3935 = vmatpush.bf16.msra.mxu1 %v5273_v32 }
 0x1ec   : > { %v1754_v49 = vpop.f32.mrf.mxu2  ;;  %7746 = vst [vmem:[#allocation35_spill] sm:$0xff] %v6594_v59 }
 0x1ef   : > { %v1520_v14 = vpop.f32.mrf.mxu1 }
 0x1f0   : > { %v6587_v7 = vadd.f32 %v1754_v49, %v1520_v14  ;;  %v7748_v14 = vld [vmem:[#allocation31_spill] sm:$0xff] }
 0x1f1   : > { %3024 = vmatmul.bf16.gmra.mxu2 %v2903_v6  ;;  %v5257_v6 = vld [vmem:[%s7584_s4 + $0x1b0] sm:$0xff] }
 0x1f2   : > { %3307 = vmatpush.bf16.msra.mxu3 %v5257_v6  ;;  %v2551_v6 = vld [vmem:[#allocation3 + $0xa8] sm:$0xff] }
 0x1f3   : > { %3612 = vmatmul.bf16.vlgmr.msra.gmra.mxu0 %v6391_v39  ;;  %v7747_v39 = vld [vmem:[#allocation40_spill] sm:$0xff]  ;;  %v6609_v34 = vpop.f32.mrf.mxu0 }
 0x1f4   : > { %v2882_v43 = vmul.f32 %v7748_v14, %v7747_v39  ;;  %7751 = vst [vmem:[#allocation31_spill] sm:$0xff] %v6609_v34  ;;  %v6619_v39 = vpack.c.bf16 %v2552_v28, %v2551_v6  ;;  %v7753_v14 = vld [vmem:[#allocation9_spill] sm:$0xff] }
 0x1f5   : > { %v2554_v6 = vld [vmem:[#allocation3 + $0xc0] sm:$0xff] }
 0x1f6   : > { %v2904_v59 = vpack.c.bf16 %v2882_v43, %v7750_v0  ;;  %v7754_v43 = vld [vmem:[#allocation10_spill] sm:$0xff] }
 0x1f7   : > { %v6592_v29 = vpop.f32.mrf.mxu1 }
 0x1f8   : > { %7745 = vst [vmem:[#allocation27_spill] sm:$0xff] %v6592_v29 }
 0x1f9   : > { %2026 = vmatmul.bf16.vlgmr.msrb.gmra.mxu3 %v1937_v51 }
 0x1fa   : > { %2694 = vmatmul.bf16.gmra.mxu1 %v6596_v10 }
 0x1fc   : > { %v6604_v49 = vpop.f32.mrf.mxu3 }
 0x1ff   : > { %v6606_v26 = vpop.f32.mrf.mxu1 }
 0x200   : > { %7749 = vst [vmem:[#allocation40_spill] sm:$0xff] %v6606_v26  ;;  %v7755_v26 = vpack.c.bf16 %v7753_v14, %v7754_v43  ;;  %v2553_v43 = vld [vmem:[#allocation3 + $0xb8] sm:$0xff] }
 0x201   : > { %3029 = vmatmul.bf16.gmra.mxu2 %v2904_v59  ;;  %v7757_v59 = vld [vmem:[#allocation52_spill] sm:$0xff] }
 0x202   : > { %v2884_v34 = vmul.f32 %v6170_v11, %v7757_v59  ;;  %v7761_v11 = vld [vmem:[#allocation12_spill] sm:$0xff] }
 0x203   : > { %3617 = vmatmul.bf16.gmra.mxu0 %v6419_v12  ;;  %v6625_v12 = vpop.f32.mrf.mxu0  ;;  %v7762_v59 = vpack.c.bf16 %v7761_v11, %v5813_v25  ;;  %v5272_v11 = vld [vmem:[%s7584_s4 + $0x228] sm:$0xff] }
 0x204   : > { %v6615_v17 = vpop.f32.mrf.mxu3  ;;  %7756 = vst [vmem:[#allocation9_spill] sm:$0xff] %v6625_v12  ;;  %v2905_v32 = vpack.c.bf16 %v2884_v34, %v6297_v22  ;;  %v6641_v12 = vpack.c.bf16 %v2554_v6, %v2553_v43  ;;  %v6650_v34 = vpop.f32.mrf.mxu2  ;;  %3936 = vmatpush.bf16.msra.mxu1 %v5272_v11 }
 0x205   : > { %7763 = vst [vmem:[#allocation12_spill] sm:$0xff] %v6650_v34 }
 0x207   : > { %v6617_v51 = vpop.f32.mrf.mxu1 }
 0x208   : > { %7752 = vst [vmem:[#allocation45_spill] sm:$0xff] %v6617_v51 }
 0x209   : > { %2031 = vmatmul.bf16.gmra.mxu3 %v7755_v26 }
 0x20a   : > { %2699 = vmatmul.bf16.gmra.mxu1 %v6619_v39 }
 0x20b   : > { %v6637_v26 = vpop.f32.mrf.mxu0 }
 0x20c   : > { %v6629_v29 = vpop.f32.mrf.mxu3  ;;  %7759 = vst [vmem:[#allocation52_spill] sm:$0xff] %v6637_v26 }
 0x20f   : > { %v6631_v56 = vpop.f32.mrf.mxu1 }
 0x210   : > { %7758 = vst [vmem:[#allocation10_spill] sm:$0xff] %v6631_v56  ;;  %v2556_v56 = vld [vmem:[#allocation3 + $0xd0] sm:$0xff] }
 0x211   : > { %3034 = vmatmul.bf16.gmra.mxu2 %v2905_v32  ;;  %v7764_v32 = vld [vmem:[#allocation46_spill] sm:$0xff] }
 0x212   : > { %v2886_v26 = vmul.f32 %v7764_v32, %v6326_v58  ;;  %v6667_v58 = vpop.f32.mrf.mxu2  ;;  %v2555_v32 = vld [vmem:[#allocation3 + $0xc8] sm:$0xff] }
 0x213   : > { %3622 = vmatmul.bf16.gmra.mxu0 %v6452_v37  ;;  %v5256_v37 = vld [vmem:[%s7584_s4 + $0x1a8] sm:$0xff]  ;;  %v6658_v43 = vpop.f32.mrf.mxu0  ;;  %7767 = vst [vmem:[#allocation86_spill] sm:$0xff] %v6667_v58 }
 0x214   : > { %v6635_v28 = vpop.f32.mrf.mxu3  ;;  %3308 = vmatpush.bf16.msra.mxu3 %v5256_v37  ;;  %7766 = vst [vmem:[#allocation85_spill] sm:$0xff] %v6658_v43  ;;  %v2906_v25 = vpack.c.bf16 %v2886_v26, %v6347_v21  ;;  %v7770_v26 = vld [vmem:[#allocation14_spill] sm:$0xff] }
 0x217   : > { %v6639_v14 = vpop.f32.mrf.mxu1 }
 0x218   : > { %7760 = vst [vmem:[#allocation84_spill] sm:$0xff] %v6639_v14 }
 0x219   : > { %2036 = vmatmul.bf16.gmra.mxu3 %v7762_v59 }
 0x21a   : > { %2704 = vmatmul.bf16.gmra.mxu1 %v6641_v12  ;;  %v6685_v11 = vpop.f32.mrf.mxu2 }
 0x21b   : > { %v6673_v43 = vpop.f32.mrf.mxu0 }
 0x21c   : > { %v6654_v14 = vpop.f32.mrf.mxu3  ;;  %7769 = vst [vmem:[#allocation88_spill] sm:$0xff] %v6673_v43 }
 0x21f   : > { %v6656_v6 = vpop.f32.mrf.mxu1 }
 0x220   : > { %7765 = vst [vmem:[#allocation46_spill] sm:$0xff] %v6656_v6  ;;  %v6671_v6 = vpack.c.bf16 %v2556_v56, %v2555_v32 }
 0x221   : > { %3039 = vmatmul.bf16.gmra.mxu2 %v2906_v25  ;;  %v7772_v25 = vld [vmem:[#allocation41_spill] sm:$0xff] }
 0x222   : > { %v2888_v51 = vmul.f32 %v6300_v36, %v7772_v25  ;;  %7774 = vst [vmem:[#allocation41_spill] sm:$0xff] %v6685_v11  ;;  %v6697_v25 = vpop.f32.mrf.mxu2 }
 0x223   : > { %3627 = vmatmul.bf16.gmra.mxu0 %v6478_v1  ;;  %v7771_v1 = vpack.c.bf16 %v7770_v26, %v5847_v3  ;;  %v6688_v32 = vpop.f32.mrf.mxu0  ;;  %v2557_v26 = vld [vmem:[#allocation3 + $0xd8] sm:$0xff] }
 0x224   : > { %v6665_v59 = vpop.f32.mrf.mxu3 }
 0x227   : > { %v6669_v37 = vpop.f32.mrf.mxu1 }
 0x228   : > { %7768 = vst [vmem:[#allocation87_spill] sm:$0xff] %v6669_v37  ;;  %v7775_v37 = vld [vmem:[#allocation43_spill] sm:$0xff] }
 0x229   : > { %2041 = vmatmul.bf16.gmra.mxu3 %v7771_v1  ;;  %v2907_v56 = vpack.c.bf16 %v2888_v51, %v7775_v37  ;;  %7776 = vst [vmem:[#allocation43_spill] sm:$0xff] %v6688_v32  ;;  %v2558_v1 = vld [vmem:[#allocation3 + $0xe0] sm:$0xff] }
 0x22a   : > { %2709 = vmatmul.bf16.gmra.mxu1 %v6671_v6  ;;  %v6695_v36 = vpack.c.bf16 %v2558_v1, %v2557_v26  ;;  %v7780_v51 = vld [vmem:[#allocation53_spill] sm:$0xff] }
 0x22c   : > { %v6681_v34 = vpop.f32.mrf.mxu3 }
 0x22f   : > { %v6683_v58 = vpop.f32.mrf.mxu1 }
 0x230   : > { %7773 = vst [vmem:[#allocation14_spill] sm:$0xff] %v6683_v58  ;;  %v7778_v58 = vld [vmem:[#allocation16_spill] sm:$0xff] }
 0x231   : > { %3044 = vmatmul.bf16.gmra.mxu2 %v2907_v56  ;;  %v7779_v11 = vpack.c.bf16 %v7778_v58, %v5879_v40  ;;  %v2890_v56 = vmul.f32 %v6179_v27, %v7780_v51  ;;  %v6716_v58 = vpop.f32.mrf.mxu2  ;;  %v5271_v27 = vld [vmem:[%s7584_s4 + $0x220] sm:$0xff]  ;;  %v2560_v51 = vld [vmem:[#allocation3 + $0xf0] sm:$0xff] }
 0x232   : > { %3937 = vmatpush.bf16.msra.mxu1 %v5271_v27 }
 0x233   : > { %3632 = vmatmul.bf16.gmra.mxu0 %v6514_v60  ;;  %v5255_v60 = vld [vmem:[%s7584_s4 + $0x1a0] sm:$0xff]  ;;  %v2908_v1 = vpack.c.bf16 %v2890_v56, %v6279_v31  ;;  %v7784_v56 = vld [vmem:[#allocation18_spill] sm:$0xff] }
 0x234   : > { %v6691_v3 = vpop.f32.mrf.mxu3  ;;  %3309 = vmatpush.bf16.msra.mxu3 %v5255_v60  ;;  %v2559_v60 = vld [vmem:[#allocation3 + $0xe8] sm:$0xff] }
 0x237   : > { %v6693_v43 = vpop.f32.mrf.mxu1 }
 0x238   : > { %7777 = vst [vmem:[#allocation89_spill] sm:$0xff] %v6693_v43  ;;  %v6708_v43 = vpop.f32.mrf.mxu0 }
 0x239   : > { %2046 = vmatmul.bf16.gmra.mxu3 %v7779_v11  ;;  %7781 = vst [vmem:[#allocation16_spill] sm:$0xff] %v6708_v43 }
 0x23a   : > { %2714 = vmatmul.bf16.gmra.mxu1 %v6695_v36 }
 0x23c   : > { %v1757_v32 = vpop.f32.mrf.mxu3 }
 0x23d   : > { %v6711_v26 = vadd.f32 %v1757_v32, %v6604_v49  ;;  %v6727_v32 = vpack.c.bf16 %v2560_v51, %v2559_v60 }
 0x23f   : > { %v6714_v40 = vpop.f32.mrf.mxu1 }
 0x240   : > { %7782 = vst [vmem:[#allocation53_spill] sm:$0xff] %v6714_v40  ;;  %v6725_v49 = vpop.f32.mrf.mxu0 }
 0x241   : > { %3049 = vmatmul.bf16.gmra.mxu2 %v2908_v1  ;;  %7783 = vst [vmem:[#allocation90_spill] sm:$0xff] %v6725_v49  ;;  %v7785_v1 = vpack.c.bf16 %v7784_v56, %v5911_v15  ;;  %v5269_v15 = vld [vmem:[%s7584_s4 + $0x210] sm:$0xff]  ;;  %v5268_v56 = vld [vmem:[%s7584_s4 + $0x208] sm:$0xff] }
 0x243   : > { %3637 = vmatmul.bf16.gmra.mxu0 %v6545_v62  ;;  %v5270_v62 = vld [vmem:[%s7584_s4 + $0x218] sm:$0xff] }
 0x244   : > { %v1759_v11 = vpop.f32.mrf.mxu3  ;;  %3938 = vmatpush.bf16.msra.mxu1 %v5270_v62 }
 0x245   : > { %v6723_v43 = vadd.f32 %v1759_v11, %v6615_v17  ;;  %v2892_v17 = vmul.f32 %v6272_v33, %v6353_v53  ;;  %v6740_v11 = vpop.f32.mrf.mxu2  ;;  %v2561_v53 = vld [vmem:[#allocation3 + $0xf8] sm:$0xff] }
 0x247   : > { %v6736_v40 = vpop.f32.mrf.mxu1  ;;  %v2909_v51 = vpack.c.bf16 %v2892_v17, %v6370_v35  ;;  %v5267_v17 = vld [vmem:[%s7584_s4 + $0x200] sm:$0xff] }
 0x248   : > { %7786 = vst [vmem:[#allocation18_spill] sm:$0xff] %v6736_v40  ;;  %3939 = vmatpush.bf16.msra.mxu1 %v5269_v15 }
 0x249   : > { %2051 = vmatmul.bf16.gmra.mxu3 %v7785_v1  ;;  %v6752_v1 = vpop.f32.mrf.mxu0 }
 0x24a   : > { %2719 = vmatmul.bf16.gmra.mxu1 %v6727_v32  ;;  %7787 = vst [vmem:[#allocation91_spill] sm:$0xff] %v6752_v1 }
 0x24c   : > { %v1762_v27 = vpop.f32.mrf.mxu3  ;;  %3940 = vmatpush.bf16.msra.mxu1 %v5268_v56 }
 0x24d   : > { %v6743_v60 = vadd.f32 %v1762_v27, %v6629_v29  ;;  %v2562_v29 = vld [vmem:[#allocation3 + $0x100] sm:$0xff]  ;;  %v6763_v15 = vpop.f32.mrf.mxu2 }
 0x24e   : > { %v6765_v49 = vpack.c.bf16 %v2562_v29, %v2561_v53 }
 0x24f   : > { %v6755_v62 = vpop.f32.mrf.mxu1 }
 0x250   : > { %7788 = vst [vmem:[#allocation92_spill] sm:$0xff] %v6755_v62  ;;  %3941 = vmatpush.bf16.msra.mxu1 %v5267_v17 }
 0x251   : > { %3054 = vmatmul.bf16.gmra.mxu2 %v2909_v51  ;;  %v7789_v51 = vld [vmem:[#allocation21_spill] sm:$0xff]  ;;  %v6774_v56 = vpop.f32.mrf.mxu0 }
 0x252   : > { %7791 = vst [vmem:[#allocation21_spill] sm:$0xff] %v6774_v56  ;;  %v2564_v56 = vld [vmem:[#allocation3 + $0x110] sm:$0xff] }
 0x253   : > { %3642 = vmatmul.bf16.gmra.mxu0 %v6577_v50  ;;  %v7790_v50 = vpack.c.bf16 %v7789_v51, %v5945_v30 }
 0x254   : > { %v1764_v33 = vpop.f32.mrf.mxu3 }
 0x255   : > { %v6758_v27 = vadd.f32 %v1764_v33, %v6635_v28  ;;  %v5254_v28 = vld [vmem:[%s7584_s4 + $0x198] sm:$0xff]  ;;  %v2894_v33 = vmul.f32 %v6356_v19, %v6558_v9  ;;  %v6784_v17 = vpop.f32.mrf.mxu2 }
 0x256   : > { %3310 = vmatpush.bf16.msra.mxu3 %v5254_v28 }
 0x257   : > { %v6781_v29 = vpop.f32.mrf.mxu1  ;;  %v2910_v30 = vpack.c.bf16 %v2894_v33, %v6561_v46 }
 0x258   : > { %7792 = vst [vmem:[#allocation93_spill] sm:$0xff] %v6781_v29 }
 0x259   : > { %2056 = vmatmul.bf16.gmra.mxu3 %v7790_v50  ;;  %v2563_v50 = vld [vmem:[#allocation3 + $0x108] sm:$0xff]  ;;  %v6787_v62 = vpop.f32.mrf.mxu0 }
 0x25a   : > { %2724 = vmatmul.bf16.gmra.mxu1 %v6765_v49  ;;  %7793 = vst [vmem:[#allocation94_spill] sm:$0xff] %v6787_v62  ;;  %v6792_v28 = vpack.c.bf16 %v2564_v56, %v2563_v50  ;;  %v3790_v62 = vld [vmem:[#allocation3 + $0x31] sm:$0xff] }
 0x25c   : > { %v1767_v1 = vpop.f32.mrf.mxu3 }
 0x25d   : > { %v6779_v53 = vadd.f32 %v1767_v1, %v6654_v14  ;;  %v7795_v1 = vld [vmem:[#allocation23_spill] sm:$0xff] }
 0x25e   : > { %v7796_v33 = vpack.c.bf16 %v7795_v1, %v5983_v63  ;;  %v5282_v63 = vld [vmem:[%s7587_s7 + $0x38] sm:$0xff] }
 0x25f   : > { %v6794_v14 = vpop.f32.mrf.mxu1  ;;  %4335 = vmatpush.bf16.msra.mxu2 %v5282_v63  ;;  %v3792_v63 = vld [vmem:[#allocation3 + $0x41] sm:$0xff] }
 0x260   : > { %7794 = vst [vmem:[#allocation95_spill] sm:$0xff] %v6794_v14  ;;  %v7829_v14 = vld [vmem:[#allocation47_spill] sm:$0xff] }
 0x261   : > { %3059 = vmatmul.bf16.gmra.mxu2 %v2910_v30  ;;  %v6803_v29 = vpop.f32.mrf.mxu0 }
 0x262   : > { %7797 = vst [vmem:[#allocation23_spill] sm:$0xff] %v6803_v29  ;;  %v7809_v29 = vld [vmem:[#allocation30_spill] sm:$0xff] }
 0x263   : > { %3647 = vmatmul.bf16.gmra.mxu0 %v6596_v10 }
 0x264   : > { %v1769_v51 = vpop.f32.mrf.mxu3 }
 0x265   : > { %v6790_v9 = vadd.f32 %v1769_v51, %v6665_v59  ;;  %v3822_v59 = vmul.f32 %v6250_v47, %v3790_v62  ;;  %v5253_v47 = vld [vmem:[%s7584_s4 + $0x190] sm:$0xff] }
 0x266   : > { %3311 = vmatpush.bf16.msra.mxu3 %v5253_v47  ;;  %v7806_v47 = vld [vmem:[#allocation34_spill] sm:$0xff] }
 0x267   : > { %v6805_v19 = vpop.f32.mrf.mxu1 }
 0x268   : > { %7798 = vst [vmem:[#allocation96_spill] sm:$0xff] %v6805_v19  ;;  %v7821_v19 = vld [vmem:[#allocation50_spill] sm:$0xff] }
 0x269   : > { %2061 = vmatmul.bf16.gmra.mxu3 %v7796_v33  ;;  %v6815_v1 = vpop.f32.mrf.mxu0  ;;  %v7800_v33 = vld [vmem:[#allocation28_spill] sm:$0xff] }
 0x26a   : > { %2729 = vmatmul.bf16.gmra.mxu1 %v6792_v28  ;;  %7799 = vst [vmem:[#allocation97_spill] sm:$0xff] %v6815_v1  ;;  %v7807_v1 = vpack.c.bf16 %v7806_v47, %v7744_v2 }
 0x26c   : > { %v1772_v30 = vpop.f32.mrf.mxu3 }
 0x26d   : > { %v6801_v10 = vadd.f32 %v1772_v30, %v6681_v34  ;;  %v3789_v34 = vld [vmem:[#allocation3 + $0x29] sm:$0xff]  ;;  %v7801_v30 = vpack.c.bf16 %v7800_v33, %v6041_v41  ;;  %v3824_v41 = vmul.f32 %v5766_v52, %v3792_v63 }
 0x26e   : > { %v3853_v50 = vpack.c.bf16 %v3822_v59, %v3789_v34  ;;  %v5281_v63 = vld [vmem:[%s7587_s7 + $0x30] sm:$0xff] }
 0x26f   : > { %v6823_v62 = vpop.f32.mrf.mxu1  ;;  %4336 = vmatpush.bf16.msra.mxu2 %v5281_v63  ;;  %v3796_v63 = vld [vmem:[#allocation3 + $0x61] sm:$0xff] }
 0x270   : > { %7802 = vst [vmem:[#allocation28_spill] sm:$0xff] %v6823_v62 }
 0x271   : > { %v6828_v59 = vpop.f32.mrf.mxu0 }
 0x273   : > { %3652 = vmatmul.bf16.gmra.mxu0 %v6619_v39 }
 0x274   : > { %v1774_v56 = vpop.f32.mrf.mxu3 }
 0x275   : > { %v6813_v51 = vadd.f32 %v1774_v56, %v6691_v3  ;;  %v7803_v3 = vld [vmem:[#allocation20_spill] sm:$0xff] }
 0x276   : > { %7804 = vst [vmem:[#allocation20_spill] sm:$0xff] %v6828_v59 }
 0x277   : > { %v6834_v33 = vpop.f32.mrf.mxu1 }
 0x278   : > { %7805 = vst [vmem:[#allocation98_spill] sm:$0xff] %v6834_v33 }
 0x279   : > { %2066 = vmatmul.bf16.gmra.mxu3 %v7801_v30 }
 0x27a   : > { %3942 = vmatmul.bf16.vlgmr.msra.gmra.mxu1 %v3853_v50  ;;  %v3791_v50 = vld [vmem:[#allocation3 + $0x39] sm:$0xff] }
 0x27b   : > { %v3854_v30 = vpack.c.bf16 %v3824_v41, %v3791_v50 }
 0x27c   : > { %v2027_v39 = vpop.f32.mrf.mxu3 }
 0x27d   : > { %v6826_v56 = vadd.f32 %v2027_v39, %v7803_v3  ;;  %v6839_v3 = vpop.f32.mrf.mxu0 }
 0x27e   : > { %7808 = vst [vmem:[#allocation34_spill] sm:$0xff] %v6839_v3 }
 0x27f   : > { %v6844_v62 = vpop.f32.mrf.mxu1 }
 0x280   : > { %7810 = vst [vmem:[#allocation30_spill] sm:$0xff] %v6844_v62 }
 0x283   : > { %3657 = vmatmul.bf16.gmra.mxu0 %v6641_v12  ;;  %v3794_v12 = vld [vmem:[#allocation3 + $0x51] sm:$0xff] }
 0x284   : > { %v6832_v34 = vpop.f32.mrf.mxu3  ;;  %v3826_v52 = vmul.f32 %v5804_v16, %v3794_v12  ;;  %v5252_v16 = vld [vmem:[%s7584_s4 + $0x188] sm:$0xff] }
 0x285   : > { %v6854_v47 = vpop.f32.mrf.mxu0  ;;  %3312 = vmatpush.bf16.msra.mxu3 %v5252_v16  ;;  %v7819_v16 = vld [vmem:[#allocation56_spill] sm:$0xff] }
 0x286   : > { %v7820_v33 = vpack.c.bf16 %v7819_v16, %v6297_v22 }
 0x289   : > { %2071 = vmatmul.bf16.gmra.mxu3 %v7807_v1  ;;  %v7811_v1 = vld [vmem:[#allocation33_spill] sm:$0xff] }
 0x28a   : > { %3947 = vmatmul.bf16.gmra.mxu1 %v3854_v30  ;;  %v3793_v30 = vld [vmem:[#allocation3 + $0x49] sm:$0xff]  ;;  %7812 = vst [vmem:[#allocation33_spill] sm:$0xff] %v6854_v47  ;;  %v3795_v47 = vld [vmem:[#allocation3 + $0x59] sm:$0xff] }
 0x28c   : > { %v2032_v39 = vpop.f32.mrf.mxu3 }
 0x28d   : > { %v6842_v59 = vadd.f32 %v2032_v39, %v7809_v29  ;;  %v3855_v29 = vpack.c.bf16 %v3826_v52, %v3793_v30  ;;  %v7813_v39 = vld [vmem:[#allocation44_spill] sm:$0xff]  ;;  %v6867_v62 = vpop.f32.mrf.mxu0  ;;  %v3828_v52 = vmul.f32 %v5835_v54, %v3796_v63 }
 0x28e   : > { %v7814_v3 = vpack.c.bf16 %v7813_v39, %v7750_v0  ;;  %v3798_v63 = vld [vmem:[#allocation3 + $0x71] sm:$0xff] }
 0x293   : > { %3662 = vmatmul.bf16.gmra.mxu0 %v6671_v6  ;;  %v6862_v6 = vpop.f32.mrf.mxu1 }
 0x294   : > { %v2034_v41 = vpop.f32.mrf.mxu3  ;;  %7815 = vst [vmem:[#allocation44_spill] sm:$0xff] %v6862_v6  ;;  %v3856_v6 = vpack.c.bf16 %v3828_v52, %v3795_v47  ;;  %v5280_v47 = vld [vmem:[%s7587_s7 + $0x28] sm:$0xff] }
 0x295   : > { %v6852_v50 = vadd.f32 %v2034_v41, %v7811_v1  ;;  %v7816_v41 = vld [vmem:[#allocation38_spill] sm:$0xff]  ;;  %4337 = vmatpush.bf16.msra.mxu2 %v5280_v47 }
 0x296   : > { %v3800_v47 = vld [vmem:[#allocation3 + $0x81] sm:$0xff] }
 0x299   : > { %2076 = vmatmul.bf16.gmra.mxu3 %v7814_v3 }
 0x29a   : > { %3952 = vmatmul.bf16.gmra.mxu1 %v3855_v29  ;;  %v7818_v29 = vld [vmem:[#allocation39_spill] sm:$0xff] }
 0x29b   : > { %v6871_v30 = vpop.f32.mrf.mxu1 }
 0x29c   : > { %v2037_v12 = vpop.f32.mrf.mxu3  ;;  %7817 = vst [vmem:[#allocation38_spill] sm:$0xff] %v6871_v30 }
 0x29d   : > { %v6865_v1 = vadd.f32 %v2037_v12, %v7816_v41  ;;  %v6879_v12 = vpop.f32.mrf.mxu0 }
 0x2a3   : > { %3667 = vmatmul.bf16.gmra.mxu0 %v6695_v36  ;;  %v6884_v54 = vpop.f32.mrf.mxu1 }
 0x2a4   : > { %v2039_v3 = vpop.f32.mrf.mxu3  ;;  %7822 = vst [vmem:[#allocation39_spill] sm:$0xff] %v6884_v54  ;;  %v7826_v54 = vld [vmem:[#allocation60_spill] sm:$0xff] }
 0x2a5   : > { %v6874_v39 = vadd.f32 %v2039_v3, %v7818_v29  ;;  %v3830_v3 = vmul.f32 %v5867_v20, %v3798_v63  ;;  %v5251_v20 = vld [vmem:[%s7584_s4 + $0x180] sm:$0xff] }
 0x2a6   : > { %3313 = vmatpush.bf16.msra.mxu3 %v5251_v20 }
 0x2a9   : > { %2081 = vmatmul.bf16.gmra.mxu3 %v7820_v33  ;;  %v6891_v33 = vpop.f32.mrf.mxu0 }
 0x2aa   : > { %3957 = vmatmul.bf16.gmra.mxu1 %v3856_v6  ;;  %v7823_v6 = vld [vmem:[#allocation51_spill] sm:$0xff] }
 0x2ac   : > { %v2042_v41 = vpop.f32.mrf.mxu3 }
 0x2ad   : > { %v6882_v36 = vadd.f32 %v2042_v41, %v7821_v19  ;;  %v3797_v19 = vld [vmem:[#allocation3 + $0x69] sm:$0xff]  ;;  %v6896_v41 = vpop.f32.mrf.mxu1 }
 0x2ae   : > { %v3857_v16 = vpack.c.bf16 %v3830_v3, %v3797_v19  ;;  %7824 = vst [vmem:[#allocation56_spill] sm:$0xff] %v6896_v41  ;;  %v7828_v19 = vld [vmem:[#allocation64_spill] sm:$0xff] }
 0x2b3   : > { %3672 = vmatmul.bf16.gmra.mxu0 %v6727_v32  ;;  %v7825_v32 = vpack.c.bf16 %v6339_v61, %v6347_v21  ;;  %v3832_v61 = vmul.f32 %v5899_v8, %v3800_v47  ;;  %v3802_v8 = vld [vmem:[#allocation3 + $0x91] sm:$0xff]  ;;  %v5279_v47 = vld [vmem:[%s7587_s7 + $0x20] sm:$0xff] }
 0x2b4   : > { %v2044_v52 = vpop.f32.mrf.mxu3  ;;  %4338 = vmatpush.bf16.msra.mxu2 %v5279_v47 }
 0x2b5   : > { %v6894_v29 = vadd.f32 %v2044_v52, %v7823_v6  ;;  %v6907_v52 = vpop.f32.mrf.mxu0  ;;  %v6909_v3 = vpop.f32.mrf.mxu1 }
 0x2b6   : > { %7827 = vst [vmem:[#allocation50_spill] sm:$0xff] %v6909_v3 }
 0x2b9   : > { %2086 = vmatmul.bf16.gmra.mxu3 %v7825_v32  ;;  %v3799_v32 = vld [vmem:[#allocation3 + $0x79] sm:$0xff] }
 0x2ba   : > { %3962 = vmatmul.bf16.gmra.mxu1 %v3857_v16  ;;  %v3858_v41 = vpack.c.bf16 %v3832_v61, %v3799_v32 }
 0x2bc   : > { %v2047_v63 = vpop.f32.mrf.mxu3 }
 0x2bd   : > { %v6905_v30 = vadd.f32 %v2047_v63, %v7826_v54  ;;  %v6916_v20 = vpop.f32.mrf.mxu0  ;;  %v7830_v54 = vpack.c.bf16 %v7829_v14, %v7775_v37  ;;  %v6921_v40 = vpop.f32.mrf.mxu1  ;;  %v3834_v14 = vmul.f32 %v5931_v57, %v3802_v8  ;;  %v7836_v8 = vld [vmem:[#allocation73_spill] sm:$0xff] }
 0x2be   : > { %7831 = vst [vmem:[#allocation51_spill] sm:$0xff] %v6921_v40 }
 0x2c3   : > { %3677 = vmatmul.bf16.gmra.mxu0 %v6765_v49 }
 0x2c4   : > { %v2049_v6 = vpop.f32.mrf.mxu3 }
 0x2c5   : > { %v6914_v16 = vadd.f32 %v2049_v6, %v7828_v19  ;;  %v6929_v61 = vpop.f32.mrf.mxu0  ;;  %v3801_v19 = vld [vmem:[#allocation3 + $0x89] sm:$0xff]  ;;  %v6936_v32 = vpop.f32.mrf.mxu1 }
 0x2c6   : > { %7832 = vst [vmem:[#allocation60_spill] sm:$0xff] %v6936_v32  ;;  %v3163_v32 = vld [vmem:[#allocation3 + $0x37] sm:$0xff] }
 0x2c9   : > { %2091 = vmatmul.bf16.gmra.mxu3 %v7830_v54  ;;  %v7833_v54 = vld [vmem:[#allocation57_spill] sm:$0xff] }
 0x2ca   : > { %3967 = vmatmul.bf16.gmra.mxu1 %v3858_v41 }
 0x2cc   : > { %v2052_v63 = vpop.f32.mrf.mxu3 }
 0x2cd   : > { %v6924_v49 = vadd.f32 %v2052_v63, %v6393_v44  ;;  %v3859_v44 = vpack.c.bf16 %v3834_v14, %v3801_v19  ;;  %v7834_v63 = vpack.c.bf16 %v7833_v54, %v6279_v31  ;;  %v7839_v14 = vld [vmem:[#allocation36_spill] sm:$0xff] }
 0x2ce   : > { %v7840_v19 = vpack.c.bf16 %v7839_v14, %v7744_v2  ;;  %v7844_v2 = vld [vmem:[#allocation7_spill] sm:$0xff] }
 0x2d3   : > { %3682 = vmatmul.bf16.gmra.mxu0 %v6792_v28  ;;  %v6944_v28 = vpop.f32.mrf.mxu1 }
 0x2d4   : > { %v2054_v6 = vpop.f32.mrf.mxu3  ;;  %7835 = vst [vmem:[#allocation64_spill] sm:$0xff] %v6944_v28 }
 0x2d5   : > { %v6934_v41 = vadd.f32 %v2054_v6, %v6402_v48  ;;  %v7837_v48 = vld [vmem:[#allocation67_spill] sm:$0xff] }
 0x2d6   : > { %v7838_v6 = vpack.c.bf16 %v7837_v48, %v6370_v35 }
 0x2d9   : > { %2096 = vmatmul.bf16.gmra.mxu3 %v7834_v63  ;;  %v5278_v63 = vld [vmem:[%s7587_s7 + $0x18] sm:$0xff] }
 0x2da   : > { %3972 = vmatmul.bf16.gmra.mxu1 %v3859_v44  ;;  %4339 = vmatpush.bf16.msra.mxu2 %v5278_v63 }
 0x2db   : > { %v6955_v54 = vpop.f32.mrf.mxu1 }
 0x2dc   : > { %v2057_v47 = vpop.f32.mrf.mxu3  ;;  %7841 = vst [vmem:[#allocation47_spill] sm:$0xff] %v6955_v54  ;;  %v7845_v54 = vld [vmem:[#allocation48_spill] sm:$0xff] }
 0x2dd   : > { %v6942_v40 = vadd.f32 %v2057_v47, %v6421_v42  ;;  %v3161_v47 = vld [vmem:[#allocation3 + $0x27] sm:$0xff] }
 0x2de   : > { %v3193_v14 = vmul.f32 %v7844_v2, %v3161_v47 }
 0x2e3   : > { %v6963_v48 = vpop.f32.mrf.mxu1 }
 0x2e4   : > { %v2059_v57 = vpop.f32.mrf.mxu3  ;;  %7843 = vst [vmem:[#allocation73_spill] sm:$0xff] %v6963_v48  ;;  %v3164_v48 = vld [vmem:[#allocation3 + $0x3f] sm:$0xff] }
 0x2e5   : > { %v6947_v3 = vadd.f32 %v2059_v57, %v7836_v8  ;;  %v3162_v8 = vld [vmem:[#allocation3 + $0x2f] sm:$0xff] }
 0x2e9   : > { %2101 = vmatmul.bf16.gmra.mxu3 %v7838_v6 }
 0x2ea   : > { %3977 = vmatmul.bf16.gmra.mxu1 %v7840_v19  ;;  %v3225_v19 = vpack.c.bf16 %v3162_v8, %v3193_v14 }
 0x2eb   : > { %v6975_v63 = vpop.f32.mrf.mxu1 }
 0x2ec   : > { %v2062_v44 = vpop.f32.mrf.mxu3  ;;  %7847 = vst [vmem:[#allocation67_spill] sm:$0xff] %v6975_v63 }
 0x2ed   : > { %v6958_v42 = vadd.f32 %v2062_v44, %v6454_v13  ;;  %v7846_v13 = vpack.c.bf16 %v7845_v54, %v7750_v0  ;;  %v7850_v0 = vld [vmem:[#allocation58_spill] sm:$0xff] }
 0x2ee   : > { %v7851_v54 = vpack.c.bf16 %v7850_v0, %v6297_v22 }
 0x2ef   : > { %7842 = vst [vmem:[#allocation57_spill] sm:$0xff] %v6958_v42 }
 0x2f3   : > { %v6981_v2 = vpop.f32.mrf.mxu1 }
 0x2f4   : > { %v2064_v57 = vpop.f32.mrf.mxu3  ;;  %7849 = vst [vmem:[#allocation36_spill] sm:$0xff] %v6981_v2  ;;  %v3171_v2 = vld [vmem:[#allocation3 + $0x77] sm:$0xff] }
 0x2f5   : > { %v6966_v6 = vadd.f32 %v2064_v57, %v6466_v23  ;;  %v7848_v57 = vld [vmem:[#allocation8_spill] sm:$0xff] }
 0x2f6   : > { %v3195_v47 = vmul.f32 %v7848_v57, %v3163_v32 }
 0x2f8   : > { %v3226_v8 = vpack.c.bf16 %v3164_v48, %v3195_v47  ;;  %v3166_v48 = vld [vmem:[#allocation3 + $0x4f] sm:$0xff] }
 0x2f9   : > { %3314 = vmatmul.bf16.vlgmr.msra.gmra.mxu3 %v3225_v19  ;;  %v5277_v19 = vld [vmem:[%s7587_s7 + $0x10] sm:$0xff]  ;;  %v7855_v47 = vld [vmem:[#allocation62_spill] sm:$0xff] }
 0x2fa   : > { %3982 = vmatmul.bf16.gmra.mxu1 %v7846_v13  ;;  %4340 = vmatpush.bf16.msra.mxu2 %v5277_v19 }
 0x2fc   : > { %v2067_v44 = vpop.f32.mrf.mxu3 }
 0x2fd   : > { %v6973_v28 = vadd.f32 %v2067_v44, %v6480_v5  ;;  %v7854_v44 = vld [vmem:[#allocation11_spill] sm:$0xff] }
 0x304   : > { %v2069_v42 = vpop.f32.mrf.mxu3 }
 0x305   : > { %v6978_v23 = vadd.f32 %v2069_v42, %v6499_v55  ;;  %v3165_v55 = vld [vmem:[#allocation3 + $0x47] sm:$0xff]  ;;  %v6992_v42 = vpop.f32.mrf.mxu1 }
 0x306   : > { %7852 = vst [vmem:[#allocation7_spill] sm:$0xff] %v6992_v42  ;;  %v3197_v22 = vmul.f32 %v7854_v44, %v3165_v55  ;;  %v3168_v42 = vld [vmem:[#allocation3 + $0x5f] sm:$0xff] }
 0x308   : > { %v3227_v57 = vpack.c.bf16 %v3166_v48, %v3197_v22  ;;  %v7012_v22 = vpop.f32.mrf.mxu2 }
 0x309   : > { %3319 = vmatmul.bf16.gmra.mxu3 %v3226_v8 }
 0x30a   : > { %3987 = vmatmul.bf16.gmra.mxu1 %v7851_v54 }
 0x30c   : > { %v2072_v5 = vpop.f32.mrf.mxu3 }
 0x30d   : > { %v6987_v14 = vadd.f32 %v2072_v5, %v6516_v18  ;;  %v7856_v18 = vpack.c.bf16 %v7855_v47, %v6347_v21  ;;  %v7001_v0 = vpop.f32.mrf.mxu1  ;;  %v3167_v5 = vld [vmem:[#allocation3 + $0x57] sm:$0xff]  ;;  %v7861_v21 = vld [vmem:[#allocation49_spill] sm:$0xff] }
 0x30e   : > { %7857 = vst [vmem:[#allocation8_spill] sm:$0xff] %v7001_v0 }
 0x314   : > { %v2074_v32 = vpop.f32.mrf.mxu3 }
 0x315   : > { %v6995_v13 = vadd.f32 %v2074_v32, %v6535_v24  ;;  %v7860_v32 = vld [vmem:[#allocation13_spill] sm:$0xff]  ;;  %v7010_v48 = vpop.f32.mrf.mxu1 }
 0x316   : > { %v3199_v55 = vmul.f32 %v7860_v32, %v3167_v5 }
 0x317   : > { %7853 = vst [vmem:[#allocation48_spill] sm:$0xff] %v6995_v13 }
 0x318   : > { %v3228_v44 = vpack.c.bf16 %v3168_v42, %v3199_v55  ;;  %v3169_v42 = vld [vmem:[#allocation3 + $0x67] sm:$0xff] }
 0x319   : > { %3324 = vmatmul.bf16.gmra.mxu3 %v3227_v57  ;;  %v7862_v57 = vpack.c.bf16 %v7861_v21, %v7775_v37  ;;  %v7865_v37 = vld [vmem:[#allocation15_spill] sm:$0xff] }
 0x31a   : > { %3992 = vmatmul.bf16.gmra.mxu1 %v7856_v18  ;;  %v3201_v55 = vmul.f32 %v7865_v37, %v3169_v42 }
 0x31c   : > { %v2077_v8 = vpop.f32.mrf.mxu3 }
 0x31d   : > { %v7004_v54 = vadd.f32 %v2077_v8, %v6547_v4  ;;  %v7023_v18 = vpop.f32.mrf.mxu1  ;;  %v7025_v8 = vpop.f32.mrf.mxu2 }
 0x31f   : > { %7858 = vst [vmem:[#allocation58_spill] sm:$0xff] %v7004_v54 }
 0x324   : > { %v2079_v19 = vpop.f32.mrf.mxu3 }
 0x325   : > { %v7007_v24 = vadd.f32 %v2079_v19, %v6567_v38  ;;  %v5276_v38 = vld [vmem:[%s7587_s7 + $0x8] sm:$0xff] }
 0x326   : > { %4341 = vmatpush.bf16.msra.mxu2 %v5276_v38  ;;  %v3170_v19 = vld [vmem:[#allocation3 + $0x6f] sm:$0xff] }
 0x327   : > { %7859 = vst [vmem:[#allocation11_spill] sm:$0xff] %v7007_v24  ;;  %v7884_v24 = vld [vmem:[#allocation25_spill] sm:$0xff] }
 0x329   : > { %3329 = vmatmul.bf16.gmra.mxu3 %v3228_v44  ;;  %v3229_v44 = vpack.c.bf16 %v3170_v19, %v3201_v55  ;;  %v7870_v19 = vld [vmem:[#allocation17_spill] sm:$0xff] }
 0x32a   : > { %3997 = vmatmul.bf16.gmra.mxu1 %v7862_v57  ;;  %v7034_v57 = vpop.f32.mrf.mxu1  ;;  %v3203_v37 = vmul.f32 %v7870_v19, %v3171_v2  ;;  %v3173_v2 = vld [vmem:[#allocation3 + $0x87] sm:$0xff]  ;;  %v3174_v19 = vld [vmem:[#allocation3 + $0x8f] sm:$0xff] }
 0x32c   : > { %v2082_v4 = vpop.f32.mrf.mxu3 }
 0x32d   : > { %v7018_v47 = vadd.f32 %v2082_v4, %v6579_v45  ;;  %v7866_v45 = vld [vmem:[#allocation59_spill] sm:$0xff]  ;;  %v7036_v4 = vpop.f32.mrf.mxu2 }
 0x32e   : > { %v7867_v21 = vpack.c.bf16 %v7866_v45, %v6279_v31 }
 0x32f   : > { %7863 = vst [vmem:[#allocation62_spill] sm:$0xff] %v7018_v47  ;;  %v7883_v47 = vld [vmem:[#allocation26_spill] sm:$0xff] }
 0x334   : > { %v2084_v5 = vpop.f32.mrf.mxu3 }
 0x335   : > { %v7028_v32 = vadd.f32 %v2084_v5, %v6587_v7  ;;  %v3172_v7 = vld [vmem:[#allocation3 + $0x7f] sm:$0xff]  ;;  %v7041_v5 = vpop.f32.mrf.mxu1  ;;  %v7047_v31 = vpop.f32.mrf.mxu2 }
 0x336   : > { %v3230_v55 = vpack.c.bf16 %v3172_v7, %v3203_v37 }
 0x337   : > { %7864 = vst [vmem:[#allocation13_spill] sm:$0xff] %v7028_v32 }
 0x339   : > { %3334 = vmatmul.bf16.gmra.mxu3 %v3229_v44  ;;  %v7871_v44 = vld [vmem:[#allocation68_spill] sm:$0xff] }
 0x33a   : > { %4002 = vmatmul.bf16.gmra.mxu1 %v7867_v21  ;;  %v7872_v45 = vpack.c.bf16 %v7871_v44, %v6370_v35  ;;  %v7875_v35 = vld [vmem:[#allocation19_spill] sm:$0xff] }
 0x33c   : > { %v2087_v0 = vpop.f32.mrf.mxu3 }
 0x33d   : > { %v7039_v38 = vadd.f32 %v2087_v0, %v6711_v26  ;;  %v7055_v21 = vpop.f32.mrf.mxu1 }
 0x33f   : > { %7868 = vst [vmem:[#allocation49_spill] sm:$0xff] %v7039_v38  ;;  %v3175_v38 = vld [vmem:[#allocation3 + $0x97] sm:$0xff] }
 0x344   : > { %v2089_v63 = vpop.f32.mrf.mxu3 }
 0x345   : > { %v7044_v42 = vadd.f32 %v2089_v63, %v6723_v43  ;;  %v5275_v43 = vld [vmem:[%s7587_s7] sm:$0xff]  ;;  %v7060_v63 = vpop.f32.mrf.mxu2 }
 0x346   : > { %4342 = vmatpush.bf16.msra.mxu2 %v5275_v43 }
 0x347   : > { %7869 = vst [vmem:[#allocation15_spill] sm:$0xff] %v7044_v42 }
 0x349   : > { %3339 = vmatmul.bf16.gmra.mxu3 %v3230_v55  ;;  %v3205_v55 = vmul.f32 %v7875_v35, %v3173_v2 }
 0x34a   : > { %4007 = vmatmul.bf16.gmra.mxu1 %v7872_v45  ;;  %v7876_v45 = vld [vmem:[#allocation82_spill] sm:$0xff] }
 0x34b   : > { %v3231_v44 = vpack.c.bf16 %v3174_v19, %v3205_v55  ;;  %v7880_v19 = vld [vmem:[#allocation22_spill] sm:$0xff] }
 0x34c   : > { %v2092_v26 = vpop.f32.mrf.mxu3  ;;  %v3207_v35 = vmul.f32 %v7880_v19, %v3175_v38  ;;  %v7885_v38 = vld [vmem:[#allocation24_spill] sm:$0xff] }
 0x34d   : > { %v7053_v0 = vadd.f32 %v2092_v26, %v6743_v60  ;;  %v7066_v60 = vpop.f32.mrf.mxu1  ;;  %v7877_v26 = vpack.c.bf16 %v7876_v45, %v6561_v46 }
 0x34f   : > { %7873 = vst [vmem:[#allocation59_spill] sm:$0xff] %v7053_v0  ;;  %v7071_v0 = vpop.f32.mrf.mxu2 }
 0x354   : > { %v2094_v7 = vpop.f32.mrf.mxu3 }
 0x355   : > { %v7063_v37 = vadd.f32 %v2094_v7, %v6758_v27  ;;  %v3176_v7 = vld [vmem:[#allocation3 + $0x9f] sm:$0xff] }
 0x356   : > { %v3232_v55 = vpack.c.bf16 %v3176_v7, %v3207_v35  ;;  %v7886_v35 = vld [vmem:[#allocation27_spill] sm:$0xff] }
 0x357   : > { %7874 = vst [vmem:[#allocation17_spill] sm:$0xff] %v7063_v37  ;;  %v7076_v32 = vpop.f32.mrf.mxu2  ;;  %v3178_v37 = vld [vmem:[#allocation3 + $0xaf] sm:$0xff] }
 0x359   : > { %3344 = vmatmul.bf16.gmra.mxu3 %v3231_v44 }
 0x35a   : > { %4012 = vmatmul.bf16.gmra.mxu1 %v7877_v26 }
 0x35c   : > { %v2097_v42 = vpop.f32.mrf.mxu3 }
 0x35d   : > { %v7074_v43 = vadd.f32 %v2097_v42, %v6779_v53  ;;  %v3177_v53 = vld [vmem:[#allocation3 + $0xa7] sm:$0xff] }
 0x35e   : > { %v7882_v42 = vld [vmem:[#allocation54_spill] sm:$0xff]  ;;  %v3209_v7 = vmul.f32 %v7885_v38, %v3177_v53  ;;  %v7105_v53 = vpop.f32.mrf.mxu1 }
 0x35f   : > { %7878 = vst [vmem:[#allocation68_spill] sm:$0xff] %v7074_v43  ;;  %v7085_v45 = vpop.f32.mrf.mxu2  ;;  %v2469_v26 = vadd.f32 %v7882_v42, %v6826_v56  ;;  %v7888_v42 = vld [vmem:[#allocation12_spill] sm:$0xff] }
 0x364   : > { %v2099_v27 = vpop.f32.mrf.mxu3 }
 0x365   : > { %v7079_v2 = vadd.f32 %v2099_v27, %v6790_v9  ;;  %v1810_v9 = vadd.f32 %v7884_v24, %v7883_v47  ;;  %v7101_v24 = vpop.f32.mrf.mxu0  ;;  %v7889_v47 = vld [vmem:[#allocation40_spill] sm:$0xff] }
 0x367   : > { %7879 = vst [vmem:[#allocation19_spill] sm:$0xff] %v7079_v2  ;;  %v2140_v19 = vadd.f32 %v6832_v34, %v1810_v9 }
 0x369   : > { %3349 = vmatmul.bf16.gmra.mxu3 %v3232_v55  ;;  %v2767_v55 = vadd.f32 %v7886_v35, %v2469_v26  ;;  %v7890_v26 = vld [vmem:[#allocation65_spill] sm:$0xff] }
 0x36a   : > { %v2471_v9 = vadd.f32 %v7890_v26, %v6842_v59  ;;  %v7123_v59 = vld [vmem:[%s7586_s6] ss:$0 sm:$0xff] }
 0x36b   : > { %v3097_v2 = vadd.f32 %v7888_v42, %v2767_v55 }
 0x36c   : > { %v2102_v46 = vpop.f32.mrf.mxu3 }
 0x36d   : > { %v7083_v44 = vadd.f32 %v2102_v46, %v6801_v10  ;;  %v3233_v10 = vpack.c.bf16 %v3178_v37, %v3209_v7  ;;  %v7097_v46 = vpop.f32.mrf.mxu2  ;;  %v3179_v37 = vld [vmem:[#allocation3 + $0xb7] sm:$0xff] }
 0x36f   : > { %7881 = vst [vmem:[#allocation82_spill] sm:$0xff] %v7083_v44  ;;  %v7887_v44 = vld [vmem:[#allocation61_spill] sm:$0xff] }
 0x370   : > { %v2470_v56 = vadd.f32 %v7887_v44, %v2140_v19  ;;  %v7892_v19 = vld [vmem:[#allocation29_spill] sm:$0xff] }
 0x374   : > { %v2104_v43 = vpop.f32.mrf.mxu3 }
 0x375   : > { %v7092_v27 = vadd.f32 %v2104_v43, %v6813_v51  ;;  %v2768_v43 = vadd.f32 %v7889_v47, %v2470_v56  ;;  %v7107_v34 = vpop.f32.mrf.mxu2  ;;  %v7893_v56 = vld [vmem:[#allocation45_spill] sm:$0xff] }
 0x376   : > { %v2769_v42 = vadd.f32 %v7893_v56, %v2471_v9 }
 0x379   : > { %3354 = vmatmul.bf16.gmra.mxu3 %v3233_v10  ;;  %v3211_v10 = vmul.f32 %v7892_v19, %v3179_v37  ;;  %v7894_v37 = vld [vmem:[#allocation69_spill] sm:$0xff] }
 0x37a   : > { %v2472_v26 = vadd.f32 %v7894_v37, %v6852_v50 }
 0x37c   : > { %v3315_v54 = vpop.f32.mrf.mxu3 }
 0x37d   : > { %v3427_v13 = vadd.f32 %v3315_v54, %v3097_v2  ;;  %v7115_v54 = vld [vmem:[%s7585_s5] ss:$0 sm:$0xff]  ;;  %v7891_v2 = vld [vmem:[#allocation86_spill] sm:$0xff] }
 0x37e   : > { %v3098_v38 = vadd.f32 %v7891_v2, %v2768_v43  ;;  %v7130_v43 = vpop.f32.mrf.mxu1 }
 0x37f   : > { %v3725_v51 = vadd.f32 %v6867_v62, %v3427_v13  ;;  %v3180_v13 = vld [vmem:[#allocation3 + $0xbf] sm:$0xff] }
 0x380   : > { %v3234_v55 = vpack.c.bf16 %v3180_v13, %v3211_v10 }
 0x381   : > { %v4055_v44 = vadd.f32 %v7010_v48, %v3725_v51  ;;  %v7127_v51 = vpop.f32.mrf.mxu0 }
 0x383   : > { %v4155_v35 = vmul.f32 %v7115_v54, %v4055_v44 }
 0x384   : > { %v3317_v62 = vpop.f32.mrf.mxu3 }
 0x385   : > { %v3428_v7 = vadd.f32 %v3317_v62, %v3098_v38  ;;  %v4191_v44 = vadd.f32 %v7123_v59, %v4155_v35  ;;  %v7895_v38 = vld [vmem:[#allocation41_spill] sm:$0xff] }
 0x386   : > { %v3099_v62 = vadd.f32 %v7895_v38, %v2769_v42  ;;  %v3181_v35 = vld [vmem:[#allocation3 + $0xc7] sm:$0xff] }
 0x387   : > { %v3726_v48 = vadd.f32 %v6879_v12, %v3428_v7  ;;  %v7137_v12 = vpop.f32.mrf.mxu2  ;;  %v4223_v19 = vmax.f32 %v4191_v44, 0.0 }
 0x389   : > { %v4056_v47 = vadd.f32 %v7023_v18, %v3726_v48  ;;  %3359 = vmatmul.bf16.gmra.mxu3 %v3234_v55  ;;  %v7896_v48 = vld [vmem:[#allocation10_spill] sm:$0xff]  ;;  %v7142_v50 = vpop.f32.mrf.mxu0 }
 0x38a   : > { %v2770_v55 = vadd.f32 %v7896_v48, %v2472_v26 }
 0x38b   : > { %v4156_v2 = vmul.f32 %v7115_v54, %v4056_v47  ;;  %v7897_v47 = vld [vmem:[#allocation70_spill] sm:$0xff] }
 0x38c   : > { %v3320_v13 = vpop.f32.mrf.mxu3  ;;  %v2473_v37 = vadd.f32 %v7897_v47, %v6865_v1  ;;  %v3100_v38 = vadd.f32 %v6697_v25, %v2770_v55  ;;  %v7899_v1 = vld [vmem:[#allocation84_spill] sm:$0xff] }
 0x38d   : > { %v4192_v9 = vadd.f32 %v7123_v59, %v4156_v2  ;;  %v3429_v7 = vadd.f32 %v3320_v13, %v3099_v62  ;;  %v7148_v2 = vpop.f32.mrf.mxu1  ;;  %v3182_v62 = vld [vmem:[#allocation3 + $0xcf] sm:$0xff]  ;;  %v7900_v25 = vld [vmem:[#allocation72_spill] sm:$0xff] }
 0x38e   : > { %v2771_v48 = vadd.f32 %v7899_v1, %v2473_v37 }
 0x38f   : > { %v4224_v18 = vmax.f32 %v4192_v9, 0.0  ;;  %v3727_v10 = vadd.f32 %v6891_v33, %v3429_v7  ;;  %v7898_v33 = vld [vmem:[#allocation37_spill] sm:$0xff]  ;;  %v7151_v26 = vpop.f32.mrf.mxu2 }
 0x390   : > { %v3213_v9 = vmul.f32 %v7898_v33, %v3181_v35 }
 0x391   : > { %v4255_v56 = vpack.c.bf16 %v4224_v18, %v4223_v19  ;;  %v4057_v42 = vadd.f32 %v7034_v57, %v3727_v10  ;;  %v2474_v10 = vadd.f32 %v7900_v25, %v6874_v39  ;;  %v7162_v47 = vpop.f32.mrf.mxu0 }
 0x392   : > { %v3235_v18 = vpack.c.bf16 %v3182_v62, %v3213_v9  ;;  %v3183_v9 = vld [vmem:[#allocation3 + $0xd7] sm:$0xff] }
 0x393   : > { %4343 = vmatmul.bf16.vlgmr.msra.gmra.mxu2 %v4255_v56  ;;  %v4157_v7 = vmul.f32 %v7115_v54, %v4057_v42  ;;  %v3101_v56 = vadd.f32 %v6716_v58, %v2771_v48  ;;  %v7903_v48 = vld [vmem:[#allocation42_spill] sm:$0xff] }
 0x394   : > { %v3322_v44 = vpop.f32.mrf.mxu3 }
 0x395   : > { %v3430_v13 = vadd.f32 %v3322_v44, %v3100_v38  ;;  %v4193_v35 = vadd.f32 %v7123_v59, %v4157_v7  ;;  %v7165_v44 = vpop.f32.mrf.mxu1  ;;  %v7902_v7 = vld [vmem:[#allocation74_spill] sm:$0xff] }
 0x397   : > { %v3728_v19 = vadd.f32 %v6907_v52, %v3430_v13  ;;  %v4225_v37 = vmax.f32 %v4193_v35, 0.0  ;;  %v7901_v13 = vld [vmem:[#allocation46_spill] sm:$0xff]  ;;  %v7169_v33 = vpop.f32.mrf.mxu2 }
 0x398   : > { %v2772_v39 = vadd.f32 %v7901_v13, %v2474_v10 }
 0x399   : > { %v4058_v57 = vadd.f32 %v7041_v5, %v3728_v19  ;;  %3364 = vmatmul.bf16.gmra.mxu3 %v3235_v18  ;;  %v2475_v19 = vadd.f32 %v7902_v7, %v6882_v36 }
 0x39a   : > { %v3102_v1 = vadd.f32 %v6740_v11, %v2772_v39 }
 0x39b   : > { %v4158_v55 = vmul.f32 %v7115_v54, %v4058_v57  ;;  %v3215_v57 = vmul.f32 %v7903_v48, %v3183_v9 }
 0x39c   : > { %v3325_v42 = vpop.f32.mrf.mxu3 }
 0x39d   : > { %v3431_v38 = vadd.f32 %v3325_v42, %v3101_v56  ;;  %v4194_v52 = vadd.f32 %v7123_v59, %v4158_v55  ;;  %v7176_v56 = vpop.f32.mrf.mxu0  ;;  %v7181_v36 = vpop.f32.mrf.mxu1 }
 0x39f   : > { %v3729_v5 = vadd.f32 %v6916_v20, %v3431_v38  ;;  %v4226_v62 = vmax.f32 %v4194_v52, 0.0  ;;  %v3184_v20 = vld [vmem:[#allocation3 + $0xdf] sm:$0xff]  ;;  %v7904_v38 = vld [vmem:[#allocation87_spill] sm:$0xff]  ;;  %v7184_v11 = vpop.f32.mrf.mxu2 }
 0x3a0   : > { %v3236_v42 = vpack.c.bf16 %v3184_v20, %v3215_v57  ;;  %v2773_v52 = vadd.f32 %v7904_v38, %v2475_v19  ;;  %v3185_v57 = vld [vmem:[#allocation3 + $0xe7] sm:$0xff] }
 0x3a1   : > { %v4256_v58 = vpack.c.bf16 %v4226_v62, %v4225_v37  ;;  %v4059_v18 = vadd.f32 %v7055_v21, %v3729_v5  ;;  %v7905_v5 = vld [vmem:[#allocation76_spill] sm:$0xff] }
 0x3a2   : > { %v2476_v37 = vadd.f32 %v7905_v5, %v6894_v29  ;;  %v3103_v13 = vadd.f32 %v6763_v15, %v2773_v52  ;;  %v7907_v15 = vld [vmem:[#allocation77_spill] sm:$0xff]  ;;  %v3186_v52 = vld [vmem:[#allocation3 + $0xef] sm:$0xff] }
 0x3a3   : > { %4348 = vmatmul.bf16.gmra.mxu2 %v4256_v58  ;;  %v4159_v10 = vmul.f32 %v7115_v54, %v4059_v18  ;;  %v7906_v18 = vld [vmem:[#allocation14_spill] sm:$0xff]  ;;  %v2477_v20 = vadd.f32 %v7907_v15, %v6905_v30  ;;  %v7911_v15 = vld [vmem:[#allocation53_spill] sm:$0xff] }
 0x3a4   : > { %v3327_v25 = vpop.f32.mrf.mxu3 }
 0x3a5   : > { %v3432_v55 = vadd.f32 %v3327_v25, %v3102_v1  ;;  %v4195_v39 = vadd.f32 %v7123_v59, %v4159_v10  ;;  %v2774_v1 = vadd.f32 %v7906_v18, %v2476_v37  ;;  %v7194_v48 = vpop.f32.mrf.mxu0  ;;  %v7196_v25 = vpop.f32.mrf.mxu1 }
 0x3a7   : > { %v3730_v35 = vadd.f32 %v6929_v61, %v3432_v55  ;;  %v4227_v19 = vmax.f32 %v4195_v39, 0.0  ;;  %v3104_v10 = vadd.f32 %v6784_v17, %v2774_v1  ;;  %v7910_v17 = vld [vmem:[#allocation78_spill] sm:$0xff] }
 0x3a9   : > { %v4060_v21 = vadd.f32 %v7066_v60, %v3730_v35  ;;  %3369 = vmatmul.bf16.gmra.mxu3 %v3236_v42  ;;  %v7908_v35 = vld [vmem:[#allocation55_spill] sm:$0xff]  ;;  %v7203_v42 = vpop.f32.mrf.mxu2 }
 0x3ab   : > { %v4160_v62 = vmul.f32 %v7115_v54, %v4060_v21 }
 0x3ac   : > { %v3330_v61 = vpop.f32.mrf.mxu3 }
 0x3ad   : > { %v3433_v9 = vadd.f32 %v3330_v61, %v3103_v13  ;;  %v4196_v58 = vadd.f32 %v7123_v59, %v4160_v62  ;;  %v7909_v13 = vld [vmem:[#allocation89_spill] sm:$0xff]  ;;  %v2478_v61 = vadd.f32 %v7910_v17, %v6914_v16 }
 0x3ae   : > { %v2775_v39 = vadd.f32 %v7909_v13, %v2477_v20  ;;  %v3187_v20 = vld [vmem:[#allocation3 + $0xf7] sm:$0xff]  ;;  %v7914_v13 = vld [vmem:[#allocation18_spill] sm:$0xff] }
 0x3af   : > { %v3731_v7 = vadd.f32 %v7101_v24, %v3433_v9  ;;  %v4228_v60 = vmax.f32 %v4196_v58, 0.0  ;;  %v3217_v24 = vmul.f32 %v7908_v35, %v3185_v57  ;;  %v2776_v16 = vadd.f32 %v7911_v15, %v2478_v61 }
 0x3b0   : > { %v3105_v58 = vadd.f32 %v7012_v22, %v2775_v39  ;;  %v7912_v22 = vld [vmem:[#allocation79_spill] sm:$0xff] }
 0x3b1   : > { %v4257_v29 = vpack.c.bf16 %v4228_v60, %v4227_v19  ;;  %v4061_v55 = vadd.f32 %v7105_v53, %v3731_v7  ;;  %v3237_v62 = vpack.c.bf16 %v3186_v52, %v3217_v24  ;;  %v7209_v53 = vpop.f32.mrf.mxu0  ;;  %v7216_v19 = vpop.f32.mrf.mxu1  ;;  %v3106_v24 = vadd.f32 %v7025_v8, %v2776_v16 }
 0x3b2   : > { %v7219_v1 = vpop.f32.mrf.mxu2 }
 0x3b3   : > { %4353 = vmatmul.bf16.gmra.mxu2 %v4257_v29  ;;  %v4161_v5 = vmul.f32 %v7115_v54, %v4061_v55 }
 0x3b4   : > { %v3332_v38 = vpop.f32.mrf.mxu3 }
 0x3b5   : > { %v3434_v21 = vadd.f32 %v3332_v38, %v3104_v10  ;;  %v4197_v7 = vadd.f32 %v7123_v59, %v4161_v5  ;;  %v2479_v10 = vadd.f32 %v7912_v22, %v6924_v49  ;;  %v7913_v38 = vld [vmem:[#allocation66_spill] sm:$0xff] }
 0x3b6   : > { %v3219_v52 = vmul.f32 %v7913_v38, %v3187_v20  ;;  %v3189_v38 = vld [vmem:[#allocation3 + $0x107] sm:$0xff] }
 0x3b7   : > { %v3732_v37 = vadd.f32 %v7127_v51, %v3434_v21  ;;  %v4229_v57 = vmax.f32 %v4197_v7, 0.0  ;;  %v2777_v39 = vadd.f32 %v7914_v13, %v2479_v10  ;;  %v7917_v10 = vld [vmem:[#allocation92_spill] sm:$0xff] }
 0x3b9   : > { %v4062_v30 = vadd.f32 %v7130_v43, %v3732_v37  ;;  %3374 = vmatmul.bf16.gmra.mxu3 %v3237_v62  ;;  %v7228_v21 = vpop.f32.mrf.mxu0  ;;  %v7230_v62 = vpop.f32.mrf.mxu1  ;;  %v3107_v61 = vadd.f32 %v7036_v4, %v2777_v39 }
 0x3bb   : > { %v4162_v9 = vmul.f32 %v7115_v54, %v4062_v30 }
 0x3bc   : > { %v3335_v51 = vpop.f32.mrf.mxu3 }
 0x3bd   : > { %v3435_v60 = vadd.f32 %v3335_v51, %v3105_v58  ;;  %v4198_v18 = vadd.f32 %v7123_v59, %v4162_v9  ;;  %v7915_v9 = vld [vmem:[#allocation80_spill] sm:$0xff] }
 0x3be   : > { %v2480_v58 = vadd.f32 %v7915_v9, %v6934_v41 }
 0x3bf   : > { %v3733_v43 = vadd.f32 %v7142_v50, %v3435_v60  ;;  %v4230_v29 = vmax.f32 %v4198_v18, 0.0  ;;  %v3188_v50 = vld [vmem:[#allocation3 + $0xff] sm:$0xff] }
 0x3c0   : > { %v3238_v17 = vpack.c.bf16 %v3188_v50, %v3219_v52  ;;  %v5359_v60 = vld [vmem:[#allocation3] sm:$0xff] }
 0x3c1   : > { %v4258_v55 = vpack.c.bf16 %v4230_v29, %v4229_v57  ;;  %v4063_v35 = vadd.f32 %v7148_v2, %v3733_v43  ;;  %v7235_v2 = vpop.f32.mrf.mxu2  ;;  %v3538_v18 = vpack.c.bf16 %v5359_v60, %v5359_v60  ;;  %v3819_v43 = vld [vmem:[#allocation3 + $0x119] sm:$0xff]  ;;  %v3820_v57 = vld [vmem:[#allocation3 + $0x121] sm:$0xff]  ;;  %v7916_v29 = vld [vmem:[#allocation63_spill] sm:$0xff]  ;;  %v7245_v20 = vpop.f32.mrf.mxu0 }
 0x3c2   : > { %v3852_v15 = vmul.f32 %v7916_v29, %v3820_v57  ;;  %v7918_v50 = vld [vmem:[#allocation81_spill] sm:$0xff] }
 0x3c3   : > { %4358 = vmatmul.bf16.gmra.mxu2 %v4258_v55  ;;  %v4163_v30 = vmul.f32 %v7115_v54, %v4063_v35  ;;  %3687 = vmatmul.bf16.gmra.mxu0 %v3538_v18  ;;  %v2778_v35 = vadd.f32 %v7917_v10, %v2480_v58  ;;  %v7921_v18 = vld [vmem:[#allocation83_spill] sm:$0xff] }
 0x3c4   : > { %v3337_v5 = vpop.f32.mrf.mxu3  ;;  %v3868_v4 = vpack.c.bf16 %v3852_v15, %v3819_v43 }
 0x3c5   : > { %v3436_v37 = vadd.f32 %v3337_v5, %v3106_v24  ;;  %v4199_v51 = vadd.f32 %v7123_v59, %v4163_v30  ;;  %v7249_v24 = vpop.f32.mrf.mxu1  ;;  %v3108_v39 = vadd.f32 %v7047_v31, %v2778_v35  ;;  %v2482_v31 = vadd.f32 %v7921_v18, %v6947_v3  ;;  %v7923_v35 = vld [vmem:[#allocation57_spill] sm:$0xff] }
 0x3c6   : > { %4017 = vmatmul.bf16.gmra.mxu1 %v3868_v4 }
 0x3c7   : > { %v3734_v49 = vadd.f32 %v7162_v47, %v3436_v37  ;;  %v4231_v55 = vmax.f32 %v4199_v51, 0.0  ;;  %v2481_v37 = vadd.f32 %v7918_v50, %v6942_v40 }
 0x3c9   : > { %v4064_v8 = vadd.f32 %v7165_v44, %v3734_v49  ;;  %3379 = vmatmul.bf16.gmra.mxu3 %v3238_v17  ;;  %v7251_v5 = vpop.f32.mrf.mxu2  ;;  %v3190_v17 = vld [vmem:[#allocation3 + $0x10f] sm:$0xff]  ;;  %v3650_v60 = vpop.f32.mrf.mxu0 }
 0x3cb   : > { %v4164_v7 = vmul.f32 %v7115_v54, %v4064_v8 }
 0x3cc   : > { %v3340_v47 = vpop.f32.mrf.mxu3 }
 0x3cd   : > { %v3437_v16 = vadd.f32 %v3340_v47, %v3107_v61  ;;  %v4200_v44 = vadd.f32 %v7123_v59, %v4164_v7  ;;  %v7920_v7 = vld [vmem:[#allocation93_spill] sm:$0xff] }
 0x3ce   : > { %v2779_v51 = vadd.f32 %v7920_v7, %v2481_v37  ;;  %v7925_v37 = vld [vmem:[#allocation75_spill] sm:$0xff] }
 0x3cf   : > { %v3735_v41 = vadd.f32 %v7176_v56, %v3437_v16  ;;  %v4232_v22 = vmax.f32 %v4200_v44, 0.0  ;;  %v7919_v56 = vld [vmem:[#allocation71_spill] sm:$0xff] }
 0x3d0   : > { %v3221_v30 = vmul.f32 %v7919_v56, %v3189_v38  ;;  %v3109_v57 = vadd.f32 %v7060_v63, %v2779_v51  ;;  %v7924_v38 = vld [vmem:[#allocation32_spill] sm:$0xff] }
 0x3d1   : > { %v4259_v52 = vpack.c.bf16 %v4232_v22, %v4231_v55  ;;  %v4065_v13 = vadd.f32 %v7181_v36, %v3735_v41  ;;  %v3980_v36 = vpop.f32.mrf.mxu1  ;;  %v7267_v29 = vpop.f32.mrf.mxu2  ;;  %v7922_v41 = vld [vmem:[#allocation95_spill] sm:$0xff]  ;;  %v2483_v63 = vadd.f32 %v7924_v38, %v7923_v35 }
 0x3d2   : > { %v3239_v58 = vpack.c.bf16 %v3190_v17, %v3221_v30  ;;  %v2780_v55 = vadd.f32 %v7922_v41, %v2482_v31  ;;  %v3191_v22 = vld [vmem:[#allocation3 + $0x117] sm:$0xff]  ;;  %v3653_v10 = vpop.f32.mrf.mxu0 }
 0x3d3   : > { %4363 = vmatmul.bf16.gmra.mxu2 %v4259_v52  ;;  %v4165_v61 = vmul.f32 %v7115_v54, %v4065_v13  ;;  %v3223_v13 = vmul.f32 %v7925_v37, %v3191_v22 }
 0x3d4   : > { %v3342_v49 = vpop.f32.mrf.mxu3  ;;  %v3110_v50 = vadd.f32 %v7071_v0, %v2780_v55  ;;  %v7927_v0 = vld [vmem:[#allocation35_spill] sm:$0xff] }
 0x3d5   : > { %v3438_v8 = vadd.f32 %v3342_v49, %v3108_v39  ;;  %v4201_v47 = vadd.f32 %v7123_v59, %v4165_v61  ;;  %v2484_v7 = vadd.f32 %v7927_v0, %v6966_v6 }
 0x3d7   : > { %v3736_v9 = vadd.f32 %v7194_v48, %v3438_v8 }
 0x3d9   : > { %v4066_v40 = vadd.f32 %v7196_v25, %v3736_v9  ;;  %3384 = vmatmul.bf16.gmra.mxu3 %v3239_v58  ;;  %v4233_v25 = vmax.f32 %v4201_v47, 0.0  ;;  %v3983_v39 = vpop.f32.mrf.mxu1  ;;  %v7277_v49 = vpop.f32.mrf.mxu2  ;;  %v7926_v9 = vld [vmem:[#allocation96_spill] sm:$0xff] }
 0x3da   : > { %v2781_v58 = vadd.f32 %v7926_v9, %v2483_v63  ;;  %v3655_v31 = vpop.f32.mrf.mxu0  ;;  %v7930_v63 = vld [vmem:[#allocation98_spill] sm:$0xff] }
 0x3db   : > { %v4166_v43 = vmul.f32 %v7115_v54, %v4066_v40 }
 0x3dc   : > { %v3345_v48 = vpop.f32.mrf.mxu3  ;;  %v3111_v40 = vadd.f32 %v7076_v32, %v2781_v58  ;;  %v7932_v58 = vld [vmem:[#allocation30_spill] sm:$0xff] }
 0x3dd   : > { %v3439_v15 = vadd.f32 %v3345_v48, %v3109_v57  ;;  %v4202_v16 = vadd.f32 %v7123_v59, %v4166_v43 }
 0x3df   : > { %v3737_v44 = vadd.f32 %v7209_v53, %v3439_v15  ;;  %v4234_v4 = vmax.f32 %v4202_v16, 0.0  ;;  %v3192_v53 = vld [vmem:[#allocation3 + $0x11f] sm:$0xff] }
 0x3e0   : > { %v3240_v61 = vpack.c.bf16 %v3192_v53, %v3223_v13  ;;  %v7928_v16 = vld [vmem:[#allocation28_spill] sm:$0xff] }
 0x3e1   : > { %v4260_v3 = vpack.c.bf16 %v4234_v4, %v4233_v25  ;;  %v4067_v52 = vadd.f32 %v7216_v19, %v3737_v44  ;;  %v3985_v47 = vpop.f32.mrf.mxu1  ;;  %v2782_v44 = vadd.f32 %v7928_v16, %v2484_v7  ;;  %v7291_v25 = vpop.f32.mrf.mxu2  ;;  %v7929_v4 = vld [vmem:[#allocation31_spill] sm:$0xff] }
 0x3e2   : > { %v2485_v32 = vadd.f32 %v7929_v4, %v6973_v28  ;;  %v3658_v35 = vpop.f32.mrf.mxu0 }
 0x3e3   : > { %4368 = vmatmul.bf16.gmra.mxu2 %v4260_v3  ;;  %v4167_v17 = vmul.f32 %v7115_v54, %v4067_v52  ;;  %v3112_v55 = vadd.f32 %v7085_v45, %v2782_v44  ;;  %v7935_v44 = vld [vmem:[#allocation48_spill] sm:$0xff] }
 0x3e4   : > { %v3347_v56 = vpop.f32.mrf.mxu3  ;;  %v2783_v52 = vadd.f32 %v7930_v63, %v2485_v32 }
 0x3e5   : > { %v3440_v30 = vadd.f32 %v3347_v56, %v3110_v50  ;;  %v4203_v18 = vadd.f32 %v7123_v59, %v4167_v17  ;;  %v7931_v56 = vld [vmem:[#allocation9_spill] sm:$0xff] }
 0x3e6   : > { %v2486_v28 = vadd.f32 %v7931_v56, %v6978_v23  ;;  %v3113_v53 = vadd.f32 %v7097_v46, %v2783_v52  ;;  %v7933_v23 = vld [vmem:[#allocation52_spill] sm:$0xff] }
 0x3e7   : > { %v3738_v8 = vadd.f32 %v7228_v21, %v3440_v30  ;;  %v4235_v15 = vmax.f32 %v4203_v18, 0.0  ;;  %v7939_v56 = vld [vmem:[#allocation88_spill] sm:$0xff] }
 0x3e9   : > { %v4068_v19 = vadd.f32 %v7230_v62, %v3738_v8  ;;  %3389 = vmatmul.bf16.gmra.mxu3 %v3240_v61  ;;  %v3988_v50 = vpop.f32.mrf.mxu1  ;;  %v7299_v13 = vpop.f32.mrf.mxu2 }
 0x3eb   : > { %v4168_v51 = vmul.f32 %v7115_v54, %v4068_v19  ;;  %v3660_v19 = vpop.f32.mrf.mxu0 }
 0x3ec   : > { %v3350_v43 = vpop.f32.mrf.mxu3 }
 0x3ed   : > { %v3441_v57 = vadd.f32 %v3350_v43, %v3111_v40  ;;  %v4204_v21 = vadd.f32 %v7123_v59, %v4168_v51  ;;  %v2487_v51 = vadd.f32 %v7933_v23, %v6987_v14  ;;  %v7941_v23 = vld [vmem:[#allocation11_spill] sm:$0xff] }
 0x3ef   : > { %v3739_v48 = vadd.f32 %v7245_v20, %v3441_v57  ;;  %v4236_v62 = vmax.f32 %v4204_v21, 0.0 }
 0x3f1   : > { %v4261_v6 = vpack.c.bf16 %v4236_v62, %v4235_v15  ;;  %v4069_v41 = vadd.f32 %v7249_v24, %v3739_v48  ;;  %v3990_v7 = vpop.f32.mrf.mxu1  ;;  %v7311_v18 = vpop.f32.mrf.mxu2  ;;  %v7934_v48 = vld [vmem:[#allocation44_spill] sm:$0xff] }
 0x3f2   : > { %v2785_v15 = vadd.f32 %v7934_v48, %v2487_v51  ;;  %v7942_v51 = vld [vmem:[#allocation43_spill] sm:$0xff] }
 0x3f3   : > { %4373 = vmatmul.bf16.gmra.mxu2 %v4261_v6  ;;  %v4169_v20 = vmul.f32 %v7115_v54, %v4069_v41  ;;  %v3663_v16 = vpop.f32.mrf.mxu0  ;;  %v7936_v6 = vld [vmem:[#allocation85_spill] sm:$0xff] }
 0x3f4   : > { %v3352_v22 = vpop.f32.mrf.mxu3  ;;  %v2488_v4 = vadd.f32 %v7936_v6, %v7935_v44  ;;  %v7943_v6 = vld [vmem:[#allocation56_spill] sm:$0xff] }
 0x3f5   : > { %v3442_v3 = vadd.f32 %v3352_v22, %v3112_v55  ;;  %v4205_v45 = vadd.f32 %v7123_v59, %v4169_v20 }
 0x3f7   : > { %v3740_v38 = vadd.f32 %v3650_v60, %v3442_v3  ;;  %v4237_v61 = vmax.f32 %v4205_v45, 0.0 }
 0x3f9   : > { %v4070_v37 = vadd.f32 %v3980_v36, %v3740_v38  ;;  %v2784_v36 = vadd.f32 %v7932_v58, %v2486_v28  ;;  %v3993_v32 = vpop.f32.mrf.mxu1  ;;  %v7321_v3 = vpop.f32.mrf.mxu2  ;;  %v7937_v38 = vld [vmem:[#allocation38_spill] sm:$0xff] }
 0x3fa   : > { %v2786_v63 = vadd.f32 %v7937_v38, %v2488_v4 }
 0x3fb   : > { %v4170_v24 = vmul.f32 %v7115_v54, %v4070_v37  ;;  %v3114_v46 = vadd.f32 %v7107_v34, %v2784_v36  ;;  %v7938_v37 = vld [vmem:[#allocation58_spill] sm:$0xff]  ;;  %v3665_v45 = vpop.f32.mrf.mxu0 }
 0x3fc   : > { %v3355_v30 = vpop.f32.mrf.mxu3  ;;  %v2489_v28 = vadd.f32 %v7939_v56, %v7938_v37 }
 0x3fd   : > { %v3443_v17 = vadd.f32 %v3355_v30, %v3113_v53  ;;  %v4206_v8 = vadd.f32 %v7123_v59, %v4170_v24  ;;  %v3116_v24 = vadd.f32 %v7151_v26, %v2786_v63  ;;  %v7330_v53 = vld [vmem:[%s7588_s8] ss:$0 sm:$0xff]  ;;  %v5361_v63 = vld [vmem:[%s5591_s12 + $0x8] sm:$0xff] }
 0x3ff   : > { %v3741_v60 = vadd.f32 %v3653_v10, %v3443_v17  ;;  %v4238_v9 = vmax.f32 %v4206_v8, 0.0  ;;  %v7335_v17 = vld [vmem:[%s7589_s9] ss:$0 sm:$0xff] }
 0x401   : > { %v4262_v0 = vpack.c.bf16 %v4238_v9, %v4237_v61  ;;  %v4071_v40 = vadd.f32 %v3983_v39, %v3741_v60  ;;  %v3115_v39 = vadd.f32 %v7137_v12, %v2785_v15  ;;  %v3995_v8 = vpop.f32.mrf.mxu1  ;;  %v7940_v9 = vld [vmem:[#allocation39_spill] sm:$0xff] }
 0x402   : > { %v2787_v58 = vadd.f32 %v7940_v9, %v2489_v28  ;;  %v7947_v9 = vld [vmem:[#allocation13_spill] sm:$0xff] }
 0x403   : > { %4378 = vmatmul.bf16.gmra.mxu2 %v4262_v0  ;;  %v4171_v10 = vmul.f32 %v7115_v54, %v4071_v40  ;;  %v2490_v40 = vadd.f32 %v7942_v51, %v7941_v23  ;;  %v5362_v23 = vld [vmem:[%s5591_s12 + $0x10] sm:$0xff] }
 0x404   : > { %v3357_v43 = vpop.f32.mrf.mxu3 }
 0x405   : > { %v3444_v57 = vadd.f32 %v3357_v43, %v3114_v46  ;;  %v4207_v34 = vadd.f32 %v7123_v59, %v4171_v10  ;;  %v5360_v43 = vld [vmem:[%s5591_s12] sm:$0xff]  ;;  %v3117_v10 = vadd.f32 %v7169_v33, %v2787_v58  ;;  %v2788_v4 = vadd.f32 %v7943_v6, %v2490_v40 }
 0x407   : > { %v3742_v21 = vadd.f32 %v3655_v31, %v3444_v57  ;;  %v3118_v37 = vadd.f32 %v7184_v11, %v2788_v4  ;;  %v7948_v11 = vld [vmem:[#allocation90_spill] sm:$0xff] }
 0x408   : > { %v2492_v58 = vadd.f32 %v7948_v11, %v7947_v9 }
 0x409   : > { %v4072_v62 = vadd.f32 %v3985_v47, %v3742_v21  ;;  %v4239_v47 = vmax.f32 %v4207_v34, 0.0 }
 0x40b   : > { %v4172_v14 = vmul.f32 %v7115_v54, %v4072_v62  ;;  %v3668_v62 = vpop.f32.mrf.mxu0 }
 0x40c   : > { %v3360_v41 = vpop.f32.mrf.mxu3 }
 0x40d   : > { %v3445_v55 = vadd.f32 %v3360_v41, %v3115_v39  ;;  %v4208_v22 = vadd.f32 %v7123_v59, %v4172_v14  ;;  %v3998_v41 = vpop.f32.mrf.mxu1 }
 0x40f   : > { %v3743_v31 = vadd.f32 %v3658_v35, %v3445_v55  ;;  %v4240_v20 = vmax.f32 %v4208_v22, 0.0 }
 0x411   : > { %v4263_v52 = vpack.c.bf16 %v4240_v20, %v4239_v47  ;;  %v4073_v12 = vadd.f32 %v3988_v50, %v3743_v31  ;;  %v7944_v31 = vld [vmem:[#allocation62_spill] sm:$0xff]  ;;  %v7945_v47 = vld [vmem:[#allocation16_spill] sm:$0xff] }
 0x412   : > { %v2491_v20 = vadd.f32 %v7945_v47, %v7944_v31 }
 0x413   : > { %4383 = vmatmul.bf16.gmra.mxu2 %v4263_v52  ;;  %v4173_v60 = vmul.f32 %v7115_v54, %v4073_v12 }
 0x414   : > { %v3362_v35 = vpop.f32.mrf.mxu3 }
 0x415   : > { %v3446_v30 = vadd.f32 %v3362_v35, %v3116_v24 }
 0x416   : > { %v4344_v50 = vpop.f32.mrf.mxu2 }
 0x417   : > { %v3744_v26 = vadd.f32 %v3660_v19, %v3446_v30  ;;  %v4428_v61 = vmul.f32 %v7330_v53, %v4344_v50  ;;  %v4209_v19 = vadd.f32 %v7123_v59, %v4173_v60  ;;  %v7946_v50 = vld [vmem:[#allocation50_spill] sm:$0xff] }
 0x418   : > { %v2789_v60 = vadd.f32 %v7946_v50, %v2491_v20  ;;  %v5364_v50 = vld [vmem:[%s5591_s12 + $0x20] sm:$0xff] }
 0x419   : > { %v4074_v36 = vadd.f32 %v3990_v7, %v3744_v26  ;;  %v4464_v0 = vadd.f32 %v7335_v17, %v4428_v61  ;;  %v4241_v33 = vmax.f32 %v4209_v19, 0.0  ;;  %v3670_v26 = vpop.f32.mrf.mxu0  ;;  %v7949_v19 = vld [vmem:[#allocation51_spill] sm:$0xff] }
 0x41a   : > { %v3119_v40 = vadd.f32 %v7203_v42, %v2789_v60 }
 0x41b   : > { %v4174_v46 = vmul.f32 %v7115_v54, %v4074_v36  ;;  %v4496_v57 = vadd.f32 %v5360_v43, %v4464_v0  ;;  %v4000_v36 = vpop.f32.mrf.mxu1 }
 0x41c   : > { %v3365_v21 = vpop.f32.mrf.mxu3 }
 0x41d   : > { %v4528_v48 = vmax.f32 %v4496_v57, 0.0  ;;  %v3447_v15 = vadd.f32 %v3365_v21, %v3117_v10  ;;  %v4210_v7 = vadd.f32 %v7123_v59, %v4174_v46  ;;  %v2790_v21 = vadd.f32 %v7949_v19, %v2492_v58  ;;  %v7957_v19 = vld [vmem:[#allocation94_spill] sm:$0xff] }
 0x41e   : > { %v4346_v44 = vpop.f32.mrf.mxu2 }
 0x41f   : > { %4560 = vst [vmem:[%s7352_s18] sm:$0xff] %v4528_v48  ;;  %v3745_v14 = vadd.f32 %v3663_v16, %v3447_v15  ;;  %v4429_v39 = vmul.f32 %v7330_v53, %v4346_v44  ;;  %v4242_v34 = vmax.f32 %v4210_v7, 0.0  ;;  %v3120_v31 = vadd.f32 %v7219_v1, %v2790_v21 }
 0x421   : > { %v4465_v55 = vadd.f32 %v7335_v17, %v4429_v39  ;;  %v4264_v22 = vpack.c.bf16 %v4242_v34, %v4241_v33  ;;  %v4075_v38 = vadd.f32 %v3993_v32, %v3745_v14  ;;  %v3673_v4 = vpop.f32.mrf.mxu0  ;;  %v7950_v14 = vld [vmem:[#allocation49_spill] sm:$0xff]  ;;  %v7951_v39 = vld [vmem:[#allocation91_spill] sm:$0xff] }
 0x422   : > { %v2493_v33 = vadd.f32 %v7951_v39, %v7950_v14 }
 0x423   : > { %v4497_v52 = vadd.f32 %v5361_v63, %v4465_v55  ;;  %4388 = vmatmul.bf16.gmra.mxu2 %v4264_v22  ;;  %v4175_v24 = vmul.f32 %v7115_v54, %v4075_v38  ;;  %v5363_v55 = vld [vmem:[%s5591_s12 + $0x18] sm:$0xff] }
 0x424   : > { %v3367_v16 = vpop.f32.mrf.mxu3 }
 0x425   : > { %v4529_v56 = vmax.f32 %v4497_v52, 0.0  ;;  %v3448_v28 = vadd.f32 %v3367_v16, %v3118_v37 }
 0x426   : > { %v4349_v12 = vpop.f32.mrf.mxu2 }
 0x427   : > { %4561 = vst [vmem:[%s7352_s18 + $0x8] sm:$0xff] %v4529_v56  ;;  %v3746_v35 = vadd.f32 %v3665_v45, %v3448_v28  ;;  %v4430_v30 = vmul.f32 %v7330_v53, %v4349_v12  ;;  %v4211_v45 = vadd.f32 %v7123_v59, %v4175_v24  ;;  %v7952_v56 = vld [vmem:[#allocation60_spill] sm:$0xff]  ;;  %v7953_v24 = vld [vmem:[#allocation15_spill] sm:$0xff] }
 0x428   : > { %v2791_v28 = vadd.f32 %v7952_v56, %v2493_v33 }
 0x429   : > { %v4076_v32 = vadd.f32 %v3995_v8, %v3746_v35  ;;  %v4466_v61 = vadd.f32 %v7335_v17, %v4430_v30  ;;  %v4243_v7 = vmax.f32 %v4211_v45, 0.0  ;;  %v7954_v35 = vld [vmem:[#allocation21_spill] sm:$0xff] }
 0x42a   : > { %v2494_v1 = vadd.f32 %v7954_v35, %v7953_v24 }
 0x42b   : > { %v4176_v0 = vmul.f32 %v7115_v54, %v4076_v32  ;;  %v4498_v51 = vadd.f32 %v5362_v23, %v4466_v61  ;;  %v3121_v32 = vadd.f32 %v7235_v2, %v2791_v28 }
 0x42c   : > { %v3370_v46 = vpop.f32.mrf.mxu3 }
 0x42d   : > { %v4530_v43 = vmax.f32 %v4498_v51, 0.0  ;;  %v3449_v57 = vadd.f32 %v3370_v46, %v3119_v40  ;;  %v4212_v8 = vadd.f32 %v7123_v59, %v4176_v0  ;;  %v7955_v51 = vld [vmem:[#allocation64_spill] sm:$0xff] }
 0x42e   : > { %v4351_v10 = vpop.f32.mrf.mxu2  ;;  %v2792_v40 = vadd.f32 %v7955_v51, %v2494_v1 }
 0x42f   : > { %4562 = vst [vmem:[%s7352_s18 + $0x10] sm:$0xff] %v4530_v43  ;;  %v3747_v48 = vadd.f32 %v3668_v62, %v3449_v57  ;;  %v4431_v15 = vmul.f32 %v7330_v53, %v4351_v10  ;;  %v4244_v44 = vmax.f32 %v4212_v8, 0.0  ;;  %v4003_v62 = vpop.f32.mrf.mxu1  ;;  %v7956_v10 = vld [vmem:[#allocation59_spill] sm:$0xff] }
 0x430   : > { %v2495_v21 = vadd.f32 %v7957_v19, %v7956_v10 }
 0x431   : > { %v4467_v42 = vadd.f32 %v7335_v17, %v4431_v15  ;;  %v4265_v6 = vpack.c.bf16 %v4244_v44, %v4243_v7  ;;  %v4077_v34 = vadd.f32 %v3998_v41, %v3747_v48  ;;  %v5365_v15 = vld [vmem:[%s5591_s12 + $0x28] sm:$0xff]  ;;  %v3122_v44 = vadd.f32 %v7251_v5, %v2792_v40  ;;  %v7959_v5 = vld [vmem:[#allocation17_spill] sm:$0xff]  ;;  %v5367_v40 = vld [vmem:[%s5591_s12 + $0x38] sm:$0xff] }
 0x433   : > { %v4499_v22 = vadd.f32 %v5363_v55, %v4467_v42  ;;  %4393 = vmatmul.bf16.gmra.mxu2 %v4265_v6  ;;  %v4177_v52 = vmul.f32 %v7115_v54, %v4077_v34 }
 0x434   : > { %v3372_v47 = vpop.f32.mrf.mxu3 }
 0x435   : > { %v4531_v20 = vmax.f32 %v4499_v22, 0.0  ;;  %v3450_v38 = vadd.f32 %v3372_v47, %v3120_v31  ;;  %v4213_v61 = vadd.f32 %v7123_v59, %v4177_v52  ;;  %v7958_v22 = vld [vmem:[#allocation47_spill] sm:$0xff] }
 0x436   : > { %v4354_v63 = vpop.f32.mrf.mxu2  ;;  %v2793_v31 = vadd.f32 %v7958_v22, %v2495_v21 }
 0x437   : > { %4563 = vst [vmem:[%s7352_s18 + $0x18] sm:$0xff] %v4531_v20  ;;  %v3748_v37 = vadd.f32 %v3670_v26, %v3450_v38  ;;  %v4432_v16 = vmul.f32 %v7330_v53, %v4354_v63  ;;  %v3675_v26 = vpop.f32.mrf.mxu0  ;;  %v4005_v0 = vpop.f32.mrf.mxu1  ;;  %v4245_v43 = vmax.f32 %v4213_v61, 0.0  ;;  %v7960_v38 = vld [vmem:[#allocation23_spill] sm:$0xff] }
 0x438   : > { %v2496_v63 = vadd.f32 %v7960_v38, %v7959_v5  ;;  %v3123_v56 = vadd.f32 %v7267_v29, %v2793_v31  ;;  %v7967_v38 = vld [vmem:[#allocation36_spill] sm:$0xff] }
 0x439   : > { %v4078_v41 = vadd.f32 %v4000_v36, %v3748_v37  ;;  %v4468_v12 = vadd.f32 %v7335_v17, %v4432_v16  ;;  %v5366_v37 = vld [vmem:[%s5591_s12 + $0x30] sm:$0xff] }
 0x43b   : > { %v4178_v30 = vmul.f32 %v7115_v54, %v4078_v41  ;;  %v4500_v60 = vadd.f32 %v5364_v50, %v4468_v12 }
 0x43c   : > { %v3375_v9 = vpop.f32.mrf.mxu3 }
 0x43d   : > { %v4532_v11 = vmax.f32 %v4500_v60, 0.0  ;;  %v3451_v58 = vadd.f32 %v3375_v9, %v3121_v32  ;;  %v4214_v36 = vadd.f32 %v7123_v59, %v4178_v30  ;;  %v7961_v30 = vld [vmem:[#allocation73_spill] sm:$0xff] }
 0x43e   : > { %v4356_v23 = vpop.f32.mrf.mxu2  ;;  %v2794_v50 = vadd.f32 %v7961_v30, %v2496_v63 }
 0x43f   : > { %4564 = vst [vmem:[%s7352_s18 + $0x20] sm:$0xff] %v4532_v11  ;;  %v3749_v45 = vadd.f32 %v3673_v4, %v3451_v58  ;;  %v4433_v46 = vmul.f32 %v7330_v53, %v4356_v23  ;;  %v4246_v2 = vmax.f32 %v4214_v36, 0.0  ;;  %v3678_v14 = vpop.f32.mrf.mxu0  ;;  %v7962_v36 = vld [vmem:[#allocation68_spill] sm:$0xff] }
 0x441   : > { %v4469_v57 = vadd.f32 %v7335_v17, %v4433_v46  ;;  %v4266_v8 = vpack.c.bf16 %v4246_v2, %v4245_v43  ;;  %v4079_v48 = vadd.f32 %v4003_v62, %v3749_v45  ;;  %v4008_v62 = vpop.f32.mrf.mxu1  ;;  %v3124_v46 = vadd.f32 %v7277_v49, %v2794_v50 }
 0x443   : > { %v4501_v7 = vadd.f32 %v5365_v15, %v4469_v57  ;;  %4398 = vmatmul.bf16.gmra.mxu2 %v4266_v8  ;;  %v4179_v33 = vmul.f32 %v7115_v54, %v4079_v48  ;;  %v7964_v48 = vld [vmem:[#allocation67_spill] sm:$0xff] }
 0x444   : > { %v3377_v42 = vpop.f32.mrf.mxu3 }
 0x445   : > { %v4533_v6 = vmax.f32 %v4501_v7, 0.0  ;;  %v3452_v4 = vadd.f32 %v3377_v42, %v3122_v44  ;;  %v4215_v28 = vadd.f32 %v7123_v59, %v4179_v33 }
 0x446   : > { %v4359_v39 = vpop.f32.mrf.mxu2 }
 0x447   : > { %4565 = vst [vmem:[%s7352_s18 + $0x28] sm:$0xff] %v4533_v6  ;;  %v3750_v34 = vadd.f32 %v3675_v26, %v3452_v4  ;;  %v4434_v55 = vmul.f32 %v7330_v53, %v4359_v39  ;;  %v4247_v61 = vmax.f32 %v4215_v28, 0.0  ;;  %v3680_v9 = vpop.f32.mrf.mxu0  ;;  %v7965_v6 = vld [vmem:[#allocation19_spill] sm:$0xff]  ;;  %v7966_v4 = vld [vmem:[#allocation20_spill] sm:$0xff]  ;;  %v5368_v39 = vld [vmem:[%s5591_s12 + $0x40] sm:$0xff] }
 0x448   : > { %v2498_v49 = vadd.f32 %v7966_v4, %v7965_v6 }
 0x449   : > { %v4080_v47 = vadd.f32 %v4005_v0, %v3750_v34  ;;  %v4470_v20 = vadd.f32 %v7335_v17, %v4434_v55  ;;  %v4010_v58 = vpop.f32.mrf.mxu1  ;;  %v7963_v0 = vld [vmem:[#allocation97_spill] sm:$0xff] }
 0x44a   : > { %v2497_v23 = vadd.f32 %v7963_v0, %v7962_v36  ;;  %v2796_v63 = vadd.f32 %v7967_v38, %v2498_v49  ;;  %v7970_v0 = vld [vmem:[#allocation7_spill] sm:$0xff] }
 0x44b   : > { %v4180_v52 = vmul.f32 %v7115_v54, %v4080_v47  ;;  %v4502_v16 = vadd.f32 %v5366_v37, %v4470_v20 }
 0x44c   : > { %v3380_v41 = vpop.f32.mrf.mxu3  ;;  %v2795_v15 = vadd.f32 %v7964_v48, %v2497_v23  ;;  %v3126_v50 = vadd.f32 %v7299_v13, %v2796_v63  ;;  %v7971_v13 = vld [vmem:[#allocation33_spill] sm:$0xff] }
 0x44d   : > { %v4534_v12 = vmax.f32 %v4502_v16, 0.0  ;;  %v3453_v24 = vadd.f32 %v3380_v41, %v3123_v56  ;;  %v4216_v35 = vadd.f32 %v7123_v59, %v4180_v52  ;;  %v7968_v41 = vld [vmem:[#allocation82_spill] sm:$0xff] }
 0x44e   : > { %v4361_v1 = vpop.f32.mrf.mxu2  ;;  %v3125_v34 = vadd.f32 %v7291_v25, %v2795_v15 }
 0x44f   : > { %4566 = vst [vmem:[%s7352_s18 + $0x30] sm:$0xff] %v4534_v12  ;;  %v3751_v60 = vadd.f32 %v3678_v14, %v3453_v24  ;;  %v4435_v32 = vmul.f32 %v7330_v53, %v4361_v1  ;;  %v4248_v26 = vmax.f32 %v4216_v35, 0.0  ;;  %v3683_v42 = vpop.f32.mrf.mxu0  ;;  %v7969_v12 = vld [vmem:[#allocation34_spill] sm:$0xff] }
 0x450   : > { %v2499_v24 = vadd.f32 %v7969_v12, %v7968_v41  ;;  %v5369_v1 = vld [vmem:[%s5591_s12 + $0x48] sm:$0xff] }
 0x451   : > { %v4471_v29 = vadd.f32 %v7335_v17, %v4435_v32  ;;  %v4267_v11 = vpack.c.bf16 %v4248_v26, %v4247_v61  ;;  %v4081_v51 = vadd.f32 %v4008_v62, %v3751_v60  ;;  %v4013_v22 = vpop.f32.mrf.mxu1 }
 0x452   : > { %v2797_v23 = vadd.f32 %v7970_v0, %v2499_v24 }
 0x453   : > { %v4503_v45 = vadd.f32 %v5367_v40, %v4471_v29  ;;  %4403 = vmatmul.bf16.gmra.mxu2 %v4267_v11  ;;  %v4181_v10 = vmul.f32 %v7115_v54, %v4081_v51 }
 0x454   : > { %v3382_v43 = vpop.f32.mrf.mxu3 }
 0x455   : > { %v4535_v2 = vmax.f32 %v4503_v45, 0.0  ;;  %v3454_v57 = vadd.f32 %v3382_v43, %v3124_v46  ;;  %v4217_v55 = vadd.f32 %v7123_v59, %v4181_v10  ;;  %v2500_v45 = vadd.f32 %v7971_v13, %v7092_v27  ;;  %v5370_v43 = vld [vmem:[%s5591_s12 + $0x50] sm:$0xff] }
 0x456   : > { %v4364_v8 = vpop.f32.mrf.mxu2 }
 0x457   : > { %4567 = vst [vmem:[%s7352_s18 + $0x38] sm:$0xff] %v4535_v2  ;;  %v3752_v19 = vadd.f32 %v3680_v9, %v3454_v57  ;;  %v4436_v21 = vmul.f32 %v7330_v53, %v4364_v8  ;;  %v4249_v16 = vmax.f32 %v4217_v55, 0.0  ;;  %v3685_v60 = vpop.f32.mrf.mxu0  ;;  %v3127_v57 = vadd.f32 %v7311_v18, %v2797_v23 }
 0x459   : > { %v4082_v7 = vadd.f32 %v4010_v58, %v3752_v19  ;;  %v4472_v44 = vadd.f32 %v7335_v17, %v4436_v21  ;;  %v4015_v9 = vpop.f32.mrf.mxu1 }
 0x45b   : > { %v4182_v14 = vmul.f32 %v7115_v54, %v4082_v7  ;;  %v4504_v33 = vadd.f32 %v5368_v39, %v4472_v44 }
 0x45c   : > { %v3385_v31 = vpop.f32.mrf.mxu3 }
 0x45d   : > { %v4536_v62 = vmax.f32 %v4504_v33, 0.0  ;;  %v3455_v47 = vadd.f32 %v3385_v31, %v3125_v34  ;;  %v4218_v20 = vadd.f32 %v7123_v59, %v4182_v14  ;;  %v5371_v33 = vld [vmem:[%s5591_s12 + $0x58] sm:$0xff] }
 0x45e   : > { %v4366_v5 = vpop.f32.mrf.mxu2 }
 0x45f   : > { %4568 = vst [vmem:[%s7352_s18 + $0x40] sm:$0xff] %v4536_v62  ;;  %v3753_v52 = vadd.f32 %v3683_v42, %v3455_v47  ;;  %v4437_v37 = vmul.f32 %v7330_v53, %v4366_v5  ;;  %v4250_v56 = vmax.f32 %v4218_v20, 0.0  ;;  %v3688_v10 = vpop.f32.mrf.mxu0  ;;  %v7972_v42 = vld [vmem:[#allocation8_spill] sm:$0xff]  ;;  %v5372_v20 = vld [vmem:[%s7585_s5] ss:$0 sm:$0xff] }
 0x460   : > { %v2798_v6 = vadd.f32 %v7972_v42, %v2500_v45  ;;  %v5377_v45 = vld [vmem:[%s5591_s12 + $0x78] sm:$0xff] }
 0x461   : > { %v4473_v25 = vadd.f32 %v7335_v17, %v4437_v37  ;;  %v4268_v28 = vpack.c.bf16 %v4250_v56, %v4249_v16  ;;  %v4083_v35 = vadd.f32 %v4013_v22, %v3753_v52  ;;  %v4018_v7 = vpop.f32.mrf.mxu1  ;;  %v5373_v56 = vld [vmem:[%s5591_s12 + $0x60] sm:$0xff] }
 0x463   : > { %v4505_v30 = vadd.f32 %v5369_v1, %v4473_v25  ;;  %4408 = vmatmul.bf16.gmra.mxu2 %v4268_v28  ;;  %v4183_v11 = vmul.f32 %v7115_v54, %v4083_v35  ;;  %v5374_v28 = vld [vmem:[%s7586_s6] ss:$0 sm:$0xff] }
 0x464   : > { %v3387_v32 = vpop.f32.mrf.mxu3 }
 0x465   : > { %v4537_v61 = vmax.f32 %v4505_v30, 0.0  ;;  %v3456_v26 = vadd.f32 %v3387_v32, %v3126_v50  ;;  %v4219_v8 = vadd.f32 %v7123_v59, %v4183_v11 }
 0x466   : > { %v4369_v29 = vpop.f32.mrf.mxu2 }
 0x467   : > { %4569 = vst [vmem:[%s7352_s18 + $0x48] sm:$0xff] %v4537_v61  ;;  %v3754_v58 = vadd.f32 %v3685_v60, %v3456_v26  ;;  %v4438_v36 = vmul.f32 %v7330_v53, %v4369_v29  ;;  %v4251_v4 = vmax.f32 %v4219_v8, 0.0  ;;  %v3690_v62 = vpop.f32.mrf.mxu0  ;;  %v5375_v61 = vld [vmem:[%s5591_s12 + $0x68] sm:$0xff] }
 0x469   : > { %v4084_v51 = vadd.f32 %v4015_v9, %v3754_v58  ;;  %v4474_v40 = vadd.f32 %v7335_v17, %v4438_v36  ;;  %v4020_v52 = vpop.f32.mrf.mxu1  ;;  %v5376_v36 = vld [vmem:[%s5591_s12 + $0x70] sm:$0xff] }
 0x46b   : > { %v4184_v46 = vmul.f32 %v7115_v54, %v4084_v51  ;;  %v4506_v2 = vadd.f32 %v5370_v43, %v4474_v40 }
 0x46c   : > { %v3390_v19 = vpop.f32.mrf.mxu3 }
 0x46d   : > { %v4538_v21 = vmax.f32 %v4506_v2, 0.0  ;;  %v3457_v48 = vadd.f32 %v3390_v19, %v3127_v57  ;;  %v4220_v15 = vadd.f32 %v7123_v59, %v4184_v46  ;;  %v3128_v59 = vadd.f32 %v7321_v3, %v2798_v6 }
 0x46e   : > { %v4371_v44 = vpop.f32.mrf.mxu2 }
 0x46f   : > { %4570 = vst [vmem:[%s7352_s18 + $0x50] sm:$0xff] %v4538_v21  ;;  %v3755_v27 = vadd.f32 %v3688_v10, %v3457_v48  ;;  %v4439_v54 = vmul.f32 %v7330_v53, %v4371_v44  ;;  %v4252_v18 = vmax.f32 %v4220_v15, 0.0  ;;  %v5378_v10 = vld [vmem:[%s5591_s12 + $0x80] sm:$0xff]  ;;  %v5379_v44 = vld [vmem:[%s5591_s12 + $0x88] sm:$0xff] }
 0x471   : > { %v4475_v49 = vadd.f32 %v7335_v17, %v4439_v54  ;;  %v4269_v14 = vpack.c.bf16 %v4252_v18, %v4251_v4  ;;  %v4085_v39 = vadd.f32 %v4018_v7, %v3755_v27  ;;  %v5380_v18 = vld [vmem:[%s5591_s12 + $0x90] sm:$0xff] }
 0x473   : > { %v4507_v34 = vadd.f32 %v5371_v33, %v4475_v49  ;;  %4413 = vmatmul.bf16.gmra.mxu2 %v4269_v14  ;;  %v4185_v5 = vmul.f32 %v5372_v20, %v4085_v39 }
 0x474   : > { %v3392_v55 = vpop.f32.mrf.mxu3 }
 0x475   : > { %v4539_v22 = vmax.f32 %v4507_v34, 0.0  ;;  %v3458_v31 = vadd.f32 %v3392_v55, %v3128_v59  ;;  %v4221_v41 = vadd.f32 %v5374_v28, %v4185_v5  ;;  %v5381_v59 = vld [vmem:[%s5591_s12 + $0x98] sm:$0xff] }
 0x476   : > { %v4374_v47 = vpop.f32.mrf.mxu2 }
 0x477   : > { %4571 = vst [vmem:[%s7352_s18 + $0x58] sm:$0xff] %v4539_v22  ;;  %v3756_v38 = vadd.f32 %v3690_v62, %v3458_v31  ;;  %v4440_v63 = vmul.f32 %v7330_v53, %v4374_v47  ;;  %v4253_v30 = vmax.f32 %v4221_v41, 0.0 }
 0x479   : > { %v4086_v37 = vadd.f32 %v4020_v52, %v3756_v38  ;;  %v4476_v3 = vadd.f32 %v7335_v17, %v4440_v63 }
 0x47b   : > { %v4186_v16 = vmul.f32 %v5372_v20, %v4086_v37  ;;  %v4508_v25 = vadd.f32 %v5373_v56, %v4476_v3  ;;  %v5382_v20 = vld [vmem:[%s5591_s12 + $0xa0] sm:$0xff]  ;;  %v5383_v3 = vld [vmem:[%s5591_s12 + $0xa8] sm:$0xff] }
 0x47d   : > { %v4540_v12 = vmax.f32 %v4508_v25, 0.0  ;;  %v4222_v24 = vadd.f32 %v5374_v28, %v4186_v16 }
 0x47e   : > { %v4376_v35 = vpop.f32.mrf.mxu2 }
 0x47f   : > { %4572 = vst [vmem:[%s7352_s18 + $0x60] sm:$0xff] %v4540_v12  ;;  %v4441_v1 = vmul.f32 %v7330_v53, %v4376_v35  ;;  %v4254_v50 = vmax.f32 %v4222_v24, 0.0  ;;  %v5384_v12 = vld [vmem:[%s5591_s12 + $0xb0] sm:$0xff] }
 0x481   : > { %v4477_v60 = vadd.f32 %v7335_v17, %v4441_v1  ;;  %v4270_v32 = vpack.c.bf16 %v4254_v50, %v4253_v30 }
 0x483   : > { %v4509_v26 = vadd.f32 %v5375_v61, %v4477_v60  ;;  %4418 = vmatmul.bf16.gmra.mxu2 %v4270_v32  ;;  %v5385_v60 = vld [vmem:[%s5591_s12 + $0xb8] sm:$0xff] }
 0x485   : > { %v4541_v9 = vmax.f32 %v4509_v26, 0.0 }
 0x486   : > { %v4379_v29 = vpop.f32.mrf.mxu2 }
 0x487   : > { %4573 = vst [vmem:[%s7352_s18 + $0x68] sm:$0xff] %v4541_v9  ;;  %v4442_v11 = vmul.f32 %v7330_v53, %v4379_v29 }
 0x489   : > { %v4478_v58 = vadd.f32 %v7335_v17, %v4442_v11  ;;  %v5386_v11 = vld [vmem:[%s5591_s12 + $0xc0] sm:$0xff] }
 0x48b   : > { %v4510_v0 = vadd.f32 %v5376_v36, %v4478_v58 }
 0x48d   : > { %v4542_v23 = vmax.f32 %v4510_v0, 0.0 }
 0x48e   : > { %v4381_v51 = vpop.f32.mrf.mxu2 }
 0x48f   : > { %4574 = vst [vmem:[%s7352_s18 + $0x70] sm:$0xff] %v4542_v23  ;;  %v4443_v40 = vmul.f32 %v7330_v53, %v4381_v51 }
 0x491   : > { %v4479_v13 = vadd.f32 %v7335_v17, %v4443_v40  ;;  %v5387_v40 = vld [vmem:[%s5591_s12 + $0xc8] sm:$0xff] }
 0x493   : > { %v4511_v46 = vadd.f32 %v5377_v45, %v4479_v13 }
 0x495   : > { %v4543_v43 = vmax.f32 %v4511_v46, 0.0 }
 0x496   : > { %v4384_v2 = vpop.f32.mrf.mxu2 }
 0x497   : > { %4575 = vst [vmem:[%s7352_s18 + $0x78] sm:$0xff] %v4543_v43  ;;  %v4444_v57 = vmul.f32 %v7330_v53, %v4384_v2 }
 0x499   : > { %v4480_v8 = vadd.f32 %v7335_v17, %v4444_v57  ;;  %v5388_v57 = vld [vmem:[%s5591_s12 + $0xd0] sm:$0xff] }
 0x49b   : > { %v4512_v19 = vadd.f32 %v5378_v10, %v4480_v8 }
 0x49d   : > { %v4544_v21 = vmax.f32 %v4512_v19, 0.0 }
 0x49e   : > { %v4386_v48 = vpop.f32.mrf.mxu2 }
 0x49f   : > { %4576 = vst [vmem:[%s7352_s18 + $0x80] sm:$0xff] %v4544_v21  ;;  %v4445_v15 = vmul.f32 %v7330_v53, %v4386_v48 }
 0x4a1   : > { %v4481_v7 = vadd.f32 %v7335_v17, %v4445_v15  ;;  %v5389_v15 = vld [vmem:[%s5591_s12 + $0xd8] sm:$0xff] }
 0x4a3   : > { %v4513_v42 = vadd.f32 %v5379_v44, %v4481_v7 }
 0x4a5   : > { %v4545_v6 = vmax.f32 %v4513_v42, 0.0 }
 0x4a6   : > { %v4389_v27 = vpop.f32.mrf.mxu2 }
 0x4a7   : > { %4577 = vst [vmem:[%s7352_s18 + $0x88] sm:$0xff] %v4545_v6  ;;  %v4446_v54 = vmul.f32 %v7330_v53, %v4389_v27 }
 0x4a9   : > { %v4482_v4 = vadd.f32 %v7335_v17, %v4446_v54  ;;  %v5390_v54 = vld [vmem:[%s5591_s12 + $0xe0] sm:$0xff] }
 0x4ab   : > { %v4514_v49 = vadd.f32 %v5380_v18, %v4482_v4 }
 0x4ad   : > { %v4546_v14 = vmax.f32 %v4514_v49, 0.0 }
 0x4ae   : > { %v4391_v39 = vpop.f32.mrf.mxu2 }
 0x4af   : > { %4578 = vst [vmem:[%s7352_s18 + $0x90] sm:$0xff] %v4546_v14  ;;  %v4447_v33 = vmul.f32 %v7330_v53, %v4391_v39 }
 0x4b1   : > { %v4483_v34 = vadd.f32 %v7335_v17, %v4447_v33  ;;  %v5391_v33 = vld [vmem:[%s5591_s12 + $0xe8] sm:$0xff] }
 0x4b3   : > { %v4515_v55 = vadd.f32 %v5381_v59, %v4483_v34 }
 0x4b5   : > { %v4547_v22 = vmax.f32 %v4515_v55, 0.0 }
 0x4b6   : > { %v4394_v31 = vpop.f32.mrf.mxu2 }
 0x4b7   : > { %4579 = vst [vmem:[%s7352_s18 + $0x98] sm:$0xff] %v4547_v22  ;;  %v4448_v62 = vmul.f32 %v7330_v53, %v4394_v31 }
 0x4b9   : > { %v4484_v47 = vadd.f32 %v7335_v17, %v4448_v62  ;;  %v5392_v62 = vld [vmem:[%s5591_s12 + $0xf0] sm:$0xff] }
 0x4bb   : > { %v4516_v5 = vadd.f32 %v5382_v20, %v4484_v47 }
 0x4bd   : > { %v4548_v38 = vmax.f32 %v4516_v5, 0.0 }
 0x4be   : > { %v4396_v63 = vpop.f32.mrf.mxu2 }
 0x4bf   : > { %4580 = vst [vmem:[%s7352_s18 + $0xa0] sm:$0xff] %v4548_v38  ;;  %v4449_v52 = vmul.f32 %v7330_v53, %v4396_v63 }
 0x4c1   : > { %v4485_v37 = vadd.f32 %v7335_v17, %v4449_v52  ;;  %v5393_v52 = vld [vmem:[%s5591_s12 + $0xf8] sm:$0xff] }
 0x4c3   : > { %v4517_v16 = vadd.f32 %v5383_v3, %v4485_v37 }
 0x4c5   : > { %v4549_v56 = vmax.f32 %v4517_v16, 0.0 }
 0x4c6   : > { %v4399_v25 = vpop.f32.mrf.mxu2 }
 0x4c7   : > { %4581 = vst [vmem:[%s7352_s18 + $0xa8] sm:$0xff] %v4549_v56  ;;  %v4450_v28 = vmul.f32 %v7330_v53, %v4399_v25 }
 0x4c9   : > { %v4486_v41 = vadd.f32 %v7335_v17, %v4450_v28 }
 0x4cb   : > { %v4518_v24 = vadd.f32 %v5384_v12, %v4486_v41 }
 0x4cd   : > { %v4550_v35 = vmax.f32 %v4518_v24, 0.0 }
 0x4ce   : > { %v4401_v1 = vpop.f32.mrf.mxu2 }
 0x4cf   : > { %4582 = vst [vmem:[%s7352_s18 + $0xb0] sm:$0xff] %v4550_v35  ;;  %v4451_v30 = vmul.f32 %v7330_v53, %v4401_v1 }
 0x4d1   : > { %v4487_v50 = vadd.f32 %v7335_v17, %v4451_v30 }
 0x4d3   : > { %v4519_v32 = vadd.f32 %v5385_v60, %v4487_v50 }
 0x4d5   : > { %v4551_v61 = vmax.f32 %v4519_v32, 0.0 }
 0x4d6   : > { %v4404_v26 = vpop.f32.mrf.mxu2 }
 0x4d7   : > { %4583 = vst [vmem:[%s7352_s18 + $0xb8] sm:$0xff] %v4551_v61  ;;  %v4452_v9 = vmul.f32 %v7330_v53, %v4404_v26 }
 0x4d9   : > { %v4488_v29 = vadd.f32 %v7335_v17, %v4452_v9 }
 0x4db   : > { %v4520_v58 = vadd.f32 %v5386_v11, %v4488_v29 }
 0x4dd   : > { %v4552_v36 = vmax.f32 %v4520_v58, 0.0 }
 0x4de   : > { %v4406_v0 = vpop.f32.mrf.mxu2 }
 0x4df   : > { %4584 = vst [vmem:[%s7352_s18 + $0xc0] sm:$0xff] %v4552_v36  ;;  %v4453_v23 = vmul.f32 %v7330_v53, %v4406_v0 }
 0x4e1   : > { %v4489_v51 = vadd.f32 %v7335_v17, %v4453_v23 }
 0x4e3   : > { %v4521_v13 = vadd.f32 %v5387_v40, %v4489_v51 }
 0x4e5   : > { %v4553_v45 = vmax.f32 %v4521_v13, 0.0 }
 0x4e6   : > { %v4409_v46 = vpop.f32.mrf.mxu2 }
 0x4e7   : > { %4585 = vst [vmem:[%s7352_s18 + $0xc8] sm:$0xff] %v4553_v45  ;;  %v4454_v43 = vmul.f32 %v7330_v53, %v4409_v46 }
 0x4e9   : > { %v4490_v2 = vadd.f32 %v7335_v17, %v4454_v43 }
 0x4eb   : > { %v4522_v8 = vadd.f32 %v5388_v57, %v4490_v2 }
 0x4ed   : > { %v4554_v10 = vmax.f32 %v4522_v8, 0.0 }
 0x4ee   : > { %v4411_v19 = vpop.f32.mrf.mxu2 }
 0x4ef   : > { %4586 = vst [vmem:[%s7352_s18 + $0xd0] sm:$0xff] %v4554_v10  ;;  %v4455_v21 = vmul.f32 %v7330_v53, %v4411_v19 }
 0x4f1   : > { %v4491_v48 = vadd.f32 %v7335_v17, %v4455_v21 }
 0x4f3   : > { %v4523_v7 = vadd.f32 %v5389_v15, %v4491_v48 }
 0x4f5   : > { %v4555_v44 = vmax.f32 %v4523_v7, 0.0 }
 0x4f6   : > { %v4414_v42 = vpop.f32.mrf.mxu2 }
 0x4f7   : > { %4587 = vst [vmem:[%s7352_s18 + $0xd8] sm:$0xff] %v4555_v44  ;;  %v4456_v6 = vmul.f32 %v7330_v53, %v4414_v42 }
 0x4f9   : > { %v4492_v27 = vadd.f32 %v7335_v17, %v4456_v6 }
 0x4fb   : > { %v4524_v4 = vadd.f32 %v5390_v54, %v4492_v27 }
 0x4fd   : > { %v4556_v18 = vmax.f32 %v4524_v4, 0.0 }
 0x4fe   : > { %v4416_v49 = vpop.f32.mrf.mxu2 }
 0x4ff   : > { %4588 = vst [vmem:[%s7352_s18 + $0xe0] sm:$0xff] %v4556_v18  ;;  %v4457_v14 = vmul.f32 %v7330_v53, %v4416_v49 }
 0x501   : > { %v4493_v39 = vadd.f32 %v7335_v17, %v4457_v14 }
 0x503   : > { %v4525_v34 = vadd.f32 %v5391_v33, %v4493_v39 }
 0x505   : > { %v4557_v59 = vmax.f32 %v4525_v34, 0.0 }
 0x506   : > { %v4419_v55 = vpop.f32.mrf.mxu2 }
 0x507   : > { %4589 = vst [vmem:[%s7352_s18 + $0xe8] sm:$0xff] %v4557_v59  ;;  %v4458_v22 = vmul.f32 %v7330_v53, %v4419_v55 }
 0x509   : > { %v4494_v31 = vadd.f32 %v7335_v17, %v4458_v22 }
 0x50b   : > { %v4526_v47 = vadd.f32 %v5392_v62, %v4494_v31 }
 0x50d   : > { %v4558_v20 = vmax.f32 %v4526_v47, 0.0 }
 0x50e   : > { %v4421_v5 = vpop.f32.mrf.mxu2 }
 0x50f   : > { %4590 = vst [vmem:[%s7352_s18 + $0xf0] sm:$0xff] %v4558_v20  ;;  %v4459_v38 = vmul.f32 %v7330_v53, %v4421_v5 }
 0x511   : > { %v4495_v63 = vadd.f32 %v7335_v17, %v4459_v38 }
 0x513   : > { %v4527_v37 = vadd.f32 %v5393_v52, %v4495_v63 }
 0x515   : > { %v4559_v3 = vmax.f32 %v4527_v37, 0.0 }
 0x517   : > { %4591 = vst [vmem:[%s7352_s18 + $0xf8] sm:$0xff] %v4559_v3 }
 0x518   : > { %5421 = shalt.err (!%p5418_p3)
}
 0x519   : > { %s5460_s30 = smov 128   ;;  %s5461_s18 = smov 8  }
 0x51a   : > { %5308 = dma.vmem_to_hbm [thread:$0]  (%p5555_p5), %s4606_s20, 4096, %s4608_s21, %s4593_s17, %s5460_s30, %s5460_s30, %s5461_s18  }
 0x51b PF: > { %p5314_p4 = scmp.ge.s32.totalorder %s5456_s16, 2  ;;  %s4622_s27 = sand.u32 1, %s5444_s13  }
 0x51c   : > { %s4623_s28 = scalar_lea.sflag [#allocation5], %s4622_s27 }
 0x51d   : > { %p5311_p7 = pnand %p5314_p4, %p5559_p6 }
 0x51f   : > { %p5312_p8 = pneg %p5311_p7 }
 0x521   : > { %5439 = dma.done.wait (%p5312_p8), %s4623_s28, 4096  }
 0x522   : > { %5441 = vsyncadd (%p5312_p8), %s4623_s28, 4294963200  ;;  %p20_p9 = scmp.ge.s32.totalorder %s5542_s19, 4   ;;  %s7973_s13 = smov %s5448_s14 }
 0x523   : > { %s7974_s14 = smov %s5452_s15  ;;  %s7975_s15 = smov %s5553_s22 }
 0x524   : > { %s7976_s16 = smov %s5542_s19  ;;  %22 = sbr.rel (!%p20_p9) target bundleno = 3 (0x3), region = 103 }
 0x529   :  { %4629 = vsyncpa [#allocation5], 1 }
 0x52a   :  { %4631 = vsyncpa [#allocation5 + $0x1], 1 }

</bundles_post_ra>
